<compile_context>
chip_gen: v7x
topology: tpu7x:2x2x1
jax: 0.10.0
libtpu: 0.0.40
codegen_flags: <defaults>
</compile_context>

<pallas_src>
import functools

import jax
import jax.numpy as jnp
from jax.experimental import pallas as pl
from jax.experimental.pallas import tpu as pltpu


# --------------------------- tile-size selection -----------------------------

def _round_up(x, m):
    return (x + m - 1) // m * m


def _mxu_tile():
    """128 for older generations (4x128^2 MXU), 256 for v6e/v7x (2x256^2 MXU)."""
    try:
        kind = jax.devices()[0].device_kind.lower()
    except Exception:
        return 256
    for tag in ("v2", "v3", "v4", "v5 lite", "v5e", "v5lite"):
        if tag in kind:
            return 128
    return 256


_TM_PREF = _TN_PREF = _mxu_tile()
_TK_PREF = 512


def _pick_tile(dim, pref, align):
    """Largest multiple of `align` that divides `dim` and is <= pref (fallback: align)."""
    best = align
    t = align
    limit = min(pref, dim)
    while t <= limit:
        if dim % t == 0:
            best = t
        t += align
    return best


# --------------------------- fused matmul kernel ------------------------------

def _matmul_bn_act_kernel(x_ref, w_ref, scale_ref, shift_ref, *rest, act, has_residual):
    """acc += x @ w over the K grid axis; epilogue: acc*scale + shift (+res) (+relu)."""
    if has_residual:
        res_ref, o_ref, acc_ref = rest
    else:
        o_ref, acc_ref = rest

    k = pl.program_id(2)

    @pl.when(k == 0)
    def _init():
        acc_ref[...] = jnp.zeros_like(acc_ref)

    acc_ref[...] += jnp.dot(x_ref[...], w_ref[...], preferred_element_type=jnp.float32)

    @pl.when(k == pl.num_programs(2) - 1)
    def _finalize():
        out = acc_ref[...] * scale_ref[...] + shift_ref[...]
        if has_residual:
            out = out + res_ref[...].astype(jnp.float32)
        if act == "relu":
            out = jnp.maximum(out, 0.0)
        o_ref[...] = out.astype(o_ref.dtype)


@functools.lru_cache(maxsize=None)
def _build_matmul(Mp, Kp, Np, tm, tk, tn, act, has_residual):
    kernel = functools.partial(_matmul_bn_act_kernel, act=act, has_residual=has_residual)
    in_specs = [
        pl.BlockSpec((tm, tk), lambda i, j, k: (i, k)),   # activations (bf16)
        pl.BlockSpec((tk, tn), lambda i, j, k: (k, j)),   # weights     (bf16)
        pl.BlockSpec((1, tn), lambda i, j, k: (0, j)),    # bn scale    (f32)
        pl.BlockSpec((1, tn), lambda i, j, k: (0, j)),    # bn shift    (f32)
    ]
    if has_residual:
        in_specs.append(pl.BlockSpec((tm, tn), lambda i, j, k: (i, j)))  # residual (bf16)
    grid_spec = pltpu.PrefetchScalarGridSpec(
        num_scalar_prefetch=0,
        grid=(Mp // tm, Np // tn, Kp // tk),
        in_specs=in_specs,
        out_specs=pl.BlockSpec((tm, tn), lambda i, j, k: (i, j)),
        scratch_shapes=[pltpu.VMEM((tm, tn), jnp.float32)],
    )
    return pl.pallas_call(
        kernel,
        out_shape=jax.ShapeDtypeStruct((Mp, Np), jnp.float32),
        grid_spec=grid_spec,
        compiler_params=pltpu.CompilerParams(
            dimension_semantics=("parallel", "parallel", "arbitrary")),
    )


def matmul_bn_act(x, w, scale, shift, residual=None, act="relu"):
    """out = act((x @ w) * scale + shift [+ residual]) with f32 accumulation."""
    M, K = x.shape
    K2, N = w.shape
    assert K2 == K

    Mp = _round_up(M, 8)
    Kp = _round_up(K, 128)
    Np = _round_up(N, 128)
    tm = _pick_tile(Mp, _TM_PREF, 8)
    tk = _pick_tile(Kp, _TK_PREF, 128)
    tn = _pick_tile(Np, _TN_PREF, 128)

    xb = jnp.pad(x.astype(jnp.bfloat16), ((0, Mp - M), (0, Kp - K)))
    wb = jnp.pad(w.astype(jnp.bfloat16), ((0, Kp - K), (0, Np - N)))
    sc = jnp.pad(jnp.asarray(scale, jnp.float32).reshape(1, N), ((0, 0), (0, Np - N)))
    sh = jnp.pad(jnp.asarray(shift, jnp.float32).reshape(1, N), ((0, 0), (0, Np - N)))

    fn = _build_matmul(Mp, Kp, Np, tm, tk, tn, act, residual is not None)
    if residual is None:
        out = fn(xb, wb, sc, sh)
    else:
        rb = jnp.pad(residual.astype(jnp.bfloat16), ((0, Mp - M), (0, Np - N)))
        out = fn(xb, wb, sc, sh, rb)
    return out[:M, :N]


# --------------------------- conv glue (im2col) -------------------------------

def im2col(x, k, stride, pad):
    """x: (N,H,W,C) NHWC -> patches (N*Ho*Wo, k*k*C)."""
    N, H, W, C = x.shape
    if pad > 0:
        x = jnp.pad(x, ((0, 0), (pad, pad), (pad, pad), (0, 0)))
    Hp, Wp = H + 2 * pad, W + 2 * pad
    Ho = (Hp - k) // stride + 1
    Wo = (Wp - k) // stride + 1
    if k == 1:
        if stride != 1:
            x = x[:, ::stride, ::stride, :]
        return x.reshape(N * Ho * Wo, C), (N, Ho, Wo)
    cols = []
    for dy in range(k):
        for dx in range(k):
            cols.append(x[:, dy:dy + stride * (Ho - 1) + 1:stride,
                          dx:dx + stride * (Wo - 1) + 1:stride, :])
    patches = jnp.stack(cols, axis=3)                       # (N,Ho,Wo,k*k,C)
    # TODO(synk): fuse this 3x3 patch gather into the matmul kernel (manual DMA of
    # overlapping row windows) to avoid writing k*k copies of the activation to HBM;
    # for now the gather is at least fused under one jit with the pallas_call operand.
    return patches.reshape(N * Ho * Wo, k * k * C), (N, Ho, Wo)


def conv_bn_act(x, w, scale, shift, stride=1, pad=0, act="relu", residual=None):
    """NHWC conv (weights (kh,kw,cin,cout)) + folded-BN affine + optional residual + act."""
    kh, _, cin, cout = w.shape
    cols, (N, Ho, Wo) = im2col(x, kh, stride, pad)
    w2 = w.reshape(kh * kh * cin, cout)
    res = residual.reshape(N * Ho * Wo, cout) if residual is not None else None
    y = matmul_bn_act(cols, w2, scale, shift, residual=res, act=act)
    return y.reshape(N, Ho, Wo, cout)


def fold_bn(bn, conv_bias, eps=1e-5):
    """Inference-mode BatchNorm folded to per-channel scale/shift (conv bias included)."""
    scale = bn["gamma"] / jnp.sqrt(bn["var"] + eps)
    bias = conv_bias if conv_bias is not None else 0.0
    shift = bn["beta"] + (bias - bn["mean"]) * scale
    return scale, shift


# --------------------------- Bottleneck forward -------------------------------

def bottleneck_forward(params, x_nchw, *, stride):
    """Matches Bottleneck.forward (BatchNorm in inference mode, dropout-free)."""
    x = jnp.transpose(x_nchw, (0, 2, 3, 1)).astype(jnp.float32)    # NCHW -> NHWC
    identity = x

    s1, b1 = fold_bn(params["bn1"], params["c1_b"])
    out = conv_bn_act(x, params["c1_w"], s1, b1, stride=1, pad=0, act="relu")

    s2, b2 = fold_bn(params["bn2"], params["c2_b"])
    out = conv_bn_act(out, params["c2_w"], s2, b2, stride=stride, pad=1, act="relu")

    if "ds_w" in params:
        sd, bd = fold_bn(params["ds_bn"], params["ds_b"])
        identity = conv_bn_act(x, params["ds_w"], sd, bd, stride=stride, pad=0, act="none")

    s3, b3 = fold_bn(params["bn3"], params["c3_b"])
    # conv3 + bn3 + residual add + relu fused into a single Pallas kernel epilogue.
    out = conv_bn_act(out, params["c3_w"], s3, b3, stride=1, pad=0, act="relu",
                      residual=identity)
    return jnp.transpose(out, (0, 3, 1, 2))                        # NHWC -> NCHW


# --------------------------- reference (pure XLA, f32) -------------------------

def _reference_bottleneck(params, x_nchw, stride):
    def conv(x, w_hwio, b, s, p):
        y = jax.lax.conv_general_dilated(
            x, w_hwio, (s, s), [(p, p), (p, p)],
            dimension_numbers=("NCHW", "HWIO", "NCHW"))
        return y + b[None, :, None, None]

    def bn(x, p, eps=1e-5):
        sc = p["gamma"] / jnp.sqrt(p["var"] + eps)
        return ((x - p["mean"][None, :, None, None]) * sc[None, :, None, None]
                + p["beta"][None, :, None, None])

    out = jax.nn.relu(bn(conv(x_nchw, params["c1_w"], params["c1_b"], 1, 0), params["bn1"]))
    out = jax.nn.relu(bn(conv(out, params["c2_w"], params["c2_b"], stride, 1), params["bn2"]))
    out = bn(conv(out, params["c3_w"], params["c3_b"], 1, 0), params["bn3"])
    identity = x_nchw
    if "ds_w" in params:
        identity = bn(conv(x_nchw, params["ds_w"], params["ds_b"], stride, 0), params["ds_bn"])
    return jax.nn.relu(out + identity)


# --------------------------- deterministic parameter init ----------------------

class ParamGen:
    def __init__(self, key):
        self._key = key

    def _next(self):
        self._key, k = jax.random.split(self._key)
        return k

    def normal(self, shape, scale=0.05):
        return scale * jax.random.normal(self._next(), shape, dtype=jnp.float32)

    def uniform(self, shape, lo, hi):
        return jax.random.uniform(self._next(), shape, jnp.float32, lo, hi)


def init_bn(pg, c):
    return {"gamma": pg.uniform((c,), 0.5, 1.5), "beta": pg.normal((c,), 0.05),
            "mean": pg.normal((c,), 0.05), "var": pg.uniform((c,), 0.5, 1.5)}


def init_bottleneck_params(pg, in_channels, planes, stride):
    expansion = 4
    p = {
        "c1_w": pg.normal((1, 1, in_channels, planes)),
        "c1_b": pg.normal((planes,), 0.02),
        "bn1": init_bn(pg, planes),
        "c2_w": pg.normal((3, 3, planes, planes)),
        "c2_b": pg.normal((planes,), 0.02),
        "bn2": init_bn(pg, planes),
        "c3_w": pg.normal((1, 1, planes, planes * expansion)),
        "c3_b": pg.normal((planes * expansion,), 0.02),
        "bn3": init_bn(pg, planes * expansion),
    }
    if stride != 1 or in_channels != planes * expansion:
        p["ds_w"] = pg.normal((1, 1, in_channels, planes * expansion))
        p["ds_b"] = pg.normal((planes * expansion,), 0.02)
        p["ds_bn"] = init_bn(pg, planes * expansion)
    return p


# --------------------------- demo ---------------------------------------------

if __name__ == "__main__":
    in_channels, planes, stride = 64, 64, 1
    B, H, W = 2, 16, 16

    key = jax.random.PRNGKey(0)
    k_params, k_x = jax.random.split(key)
    params = init_bottleneck_params(ParamGen(k_params), in_channels, planes, stride)
    x = jax.random.normal(k_x, (B, in_channels, H, W), jnp.float32)

    fwd = jax.jit(functools.partial(bottleneck_forward, stride=stride))
    out = fwd(params, x)
    jax.block_until_ready(out)

    ref = _reference_bottleneck(params, x, stride)
    err = float(jnp.max(jnp.abs(out - ref)))

    assert out.shape == (B, planes * 4, H // stride, W // stride), out.shape
    assert err < 5e-2, f"max abs err vs f32 reference: {err}"
    print("KERNEL_OK")
</pallas_src>

<mosaic_0001>
module attributes {stable_mosaic.version = 11 : i64} {
  func.func @_matmul_bn_act_kernel(%arg0: i32, %arg1: i32, %arg2: i32, %arg3: memref<256x128xbf16, #tpu.memory_space<vmem>>, %arg4: memref<128x128xbf16, #tpu.memory_space<vmem>>, %arg5: memref<1x128xf32, #tpu.memory_space<vmem>>, %arg6: memref<1x128xf32, #tpu.memory_space<vmem>>, %arg7: memref<256x128xf32, #tpu.memory_space<vmem>>, %arg8: memref<256x128xf32, #tpu.memory_space<vmem>>) attributes {dimension_semantics = [#tpu.dimension_semantics<parallel>, #tpu.dimension_semantics<parallel>, #tpu.dimension_semantics<arbitrary>], iteration_bounds = array<i64: 2, 1, 1>, scalar_prefetch = 0 : i64, scratch_operands = 1 : i64, tpu.core_type = #tpu.core_type<tc>, window_params = [{transform_indices = @transform_0, window_bounds = array<i64: 256, 128>}, {transform_indices = @transform_1, window_bounds = array<i64: 128, 128>}, {transform_indices = @transform_2, window_bounds = array<i64: 1, 128>}, {transform_indices = @transform_3, window_bounds = array<i64: 1, 128>}, {transform_indices = @transform_4, window_bounds = array<i64: 256, 128>}]} {
    %c0_i32 = arith.constant 0 : i32
    %0 = arith.cmpi eq, %arg2, %c0_i32 : i32
    %1 = arith.extui %0 : i1 to i32
    %c0_i32_0 = arith.constant 0 : i32
    %2 = arith.cmpi ne, %1, %c0_i32_0 : i32
    scf.if %2 {
      %cst_10 = arith.constant 0.000000e+00 : f32
      %12 = vector.broadcast %cst_10 : f32 to vector<256x128xf32>
      %c0_11 = arith.constant 0 : index
      %c0_12 = arith.constant 0 : index
      %13 = vector.load %arg8[%c0_11, %c0_12] : memref<256x128xf32, #tpu.memory_space<vmem>>, vector<256x128xf32>
      tpu.vector_store %arg8[%c0_11, %c0_12], %12 {strides = array<i32>} : memref<256x128xf32, #tpu.memory_space<vmem>>, vector<256x128xf32>,
    } else {
    }
    %c0 = arith.constant 0 : index
    %c0_1 = arith.constant 0 : index
    %3 = vector.load %arg8[%c0, %c0_1] : memref<256x128xf32, #tpu.memory_space<vmem>>, vector<256x128xf32>
    %c0_2 = arith.constant 0 : index
    %c0_3 = arith.constant 0 : index
    %4 = vector.load %arg3[%c0_2, %c0_3] : memref<256x128xbf16, #tpu.memory_space<vmem>>, vector<256x128xbf16>
    %c0_4 = arith.constant 0 : index
    %c0_5 = arith.constant 0 : index
    %5 = vector.load %arg4[%c0_4, %c0_5] : memref<128x128xbf16, #tpu.memory_space<vmem>>, vector<128x128xbf16>
    %cst = arith.constant dense<0.000000e+00> : vector<256x128xf32>
    %6 = tpu.matmul %4, %5, %cst {dimension_numbers = #tpu.dot_dimension_numbers<[1], [0], [0], [1], [0, 0, 1, 1], [], []>} : vector<256x128xbf16>, vector<128x128xbf16>, vector<256x128xf32> -> vector<256x128xf32>
    %7 = arith.addf %3, %6 : vector<256x128xf32>
    %c0_6 = arith.constant 0 : index
    %c0_7 = arith.constant 0 : index
    %8 = vector.load %arg8[%c0_6, %c0_7] : memref<256x128xf32, #tpu.memory_space<vmem>>, vector<256x128xf32>
    tpu.vector_store %arg8[%c0_6, %c0_7], %7 {strides = array<i32>} : memref<256x128xf32, #tpu.memory_space<vmem>>, vector<256x128xf32>,
    %c0_i32_8 = arith.constant 0 : i32
    %9 = arith.cmpi eq, %arg2, %c0_i32_8 : i32
    %10 = arith.extui %9 : i1 to i32
    %c0_i32_9 = arith.constant 0 : i32
    %11 = arith.cmpi ne, %10, %c0_i32_9 : i32
    scf.if %11 {
      %c0_10 = arith.constant 0 : index
      %c0_11 = arith.constant 0 : index
      %12 = vector.load %arg8[%c0_10, %c0_11] : memref<256x128xf32, #tpu.memory_space<vmem>>, vector<256x128xf32>
      %c0_12 = arith.constant 0 : index
      %c0_13 = arith.constant 0 : index
      %13 = vector.load %arg5[%c0_12, %c0_13] : memref<1x128xf32, #tpu.memory_space<vmem>>, vector<1x128xf32>
      %14 = vector.broadcast %13 : vector<1x128xf32> to vector<256x128xf32>
      %15 = arith.mulf %12, %14 : vector<256x128xf32>
      %c0_14 = arith.constant 0 : index
      %c0_15 = arith.constant 0 : index
      %16 = vector.load %arg6[%c0_14, %c0_15] : memref<1x128xf32, #tpu.memory_space<vmem>>, vector<1x128xf32>
      %17 = vector.broadcast %16 : vector<1x128xf32> to vector<256x128xf32>
      %18 = arith.addf %15, %17 : vector<256x128xf32>
      %cst_16 = arith.constant 0.000000e+00 : f32
      %19 = vector.broadcast %cst_16 : f32 to vector<256x128xf32>
      %20 = arith.maximumf %18, %19 : vector<256x128xf32>
      %c0_17 = arith.constant 0 : index
      %c0_18 = arith.constant 0 : index
      %21 = vector.load %arg7[%c0_17, %c0_18] : memref<256x128xf32, #tpu.memory_space<vmem>>, vector<256x128xf32>
      tpu.vector_store %arg7[%c0_17, %c0_18], %20 {strides = array<i32>} : memref<256x128xf32, #tpu.memory_space<vmem>>, vector<256x128xf32>,
    } else {
    }
    return
  }
  func.func @transform_0(%arg0: i32, %arg1: i32, %arg2: i32) -> (i32, i32) {
    %c0_i32 = arith.constant 0 : i32
    return %arg0, %arg2 : i32, i32
  }
  func.func @transform_1(%arg0: i32, %arg1: i32, %arg2: i32) -> (i32, i32) {
    %c0_i32 = arith.constant 0 : i32
    return %arg2, %arg1 : i32, i32
  }
  func.func @transform_2(%arg0: i32, %arg1: i32, %arg2: i32) -> (i32, i32) {
    %c0_i32 = arith.constant 0 : i32
    %c0_i32_0 = arith.constant 0 : i32
    return %c0_i32, %arg1 : i32, i32
  }
  func.func @transform_3(%arg0: i32, %arg1: i32, %arg2: i32) -> (i32, i32) {
    %c0_i32 = arith.constant 0 : i32
    %c0_i32_0 = arith.constant 0 : i32
    return %c0_i32, %arg1 : i32, i32
  }
  func.func @transform_4(%arg0: i32, %arg1: i32, %arg2: i32) -> (i32, i32) {
    %c0_i32 = arith.constant 0 : i32
    return %arg0, %arg1 : i32, i32
  }
}

module attributes {stable_mosaic.version = 11 : i64} {
  func.func @_matmul_bn_act_kernel(%arg0: i32, %arg1: i32, %arg2: i32, %arg3: memref<256x128xbf16, #tpu.memory_space<vmem>>, %arg4: memref<128x128xbf16, #tpu.memory_space<vmem>>, %arg5: memref<1x128xf32, #tpu.memory_space<vmem>>, %arg6: memref<1x128xf32, #tpu.memory_space<vmem>>, %arg7: memref<256x128xf32, #tpu.memory_space<vmem>>, %arg8: memref<256x128xf32, #tpu.memory_space<vmem>>) attributes {dimension_semantics = [#tpu.dimension_semantics<parallel>, #tpu.dimension_semantics<parallel>, #tpu.dimension_semantics<arbitrary>], iteration_bounds = array<i64: 2, 1, 5>, scalar_prefetch = 0 : i64, scratch_operands = 1 : i64, tpu.core_type = #tpu.core_type<tc>, window_params = [{transform_indices = @transform_0, window_bounds = array<i64: 256, 128>}, {transform_indices = @transform_1, window_bounds = array<i64: 128, 128>}, {transform_indices = @transform_2, window_bounds = array<i64: 1, 128>}, {transform_indices = @transform_3, window_bounds = array<i64: 1, 128>}, {transform_indices = @transform_4, window_bounds = array<i64: 256, 128>}]} {
    %c0_i32 = arith.constant 0 : i32
    %0 = arith.cmpi eq, %arg2, %c0_i32 : i32
    %1 = arith.extui %0 : i1 to i32
    %c0_i32_0 = arith.constant 0 : i32
    %2 = arith.cmpi ne, %1, %c0_i32_0 : i32
    scf.if %2 {
      %cst_9 = arith.constant 0.000000e+00 : f32
      %12 = vector.broadcast %cst_9 : f32 to vector<256x128xf32>
      %c0_10 = arith.constant 0 : index
      %c0_11 = arith.constant 0 : index
      %13 = vector.load %arg8[%c0_10, %c0_11] : memref<256x128xf32, #tpu.memory_space<vmem>>, vector<256x128xf32>
      tpu.vector_store %arg8[%c0_10, %c0_11], %12 {strides = array<i32>} : memref<256x128xf32, #tpu.memory_space<vmem>>, vector<256x128xf32>,
    } else {
    }
    %c0 = arith.constant 0 : index
    %c0_1 = arith.constant 0 : index
    %3 = vector.load %arg8[%c0, %c0_1] : memref<256x128xf32, #tpu.memory_space<vmem>>, vector<256x128xf32>
    %c0_2 = arith.constant 0 : index
    %c0_3 = arith.constant 0 : index
    %4 = vector.load %arg3[%c0_2, %c0_3] : memref<256x128xbf16, #tpu.memory_space<vmem>>, vector<256x128xbf16>
    %c0_4 = arith.constant 0 : index
    %c0_5 = arith.constant 0 : index
    %5 = vector.load %arg4[%c0_4, %c0_5] : memref<128x128xbf16, #tpu.memory_space<vmem>>, vector<128x128xbf16>
    %cst = arith.constant dense<0.000000e+00> : vector<256x128xf32>
    %6 = tpu.matmul %4, %5, %cst {dimension_numbers = #tpu.dot_dimension_numbers<[1], [0], [0], [1], [0, 0, 1, 1], [], []>} : vector<256x128xbf16>, vector<128x128xbf16>, vector<256x128xf32> -> vector<256x128xf32>
    %7 = arith.addf %3, %6 : vector<256x128xf32>
    %c0_6 = arith.constant 0 : index
    %c0_7 = arith.constant 0 : index
    %8 = vector.load %arg8[%c0_6, %c0_7] : memref<256x128xf32, #tpu.memory_space<vmem>>, vector<256x128xf32>
    tpu.vector_store %arg8[%c0_6, %c0_7], %7 {strides = array<i32>} : memref<256x128xf32, #tpu.memory_space<vmem>>, vector<256x128xf32>,
    %c4_i32 = arith.constant 4 : i32
    %9 = arith.cmpi eq, %arg2, %c4_i32 : i32
    %10 = arith.extui %9 : i1 to i32
    %c0_i32_8 = arith.constant 0 : i32
    %11 = arith.cmpi ne, %10, %c0_i32_8 : i32
    scf.if %11 {
      %c0_9 = arith.constant 0 : index
      %c0_10 = arith.constant 0 : index
      %12 = vector.load %arg8[%c0_9, %c0_10] : memref<256x128xf32, #tpu.memory_space<vmem>>, vector<256x128xf32>
      %c0_11 = arith.constant 0 : index
      %c0_12 = arith.constant 0 : index
      %13 = vector.load %arg5[%c0_11, %c0_12] : memref<1x128xf32, #tpu.memory_space<vmem>>, vector<1x128xf32>
      %14 = vector.broadcast %13 : vector<1x128xf32> to vector<256x128xf32>
      %15 = arith.mulf %12, %14 : vector<256x128xf32>
      %c0_13 = arith.constant 0 : index
      %c0_14 = arith.constant 0 : index
      %16 = vector.load %arg6[%c0_13, %c0_14] : memref<1x128xf32, #tpu.memory_space<vmem>>, vector<1x128xf32>
      %17 = vector.broadcast %16 : vector<1x128xf32> to vector<256x128xf32>
      %18 = arith.addf %15, %17 : vector<256x128xf32>
      %cst_15 = arith.constant 0.000000e+00 : f32
      %19 = vector.broadcast %cst_15 : f32 to vector<256x128xf32>
      %20 = arith.maximumf %18, %19 : vector<256x128xf32>
      %c0_16 = arith.constant 0 : index
      %c0_17 = arith.constant 0 : index
      %21 = vector.load %arg7[%c0_16, %c0_17] : memref<256x128xf32, #tpu.memory_space<vmem>>, vector<256x128xf32>
      tpu.vector_store %arg7[%c0_16, %c0_17], %20 {strides = array<i32>} : memref<256x128xf32, #tpu.memory_space<vmem>>, vector<256x128xf32>,
    } else {
    }
    return
  }
  func.func @transform_0(%arg0: i32, %arg1: i32, %arg2: i32) -> (i32, i32) {
    %c0_i32 = arith.constant 0 : i32
    return %arg0, %arg2 : i32, i32
  }
  func.func @transform_1(%arg0: i32, %arg1: i32, %arg2: i32) -> (i32, i32) {
    %c0_i32 = arith.constant 0 : i32
    return %arg2, %arg1 : i32, i32
  }
  func.func @transform_2(%arg0: i32, %arg1: i32, %arg2: i32) -> (i32, i32) {
    %c0_i32 = arith.constant 0 : i32
    %c0_i32_0 = arith.constant 0 : i32
    return %c0_i32, %arg1 : i32, i32
  }
  func.func @transform_3(%arg0: i32, %arg1: i32, %arg2: i32) -> (i32, i32) {
    %c0_i32 = arith.constant 0 : i32
    %c0_i32_0 = arith.constant 0 : i32
    return %c0_i32, %arg1 : i32, i32
  }
  func.func @transform_4(%arg0: i32, %arg1: i32, %arg2: i32) -> (i32, i32) {
    %c0_i32 = arith.constant 0 : i32
    return %arg0, %arg1 : i32, i32
  }
}

module attributes {stable_mosaic.version = 11 : i64} {
  func.func @_matmul_bn_act_kernel(%arg0: i32, %arg1: i32, %arg2: i32, %arg3: memref<256x128xbf16, #tpu.memory_space<vmem>>, %arg4: memref<128x256xbf16, #tpu.memory_space<vmem>>, %arg5: memref<1x256xf32, #tpu.memory_space<vmem>>, %arg6: memref<1x256xf32, #tpu.memory_space<vmem>>, %arg7: memref<256x256xf32, #tpu.memory_space<vmem>>, %arg8: memref<256x256xf32, #tpu.memory_space<vmem>>) attributes {dimension_semantics = [#tpu.dimension_semantics<parallel>, #tpu.dimension_semantics<parallel>, #tpu.dimension_semantics<arbitrary>], iteration_bounds = array<i64: 2, 1, 1>, scalar_prefetch = 0 : i64, scratch_operands = 1 : i64, tpu.core_type = #tpu.core_type<tc>, window_params = [{transform_indices = @transform_0, window_bounds = array<i64: 256, 128>}, {transform_indices = @transform_1, window_bounds = array<i64: 128, 256>}, {transform_indices = @transform_2, window_bounds = array<i64: 1, 256>}, {transform_indices = @transform_3, window_bounds = array<i64: 1, 256>}, {transform_indices = @transform_4, window_bounds = array<i64: 256, 256>}]} {
    %c0_i32 = arith.constant 0 : i32
    %0 = arith.cmpi eq, %arg2, %c0_i32 : i32
    %1 = arith.extui %0 : i1 to i32
    %c0_i32_0 = arith.constant 0 : i32
    %2 = arith.cmpi ne, %1, %c0_i32_0 : i32
    scf.if %2 {
      %cst_10 = arith.constant 0.000000e+00 : f32
      %12 = vector.broadcast %cst_10 : f32 to vector<256x256xf32>
      %c0_11 = arith.constant 0 : index
      %c0_12 = arith.constant 0 : index
      %13 = vector.load %arg8[%c0_11, %c0_12] : memref<256x256xf32, #tpu.memory_space<vmem>>, vector<256x256xf32>
      tpu.vector_store %arg8[%c0_11, %c0_12], %12 {strides = array<i32>} : memref<256x256xf32, #tpu.memory_space<vmem>>, vector<256x256xf32>,
    } else {
    }
    %c0 = arith.constant 0 : index
    %c0_1 = arith.constant 0 : index
    %3 = vector.load %arg8[%c0, %c0_1] : memref<256x256xf32, #tpu.memory_space<vmem>>, vector<256x256xf32>
    %c0_2 = arith.constant 0 : index
    %c0_3 = arith.constant 0 : index
    %4 = vector.load %arg3[%c0_2, %c0_3] : memref<256x128xbf16, #tpu.memory_space<vmem>>, vector<256x128xbf16>
    %c0_4 = arith.constant 0 : index
    %c0_5 = arith.constant 0 : index
    %5 = vector.load %arg4[%c0_4, %c0_5] : memref<128x256xbf16, #tpu.memory_space<vmem>>, vector<128x256xbf16>
    %cst = arith.constant dense<0.000000e+00> : vector<256x256xf32>
    %6 = tpu.matmul %4, %5, %cst {dimension_numbers = #tpu.dot_dimension_numbers<[1], [0], [0], [1], [0, 0, 1, 1], [], []>} : vector<256x128xbf16>, vector<128x256xbf16>, vector<256x256xf32> -> vector<256x256xf32>
    %7 = arith.addf %3, %6 : vector<256x256xf32>
    %c0_6 = arith.constant 0 : index
    %c0_7 = arith.constant 0 : index
    %8 = vector.load %arg8[%c0_6, %c0_7] : memref<256x256xf32, #tpu.memory_space<vmem>>, vector<256x256xf32>
    tpu.vector_store %arg8[%c0_6, %c0_7], %7 {strides = array<i32>} : memref<256x256xf32, #tpu.memory_space<vmem>>, vector<256x256xf32>,
    %c0_i32_8 = arith.constant 0 : i32
    %9 = arith.cmpi eq, %arg2, %c0_i32_8 : i32
    %10 = arith.extui %9 : i1 to i32
    %c0_i32_9 = arith.constant 0 : i32
    %11 = arith.cmpi ne, %10, %c0_i32_9 : i32
    scf.if %11 {
      %c0_10 = arith.constant 0 : index
      %c0_11 = arith.constant 0 : index
      %12 = vector.load %arg8[%c0_10, %c0_11] : memref<256x256xf32, #tpu.memory_space<vmem>>, vector<256x256xf32>
      %c0_12 = arith.constant 0 : index
      %c0_13 = arith.constant 0 : index
      %13 = vector.load %arg5[%c0_12, %c0_13] : memref<1x256xf32, #tpu.memory_space<vmem>>, vector<1x256xf32>
      %14 = vector.broadcast %13 : vector<1x256xf32> to vector<256x256xf32>
      %15 = arith.mulf %12, %14 : vector<256x256xf32>
      %c0_14 = arith.constant 0 : index
      %c0_15 = arith.constant 0 : index
      %16 = vector.load %arg6[%c0_14, %c0_15] : memref<1x256xf32, #tpu.memory_space<vmem>>, vector<1x256xf32>
      %17 = vector.broadcast %16 : vector<1x256xf32> to vector<256x256xf32>
      %18 = arith.addf %15, %17 : vector<256x256xf32>
      %c0_16 = arith.constant 0 : index
      %c0_17 = arith.constant 0 : index
      %19 = vector.load %arg7[%c0_16, %c0_17] : memref<256x256xf32, #tpu.memory_space<vmem>>, vector<256x256xf32>
      tpu.vector_store %arg7[%c0_16, %c0_17], %18 {strides = array<i32>} : memref<256x256xf32, #tpu.memory_space<vmem>>, vector<256x256xf32>,
    } else {
    }
    return
  }
  func.func @transform_0(%arg0: i32, %arg1: i32, %arg2: i32) -> (i32, i32) {
    %c0_i32 = arith.constant 0 : i32
    return %arg0, %arg2 : i32, i32
  }
  func.func @transform_1(%arg0: i32, %arg1: i32, %arg2: i32) -> (i32, i32) {
    %c0_i32 = arith.constant 0 : i32
    return %arg2, %arg1 : i32, i32
  }
  func.func @transform_2(%arg0: i32, %arg1: i32, %arg2: i32) -> (i32, i32) {
    %c0_i32 = arith.constant 0 : i32
    %c0_i32_0 = arith.constant 0 : i32
    return %c0_i32, %arg1 : i32, i32
  }
  func.func @transform_3(%arg0: i32, %arg1: i32, %arg2: i32) -> (i32, i32) {
    %c0_i32 = arith.constant 0 : i32
    %c0_i32_0 = arith.constant 0 : i32
    return %c0_i32, %arg1 : i32, i32
  }
  func.func @transform_4(%arg0: i32, %arg1: i32, %arg2: i32) -> (i32, i32) {
    %c0_i32 = arith.constant 0 : i32
    return %arg0, %arg1 : i32, i32
  }
}

module attributes {stable_mosaic.version = 11 : i64} {
  func.func @_matmul_bn_act_kernel(%arg0: i32, %arg1: i32, %arg2: i32, %arg3: memref<256x128xbf16, #tpu.memory_space<vmem>>, %arg4: memref<128x256xbf16, #tpu.memory_space<vmem>>, %arg5: memref<1x256xf32, #tpu.memory_space<vmem>>, %arg6: memref<1x256xf32, #tpu.memory_space<vmem>>, %arg7: memref<256x256xbf16, #tpu.memory_space<vmem>>, %arg8: memref<256x256xf32, #tpu.memory_space<vmem>>, %arg9: memref<256x256xf32, #tpu.memory_space<vmem>>) attributes {dimension_semantics = [#tpu.dimension_semantics<parallel>, #tpu.dimension_semantics<parallel>, #tpu.dimension_semantics<arbitrary>], iteration_bounds = array<i64: 2, 1, 1>, scalar_prefetch = 0 : i64, scratch_operands = 1 : i64, tpu.core_type = #tpu.core_type<tc>, window_params = [{transform_indices = @transform_0, window_bounds = array<i64: 256, 128>}, {transform_indices = @transform_1, window_bounds = array<i64: 128, 256>}, {transform_indices = @transform_2, window_bounds = array<i64: 1, 256>}, {transform_indices = @transform_3, window_bounds = array<i64: 1, 256>}, {transform_indices = @transform_4, window_bounds = array<i64: 256, 256>}, {transform_indices = @transform_5, window_bounds = array<i64: 256, 256>}]} {
    %c0_i32 = arith.constant 0 : i32
    %0 = arith.cmpi eq, %arg2, %c0_i32 : i32
    %1 = arith.extui %0 : i1 to i32
    %c0_i32_0 = arith.constant 0 : i32
    %2 = arith.cmpi ne, %1, %c0_i32_0 : i32
    scf.if %2 {
      %cst_10 = arith.constant 0.000000e+00 : f32
      %12 = vector.broadcast %cst_10 : f32 to vector<256x256xf32>
      %c0_11 = arith.constant 0 : index
      %c0_12 = arith.constant 0 : index
      %13 = vector.load %arg9[%c0_11, %c0_12] : memref<256x256xf32, #tpu.memory_space<vmem>>, vector<256x256xf32>
      tpu.vector_store %arg9[%c0_11, %c0_12], %12 {strides = array<i32>} : memref<256x256xf32, #tpu.memory_space<vmem>>, vector<256x256xf32>,
    } else {
    }
    %c0 = arith.constant 0 : index
    %c0_1 = arith.constant 0 : index
    %3 = vector.load %arg9[%c0, %c0_1] : memref<256x256xf32, #tpu.memory_space<vmem>>, vector<256x256xf32>
    %c0_2 = arith.constant 0 : index
    %c0_3 = arith.constant 0 : index
    %4 = vector.load %arg3[%c0_2, %c0_3] : memref<256x128xbf16, #tpu.memory_space<vmem>>, vector<256x128xbf16>
    %c0_4 = arith.constant 0 : index
    %c0_5 = arith.constant 0 : index
    %5 = vector.load %arg4[%c0_4, %c0_5] : memref<128x256xbf16, #tpu.memory_space<vmem>>, vector<128x256xbf16>
    %cst = arith.constant dense<0.000000e+00> : vector<256x256xf32>
    %6 = tpu.matmul %4, %5, %cst {dimension_numbers = #tpu.dot_dimension_numbers<[1], [0], [0], [1], [0, 0, 1, 1], [], []>} : vector<256x128xbf16>, vector<128x256xbf16>, vector<256x256xf32> -> vector<256x256xf32>
    %7 = arith.addf %3, %6 : vector<256x256xf32>
    %c0_6 = arith.constant 0 : index
    %c0_7 = arith.constant 0 : index
    %8 = vector.load %arg9[%c0_6, %c0_7] : memref<256x256xf32, #tpu.memory_space<vmem>>, vector<256x256xf32>
    tpu.vector_store %arg9[%c0_6, %c0_7], %7 {strides = array<i32>} : memref<256x256xf32, #tpu.memory_space<vmem>>, vector<256x256xf32>,
    %c0_i32_8 = arith.constant 0 : i32
    %9 = arith.cmpi eq, %arg2, %c0_i32_8 : i32
    %10 = arith.extui %9 : i1 to i32
    %c0_i32_9 = arith.constant 0 : i32
    %11 = arith.cmpi ne, %10, %c0_i32_9 : i32
    scf.if %11 {
      %c0_10 = arith.constant 0 : index
      %c0_11 = arith.constant 0 : index
      %12 = vector.load %arg9[%c0_10, %c0_11] : memref<256x256xf32, #tpu.memory_space<vmem>>, vector<256x256xf32>
      %c0_12 = arith.constant 0 : index
      %c0_13 = arith.constant 0 : index
      %13 = vector.load %arg5[%c0_12, %c0_13] : memref<1x256xf32, #tpu.memory_space<vmem>>, vector<1x256xf32>
      %14 = vector.broadcast %13 : vector<1x256xf32> to vector<256x256xf32>
      %15 = arith.mulf %12, %14 : vector<256x256xf32>
      %c0_14 = arith.constant 0 : index
      %c0_15 = arith.constant 0 : index
      %16 = vector.load %arg6[%c0_14, %c0_15] : memref<1x256xf32, #tpu.memory_space<vmem>>, vector<1x256xf32>
      %17 = vector.broadcast %16 : vector<1x256xf32> to vector<256x256xf32>
      %18 = arith.addf %15, %17 : vector<256x256xf32>
      %c0_16 = arith.constant 0 : index
      %c0_17 = arith.constant 0 : index
      %19 = vector.load %arg7[%c0_16, %c0_17] : memref<256x256xbf16, #tpu.memory_space<vmem>>, vector<256x256xbf16>
      %20 = arith.extf %19 : vector<256x256xbf16> to vector<256x256xf32>
      %21 = arith.addf %18, %20 : vector<256x256xf32>
      %cst_18 = arith.constant 0.000000e+00 : f32
      %22 = vector.broadcast %cst_18 : f32 to vector<256x256xf32>
      %23 = arith.maximumf %21, %22 : vector<256x256xf32>
      %c0_19 = arith.constant 0 : index
      %c0_20 = arith.constant 0 : index
      %24 = vector.load %arg8[%c0_19, %c0_20] : memref<256x256xf32, #tpu.memory_space<vmem>>, vector<256x256xf32>
      tpu.vector_store %arg8[%c0_19, %c0_20], %23 {strides = array<i32>} : memref<256x256xf32, #tpu.memory_space<vmem>>, vector<256x256xf32>,
    } else {
    }
    return
  }
  func.func @transform_0(%arg0: i32, %arg1: i32, %arg2: i32) -> (i32, i32) {
    %c0_i32 = arith.constant 0 : i32
    return %arg0, %arg2 : i32, i32
  }
  func.func @transform_1(%arg0: i32, %arg1: i32, %arg2: i32) -> (i32, i32) {
    %c0_i32 = arith.constant 0 : i32
    return %arg2, %arg1 : i32, i32
  }
  func.func @transform_2(%arg0: i32, %arg1: i32, %arg2: i32) -> (i32, i32) {
    %c0_i32 = arith.constant 0 : i32
    %c0_i32_0 = arith.constant 0 : i32
    return %c0_i32, %arg1 : i32, i32
  }
  func.func @transform_3(%arg0: i32, %arg1: i32, %arg2: i32) -> (i32, i32) {
    %c0_i32 = arith.constant 0 : i32
    %c0_i32_0 = arith.constant 0 : i32
    return %c0_i32, %arg1 : i32, i32
  }
  func.func @transform_4(%arg0: i32, %arg1: i32, %arg2: i32) -> (i32, i32) {
    %c0_i32 = arith.constant 0 : i32
    return %arg0, %arg1 : i32, i32
  }
  func.func @transform_5(%arg0: i32, %arg1: i32, %arg2: i32) -> (i32, i32) {
    %c0_i32 = arith.constant 0 : i32
    return %arg0, %arg1 : i32, i32
  }
}

</mosaic_0001>

<bundles_post_ra>
// kernel: bottleneck_forward.4
= control target key start
LH: loop header
LB: loop body
LE: loop exit
PB: predicated region body
PF: predicated region fallthrough
CT: control target
= control target key end

     0   :  { %s1311_s15 = smov 0   ;;  %s1313_s16 = smov 0   ;;  %s1498_s0 = inlined_call_operand.vmem [shape: bf16[512,128], index: 0, kind: input, shape index: {}]   ;;  %s1499_s1 = inlined_call_operand.vmem [shape: bf16[128,128], index: 1, kind: input, shape index: {}]   ;;  %s1500_s2 = inlined_call_operand.vmem [shape: f32[1,128], index: 2, kind: input, shape index: {}]   ;;  %s1501_s3 = inlined_call_operand.vmem [shape: f32[1,128], index: 3, kind: input, shape index: {}]   ;;  %s1502_s4 = inlined_call_operand.vmem [shape: f32[512,128], index: 4, kind: output, shape index: {}]  }
   0x1   :  { %s1315_s17 = smov 0  }
   0x2 LB: > { %s33_s18 = sadd.s32 1, %s1280_s16  ;;  %p1093_p0 = scmp.ge.s32.totalorder %s1284_s17, 1  ;;  %s1284_s17 = sphi %s1315_s17, %s14_s17   ;;  %s1280_s16 = sphi %s1313_s16, %s1504_s16   ;;  %s1276_s15 = sphi %s1311_s15, %s1503_s15  }
   0x3   : > { %p35_p1 = scmp.ge.s32.totalorder %s33_s18, 2  ;;  %p221_p2 = scmp.lt.s32.totalorder %s1284_s17, 3 }
   0x5   : > { %s1506_s18 = smov (%p35_p1, %s33_s18), 0  ;;  %p222_p3 = pnand %p1093_p0, %p221_p2 }
   0x6   : > { %v1238_v0 = vld [vmem:[%s1499_s1] sm:$0xff] (!%p222_p3)   ;;  %s1094_s21 = sshll.u32 (!%p222_p3), %s1276_s15, 5  ;;  %v1239_v1 = vld [vmem:[%s1499_s1 + $0x8] sm:$0xff] (!%p222_p3)   ;;  %v1240_v2 = vld [vmem:[%s1499_s1 + $0x10] sm:$0xff] (!%p222_p3)  }
   0x7   : > { %225 = sbr.rel (%p222_p3) target bundleno = 285 (0x11d), region = 36  ;;  %p268_p4 = scmp.lt.s32.totalorder (!%p222_p3), %s1094_s21, 63  ;;  %1150 = vmatprep.subr.bf16.mxu0 (!%p222_p3), %v1238_v0  ;;  %1198 = vmatprep.subr.bf16.mxu1 (!%p222_p3), %v1238_v0  ;;  %v1241_v3 = vld [vmem:[%s1499_s1 + $0x18] sm:$0xff] (!%p222_p3)   ;;  %v1242_v6 = vld [vmem:[%s1499_s1 + $0x20] sm:$0xff] (!%p222_p3)   ;;  %v1243_v7 = vld [vmem:[%s1499_s1 + $0x28] sm:$0xff] (!%p222_p3)  }
   0x8   : > { %1151 = vmatpush3.bf16.msra.mxu0 (!%p222_p3), %v1238_v0  ;;  %1206 = vmatpush3.bf16.msra.mxu1 (!%p222_p3), %v1238_v0  ;;  %v1244_v8 = vld [vmem:[%s1499_s1 + $0x30] sm:$0xff] (!%p222_p3)   ;;  %v1245_v9 = vld [vmem:[%s1499_s1 + $0x38] sm:$0xff] (!%p222_p3)   ;;  %v1380_v24 = vld [vmem:[%s1500_s2] ss:$0 sm:$0xff] (!%p222_p3) }
   0x9   : > { %1152 = vmatprep.subr.bf16.mxu0 (!%p222_p3), %v1239_v1  ;;  %1199 = vmatprep.subr.bf16.mxu1 (!%p222_p3), %v1239_v1  ;;  %v1385_v26 = vld [vmem:[%s1501_s3] ss:$0 sm:$0xff] (!%p222_p3) }
   0xc   : > { %1153 = vmatpush3.bf16.msra.mxu0 (!%p222_p3), %v1239_v1  ;;  %1207 = vmatpush3.bf16.msra.mxu1 (!%p222_p3), %v1239_v1 }
   0xd   : > { %1154 = vmatprep.subr.bf16.mxu0 (!%p222_p3), %v1240_v2  ;;  %1200 = vmatprep.subr.bf16.mxu1 (!%p222_p3), %v1240_v2 }
   0xe   : > { %s1508_s21 = smov (!%p268_p4, %s1094_s21), 63 }
   0xf   : > { %s1095_s26 = sshll.u32 %s1508_s21, 2  ;;  %s1097_s22 = sshll.u32 %s1508_s21, 3 }
  0x10   : > { %s1344_s29 = scalar_lea.vmem %s1498_s0, %s1095_s26  ;;  %1155 = vmatpush3.bf16.msra.mxu0 %v1240_v2  ;;  %1208 = vmatpush3.bf16.msra.mxu1 %v1240_v2  ;;  %s1399_s24 = scalar_lea.vmem %s1502_s4, %s1097_s22 }
  0x11   : > { %v1246_v4 = vld [vmem:[%s1344_s29] sm:$0xff]   ;;  %1156 = vmatprep.subr.bf16.mxu0 %v1241_v3  ;;  %1201 = vmatprep.subr.bf16.mxu1 %v1241_v3  ;;  %v1248_v10 = vld [vmem:[%s1344_s29 + $0x8] sm:$0xff]   ;;  %v1250_v12 = vld [vmem:[%s1344_s29 + $0x10] sm:$0xff]  }
  0x12   : > { %v1247_v5 = vld [vmem:[%s1344_s29 + $0x40] sm:$0xff]   ;;  %1166 = vmatprep.mubr.bf16.mxu0 %v1246_v4  ;;  %v1249_v11 = vld [vmem:[%s1344_s29 + $0x48] sm:$0xff]   ;;  %v1251_v13 = vld [vmem:[%s1344_s29 + $0x50] sm:$0xff]  }
  0x13   : > { %1182 = vmatprep.mubr.bf16.mxu1 %v1247_v5  ;;  %v1252_v14 = vld [vmem:[%s1344_s29 + $0x18] sm:$0xff]   ;;  %v1254_v16 = vld [vmem:[%s1344_s29 + $0x20] sm:$0xff]   ;;  %v1256_v18 = vld [vmem:[%s1344_s29 + $0x28] sm:$0xff]  }
  0x14   : > { %1157 = vmatpush3.bf16.msra.mxu0 %v1241_v3  ;;  %1209 = vmatpush3.bf16.msra.mxu1 %v1241_v3  ;;  %v1253_v15 = vld [vmem:[%s1344_s29 + $0x58] sm:$0xff]   ;;  %v1255_v17 = vld [vmem:[%s1344_s29 + $0x60] sm:$0xff]   ;;  %v1257_v19 = vld [vmem:[%s1344_s29 + $0x68] sm:$0xff]  }
  0x15   : > { %1158 = vmatprep.subr.bf16.mxu0 %v1242_v6  ;;  %1202 = vmatprep.subr.bf16.mxu1 %v1242_v6  ;;  %v1258_v20 = vld [vmem:[%s1344_s29 + $0x30] sm:$0xff]   ;;  %v1260_v22 = vld [vmem:[%s1344_s29 + $0x38] sm:$0xff]  }
  0x16   : > { %v1259_v21 = vld [vmem:[%s1344_s29 + $0x70] sm:$0xff]   ;;  %v1261_v23 = vld [vmem:[%s1344_s29 + $0x78] sm:$0xff]  }
  0x18   : > { %1159 = vmatpush3.bf16.msra.mxu0 %v1242_v6  ;;  %1210 = vmatpush3.bf16.msra.mxu1 %v1242_v6 }
  0x19   : > { %1160 = vmatprep.subr.bf16.mxu0 %v1243_v7  ;;  %1203 = vmatprep.subr.bf16.mxu1 %v1243_v7 }
  0x1c   : > { %1161 = vmatpush3.bf16.msra.mxu0 %v1243_v7  ;;  %1211 = vmatpush3.bf16.msra.mxu1 %v1243_v7 }
  0x1d   : > { %1162 = vmatprep.subr.bf16.mxu0 %v1244_v8  ;;  %1204 = vmatprep.subr.bf16.mxu1 %v1244_v8 }
  0x20   : > { %1163 = vmatpush3.bf16.msra.mxu0 %v1244_v8  ;;  %1212 = vmatpush3.bf16.msra.mxu1 %v1244_v8 }
  0x21   : > { %1164 = vmatprep.subr.bf16.mxu0 %v1245_v9  ;;  %1205 = vmatprep.subr.bf16.mxu1 %v1245_v9 }
  0x24   : > { %1165 = vmatpush3.bf16.msra.mxu0 %v1245_v9  ;;  %1213 = vmatpush3.bf16.msra.mxu1 %v1245_v9 }
  0x27   : > { %1167 = vmatmul.mubr.bf16.vlgmr.msra.gmra.mrb[0].mxu0 %v1248_v10  ;;  %1183 = vmatmul.mubr.bf16.vlgmr.msra.gmra.mrb[0].mxu1 %v1249_v11 }
  0x28   : > { %1170 = vmatprep.mubr.bf16.mxu0 %v1250_v12  ;;  %1186 = vmatprep.mubr.bf16.mxu1 %v1251_v13 }
  0x2f   : > { %1171 = vmatmul.mubr.bf16.gmra.mrb[4].mxu0 %v1252_v14  ;;  %1187 = vmatmul.mubr.bf16.gmra.mrb[4].mxu1 %v1253_v15 }
  0x30   : > { %1174 = vmatprep.mubr.bf16.mxu0 %v1254_v16  ;;  %1190 = vmatprep.mubr.bf16.mxu1 %v1255_v17 }
  0x37   : > { %1175 = vmatmul.mubr.bf16.gmra.mrb[8].mxu0 %v1256_v18  ;;  %1191 = vmatmul.mubr.bf16.gmra.mrb[8].mxu1 %v1257_v19 }
  0x38   : > { %1178 = vmatprep.mubr.bf16.mxu0 %v1258_v20  ;;  %1194 = vmatprep.mubr.bf16.mxu1 %v1259_v21 }
  0x3f   : > { %1179 = vmatmul.mubr.bf16.gmra.mrb[12].mxu0 %v1260_v22  ;;  %1195 = vmatmul.mubr.bf16.gmra.mrb[12].mxu1 %v1261_v23 }
  0xfa   : > { %v1168_v25 = vpop.f32.mrb[0].mxu0  ;;  %v1184_v27 = vpop.f32.mrb[0].mxu1 }
  0xfb   : > { %v830_v28 = vmul.f32 %v1168_v25, %v1380_v24  ;;  %v846_v29 = vmul.f32 %v1184_v27, %v1380_v24  ;;  %v595_v30 = vpop.f32.mrb[1].mxu0  ;;  %v659_v31 = vpop.f32.mrb[1].mxu1 }
  0xfc   : > { %v828_v32 = vmul.f32 %v1380_v24, %v595_v30  ;;  %v844_v33 = vmul.f32 %v1380_v24, %v659_v31  ;;  %v1169_v34 = vpop.f32.mrb[2].mxu0  ;;  %v1185_v35 = vpop.f32.mrb[2].mxu1 }
  0xfd   : > { %v869_v36 = vadd.f32 %v1385_v26, %v830_v28  ;;  %v885_v37 = vadd.f32 %v1385_v26, %v846_v29  ;;  %v831_v38 = vmul.f32 %v1169_v34, %v1380_v24  ;;  %v847_v39 = vmul.f32 %v1185_v35, %v1380_v24  ;;  %v598_v40 = vpop.f32.mrb[3].mxu0  ;;  %v662_v41 = vpop.f32.mrb[3].mxu1 }
  0xfe   : > { %v867_v42 = vadd.f32 %v1385_v26, %v828_v32  ;;  %v883_v43 = vadd.f32 %v1385_v26, %v844_v33  ;;  %v829_v44 = vmul.f32 %v1380_v24, %v598_v40  ;;  %v845_v45 = vmul.f32 %v1380_v24, %v662_v41 }
  0xff   : > { %v901_v46 = vmax.f32 %v869_v36, 0.0  ;;  %v917_v47 = vmax.f32 %v885_v37, 0.0  ;;  %v870_v48 = vadd.f32 %v1385_v26, %v831_v38  ;;  %v886_v49 = vadd.f32 %v1385_v26, %v847_v39 }
 0x100   : > { %v899_v50 = vmax.f32 %v867_v42, 0.0  ;;  %v915_v51 = vmax.f32 %v883_v43, 0.0  ;;  %v868_v52 = vadd.f32 %v1385_v26, %v829_v44  ;;  %v884_v53 = vadd.f32 %v1385_v26, %v845_v45 }
 0x101   : > { %933 = vst [vmem:[%s1399_s24 + $0x10] sm:$0xff] %v901_v46  ;;  %949 = vst [vmem:[%s1399_s24 + $0x90] sm:$0xff] %v917_v47  ;;  %v902_v54 = vmax.f32 %v870_v48, 0.0  ;;  %v918_v55 = vmax.f32 %v886_v49, 0.0 }
 0x102   : > { %931 = vst [vmem:[%s1399_s24] sm:$0xff] %v899_v50  ;;  %947 = vst [vmem:[%s1399_s24 + $0x80] sm:$0xff] %v915_v51  ;;  %v900_v56 = vmax.f32 %v868_v52, 0.0  ;;  %v916_v57 = vmax.f32 %v884_v53, 0.0  ;;  %v1172_v58 = vpop.f32.mrb[4].mxu0  ;;  %v1188_v59 = vpop.f32.mrb[4].mxu1 }
 0x103   : > { %934 = vst [vmem:[%s1399_s24 + $0x18] sm:$0xff] %v902_v54  ;;  %950 = vst [vmem:[%s1399_s24 + $0x98] sm:$0xff] %v918_v55  ;;  %v834_v60 = vmul.f32 %v1172_v58, %v1380_v24  ;;  %v850_v61 = vmul.f32 %v1188_v59, %v1380_v24  ;;  %v611_v62 = vpop.f32.mrb[5].mxu0  ;;  %v675_v63 = vpop.f32.mrb[5].mxu1 }
 0x104   : > { %932 = vst [vmem:[%s1399_s24 + $0x8] sm:$0xff] %v900_v56  ;;  %948 = vst [vmem:[%s1399_s24 + $0x88] sm:$0xff] %v916_v57  ;;  %v832_v0 = vmul.f32 %v1380_v24, %v611_v62  ;;  %v848_v1 = vmul.f32 %v1380_v24, %v675_v63  ;;  %v1173_v2 = vpop.f32.mrb[6].mxu0  ;;  %v1189_v3 = vpop.f32.mrb[6].mxu1 }
 0x105   : > { %v873_v4 = vadd.f32 %v1385_v26, %v834_v60  ;;  %v889_v5 = vadd.f32 %v1385_v26, %v850_v61  ;;  %v835_v6 = vmul.f32 %v1173_v2, %v1380_v24  ;;  %v851_v7 = vmul.f32 %v1189_v3, %v1380_v24  ;;  %v614_v8 = vpop.f32.mrb[7].mxu0  ;;  %v678_v9 = vpop.f32.mrb[7].mxu1 }
 0x106   : > { %v871_v10 = vadd.f32 %v1385_v26, %v832_v0  ;;  %v887_v11 = vadd.f32 %v1385_v26, %v848_v1  ;;  %v833_v12 = vmul.f32 %v1380_v24, %v614_v8  ;;  %v849_v13 = vmul.f32 %v1380_v24, %v678_v9 }
 0x107   : > { %v905_v14 = vmax.f32 %v873_v4, 0.0  ;;  %v921_v15 = vmax.f32 %v889_v5, 0.0  ;;  %v874_v16 = vadd.f32 %v1385_v26, %v835_v6  ;;  %v890_v17 = vadd.f32 %v1385_v26, %v851_v7 }
 0x108   : > { %v903_v18 = vmax.f32 %v871_v10, 0.0  ;;  %v919_v19 = vmax.f32 %v887_v11, 0.0  ;;  %v872_v20 = vadd.f32 %v1385_v26, %v833_v12  ;;  %v888_v21 = vadd.f32 %v1385_v26, %v849_v13 }
 0x109   : > { %937 = vst [vmem:[%s1399_s24 + $0x30] sm:$0xff] %v905_v14  ;;  %953 = vst [vmem:[%s1399_s24 + $0xb0] sm:$0xff] %v921_v15  ;;  %v906_v22 = vmax.f32 %v874_v16, 0.0  ;;  %v922_v23 = vmax.f32 %v890_v17, 0.0 }
 0x10a   : > { %935 = vst [vmem:[%s1399_s24 + $0x20] sm:$0xff] %v903_v18  ;;  %951 = vst [vmem:[%s1399_s24 + $0xa0] sm:$0xff] %v919_v19  ;;  %v904_v25 = vmax.f32 %v872_v20, 0.0  ;;  %v920_v27 = vmax.f32 %v888_v21, 0.0  ;;  %v1176_v28 = vpop.f32.mrb[8].mxu0  ;;  %v1192_v29 = vpop.f32.mrb[8].mxu1 }
 0x10b   : > { %938 = vst [vmem:[%s1399_s24 + $0x38] sm:$0xff] %v906_v22  ;;  %954 = vst [vmem:[%s1399_s24 + $0xb8] sm:$0xff] %v922_v23  ;;  %v838_v30 = vmul.f32 %v1176_v28, %v1380_v24  ;;  %v854_v31 = vmul.f32 %v1192_v29, %v1380_v24  ;;  %v627_v32 = vpop.f32.mrb[9].mxu0  ;;  %v691_v33 = vpop.f32.mrb[9].mxu1 }
 0x10c   : > { %936 = vst [vmem:[%s1399_s24 + $0x28] sm:$0xff] %v904_v25  ;;  %952 = vst [vmem:[%s1399_s24 + $0xa8] sm:$0xff] %v920_v27  ;;  %v836_v34 = vmul.f32 %v1380_v24, %v627_v32  ;;  %v852_v35 = vmul.f32 %v1380_v24, %v691_v33  ;;  %v1177_v36 = vpop.f32.mrb[10].mxu0  ;;  %v1193_v37 = vpop.f32.mrb[10].mxu1 }
 0x10d   : > { %v877_v38 = vadd.f32 %v1385_v26, %v838_v30  ;;  %v893_v39 = vadd.f32 %v1385_v26, %v854_v31  ;;  %v839_v40 = vmul.f32 %v1177_v36, %v1380_v24  ;;  %v855_v41 = vmul.f32 %v1193_v37, %v1380_v24  ;;  %v630_v42 = vpop.f32.mrb[11].mxu0  ;;  %v694_v43 = vpop.f32.mrb[11].mxu1 }
 0x10e   : > { %v875_v44 = vadd.f32 %v1385_v26, %v836_v34  ;;  %v891_v45 = vadd.f32 %v1385_v26, %v852_v35  ;;  %v837_v46 = vmul.f32 %v1380_v24, %v630_v42  ;;  %v853_v47 = vmul.f32 %v1380_v24, %v694_v43 }
 0x10f   : > { %v909_v48 = vmax.f32 %v877_v38, 0.0  ;;  %v925_v49 = vmax.f32 %v893_v39, 0.0  ;;  %v878_v50 = vadd.f32 %v1385_v26, %v839_v40  ;;  %v894_v51 = vadd.f32 %v1385_v26, %v855_v41 }
 0x110   : > { %v907_v52 = vmax.f32 %v875_v44, 0.0  ;;  %v923_v53 = vmax.f32 %v891_v45, 0.0  ;;  %v876_v54 = vadd.f32 %v1385_v26, %v837_v46  ;;  %v892_v55 = vadd.f32 %v1385_v26, %v853_v47 }
 0x111   : > { %941 = vst [vmem:[%s1399_s24 + $0x50] sm:$0xff] %v909_v48  ;;  %957 = vst [vmem:[%s1399_s24 + $0xd0] sm:$0xff] %v925_v49  ;;  %v910_v56 = vmax.f32 %v878_v50, 0.0  ;;  %v926_v57 = vmax.f32 %v894_v51, 0.0 }
 0x112   : > { %939 = vst [vmem:[%s1399_s24 + $0x40] sm:$0xff] %v907_v52  ;;  %955 = vst [vmem:[%s1399_s24 + $0xc0] sm:$0xff] %v923_v53  ;;  %v908_v58 = vmax.f32 %v876_v54, 0.0  ;;  %v924_v59 = vmax.f32 %v892_v55, 0.0  ;;  %v1180_v60 = vpop.f32.mrb[12].mxu0  ;;  %v1196_v61 = vpop.f32.mrb[12].mxu1 }
 0x113   : > { %942 = vst [vmem:[%s1399_s24 + $0x58] sm:$0xff] %v910_v56  ;;  %958 = vst [vmem:[%s1399_s24 + $0xd8] sm:$0xff] %v926_v57  ;;  %v842_v62 = vmul.f32 %v1180_v60, %v1380_v24  ;;  %v858_v63 = vmul.f32 %v1196_v61, %v1380_v24  ;;  %v643_v0 = vpop.f32.mrb[13].mxu0  ;;  %v707_v1 = vpop.f32.mrb[13].mxu1 }
 0x114   : > { %940 = vst [vmem:[%s1399_s24 + $0x48] sm:$0xff] %v908_v58  ;;  %956 = vst [vmem:[%s1399_s24 + $0xc8] sm:$0xff] %v924_v59  ;;  %v840_v2 = vmul.f32 %v1380_v24, %v643_v0  ;;  %v856_v3 = vmul.f32 %v1380_v24, %v707_v1  ;;  %v1181_v4 = vpop.f32.mrb[14].mxu0  ;;  %v1197_v5 = vpop.f32.mrb[14].mxu1 }
 0x115   : > { %v881_v6 = vadd.f32 %v1385_v26, %v842_v62  ;;  %v897_v7 = vadd.f32 %v1385_v26, %v858_v63  ;;  %v843_v8 = vmul.f32 %v1181_v4, %v1380_v24  ;;  %v859_v9 = vmul.f32 %v1197_v5, %v1380_v24  ;;  %v646_v10 = vpop.f32.mrb[15].mxu0  ;;  %v710_v11 = vpop.f32.mrb[15].mxu1 }
 0x116   : > { %v879_v12 = vadd.f32 %v1385_v26, %v840_v2  ;;  %v895_v13 = vadd.f32 %v1385_v26, %v856_v3  ;;  %v841_v14 = vmul.f32 %v1380_v24, %v646_v10  ;;  %v857_v15 = vmul.f32 %v1380_v24, %v710_v11 }
 0x117   : > { %v913_v16 = vmax.f32 %v881_v6, 0.0  ;;  %v929_v17 = vmax.f32 %v897_v7, 0.0  ;;  %v882_v18 = vadd.f32 %v1385_v26, %v843_v8  ;;  %v898_v19 = vadd.f32 %v1385_v26, %v859_v9 }
 0x118   : > { %v911_v20 = vmax.f32 %v879_v12, 0.0  ;;  %v927_v21 = vmax.f32 %v895_v13, 0.0  ;;  %v880_v22 = vadd.f32 %v1385_v26, %v841_v14  ;;  %v896_v23 = vadd.f32 %v1385_v26, %v857_v15 }
 0x119   : > { %945 = vst [vmem:[%s1399_s24 + $0x70] sm:$0xff] %v913_v16  ;;  %961 = vst [vmem:[%s1399_s24 + $0xf0] sm:$0xff] %v929_v17  ;;  %v914_v25 = vmax.f32 %v882_v18, 0.0  ;;  %v930_v24 = vmax.f32 %v898_v19, 0.0 }
 0x11a   : > { %943 = vst [vmem:[%s1399_s24 + $0x60] sm:$0xff] %v911_v20  ;;  %959 = vst [vmem:[%s1399_s24 + $0xe0] sm:$0xff] %v927_v21  ;;  %v912_v27 = vmax.f32 %v880_v22, 0.0  ;;  %v928_v28 = vmax.f32 %v896_v23, 0.0 }
 0x11b   : > { %946 = vst [vmem:[%s1399_s24 + $0x78] sm:$0xff] %v914_v25  ;;  %962 = vst [vmem:[%s1399_s24 + $0xf8] sm:$0xff] %v930_v24 }
 0x11c   : > { %944 = vst [vmem:[%s1399_s24 + $0x68] sm:$0xff] %v912_v27  ;;  %960 = vst [vmem:[%s1399_s24 + $0xe8] sm:$0xff] %v928_v28 }
 0x11d PF: > { %s14_s17 = sadd.s32 1, %s1284_s17   ;;  %s1503_s15 = smov %s1280_s16 }
 0x11e   : > { %p11_p5 = scmp.ge.s32.totalorder %s14_s17, 4   ;;  %s1504_s16 = smov %s1506_s18 }
 0x120   :  { %13 = sbr.rel (!%p11_p5) target bundleno = 2 (0x2), region = 83 }

// kernel: bottleneck_forward.5
= control target key start
LH: loop header
LB: loop body
LE: loop exit
PB: predicated region body
PF: predicated region fallthrough
CT: control target
= control target key end

     0   :  { %s1548_s15 = smov 0   ;;  %s1550_s16 = smov 0   ;;  %s1846_s0 = inlined_call_operand.vmem [shape: bf16[512,640], index: 0, kind: input, shape index: {}]   ;;  %s1847_s1 = inlined_call_operand.vmem [shape: bf16[640,128], index: 1, kind: input, shape index: {}]   ;;  %s1848_s2 = inlined_call_operand.vmem [shape: f32[1,128], index: 2, kind: input, shape index: {}]   ;;  %s1849_s3 = inlined_call_operand.vmem [shape: f32[1,128], index: 3, kind: input, shape index: {}]   ;;  %s1850_s4 = inlined_call_operand.vmem [shape: f32[512,128], index: 4, kind: output, shape index: {}]  }
   0x1   :  { %s1552_s17 = smov 0   ;;  %s1554_s18 = smov 0  }
   0x2   :  { %s1556_s19 = smov 0   ;;  %s1558_s20 = smov 0  }
   0x3   :  { %s1560_s21 = smov 0  }
   0x4 LB: > { %s26_s22 = sadd.s32 1, %s1512_s19  ;;  %s33_s23 = sadd.s32 1, %s1516_s20  ;;  %s1520_s21 = sphi %s1560_s21, %s14_s21   ;;  %s1516_s20 = sphi %s1558_s20, %s1856_s20   ;;  %s1512_s19 = sphi %s1556_s19, %s1855_s19   ;;  %s1508_s18 = sphi %s1554_s18, %s1854_s18   ;;  %s1504_s17 = sphi %s1552_s17, %s1853_s17   ;;  %s1500_s16 = sphi %s1550_s16, %s1852_s16   ;;  %s1496_s15 = sphi %s1548_s15, %s1851_s15  }
   0x5   : > { %p27_p0 = scmp.ge.s32.totalorder %s26_s22, 5  ;;  %p49_p1 = scmp.ne.s32.totalorder %s1500_s16, %s1496_s15 }
   0x6   : > { %p50_p2 = scmp.eq.s32.totalorder %s1520_s21, 0  ;;  %s42_s27 = sadd.s32 1, %s1500_s16 }
   0x7   : > { %s1858_s22 = smov (%p27_p0, %s26_s22), 0  ;;  %s1860_s23 = smov (!%p27_p0, %s33_s23), %s1516_s20 }
   0x8   : > { %p51_p3 = por %p50_p2, %p49_p1  ;;  %p35_p4 = scmp.ge.s32.totalorder %s1860_s23, 2 }
   0x9   : > { %s38_s24 = ssub.s32 %s1512_s19, %s1858_s22  ;;  %p1255_p6 = scmp.ge.s32.totalorder %s1520_s21, 10 }
   0xa   : > { %s1862_s23 = smov (%p35_p4, %s1860_s23), 0 }
   0xb   : > { %s37_s25 = ssub.s32 %s1516_s20, %s1862_s23  ;;  %195 = sbr.rel (%p1255_p6) target bundleno = 46 (0x2e), region = 24 }
   0xc   : > { %s39_s26 = sor.u32 %s38_s24, %s37_s25 }
   0xd   : > { %p40_p5 = scmp.eq.s32.totalorder %s39_s26, 0 }
   0xf   : > { %s1599_s28 = scalar_select %p40_p5, %s1500_s16, %s42_s27  }
  0x12   : > { %198 = sbr.rel (!%p51_p3) target bundleno = 46 (0x2e), region = 28  ;;  %s200_s29 = sand.u32 (%p51_p3), 1, %s1500_s16  }
  0x13   : > { %s1384_s30 = smul.u32 (%p51_p3), 160, %s1516_s20  ;;  %s1256_s5 = sshll.u32 (%p51_p3), %s200_s29, 7 }
  0x14   : > { %s1613_s11 = scalar_lea.vmem (%p51_p3), [#allocation3], %s1256_s5 }
  0x15   : > { %s205_s6 = sadd.s32 (%p51_p3), %s1512_s19, %s1384_s30 }
  0x16   : > { %s1259_s7 = sshll.u32 (%p51_p3), %s205_s6, 2 }
  0x17   : > { %s1608_s10 = scalar_lea.vmem (%p51_p3), %s1846_s0, %s1259_s7 }
  0x18   : > { %v223_v0 = vld [vmem:[%s1608_s10] sm:$0xf] (%p51_p3)  ;;  %v225_v1 = vld [vmem:[%s1608_s10 + $0x14] sm:$0xf] (%p51_p3)  ;;  %v227_v2 = vld [vmem:[%s1608_s10 + $0x28] sm:$0xf] (%p51_p3) }
  0x19   : > { %224 = vst [vmem:[%s1613_s11] sm:$0xf] %v223_v0  ;;  %226 = vst [vmem:[%s1613_s11 + $0x4] sm:$0xf] %v225_v1  ;;  %v229_v3 = vld [vmem:[%s1608_s10 + $0x3c] sm:$0xf] }
  0x1a   : > { %228 = vst [vmem:[%s1613_s11 + $0x8] sm:$0xf] %v227_v2  ;;  %v231_v4 = vld [vmem:[%s1608_s10 + $0x50] sm:$0xf]  ;;  %v233_v5 = vld [vmem:[%s1608_s10 + $0x64] sm:$0xf] }
  0x1b   : > { %230 = vst [vmem:[%s1613_s11 + $0xc] sm:$0xf] %v229_v3  ;;  %232 = vst [vmem:[%s1613_s11 + $0x10] sm:$0xf] %v231_v4  ;;  %v235_v6 = vld [vmem:[%s1608_s10 + $0x78] sm:$0xf] }
  0x1c   : > { %234 = vst [vmem:[%s1613_s11 + $0x14] sm:$0xf] %v233_v5  ;;  %v237_v7 = vld [vmem:[%s1608_s10 + $0x8c] sm:$0xf]  ;;  %v239_v8 = vld [vmem:[%s1608_s10 + $0xa0] sm:$0xf] }
  0x1d   : > { %236 = vst [vmem:[%s1613_s11 + $0x18] sm:$0xf] %v235_v6  ;;  %238 = vst [vmem:[%s1613_s11 + $0x1c] sm:$0xf] %v237_v7  ;;  %v241_v9 = vld [vmem:[%s1608_s10 + $0xb4] sm:$0xf] }
  0x1e   : > { %240 = vst [vmem:[%s1613_s11 + $0x20] sm:$0xf] %v239_v8  ;;  %v243_v10 = vld [vmem:[%s1608_s10 + $0xc8] sm:$0xf]  ;;  %v245_v11 = vld [vmem:[%s1608_s10 + $0xdc] sm:$0xf] }
  0x1f   : > { %242 = vst [vmem:[%s1613_s11 + $0x24] sm:$0xf] %v241_v9  ;;  %244 = vst [vmem:[%s1613_s11 + $0x28] sm:$0xf] %v243_v10  ;;  %v247_v12 = vld [vmem:[%s1608_s10 + $0xf0] sm:$0xf] }
  0x20   : > { %246 = vst [vmem:[%s1613_s11 + $0x2c] sm:$0xf] %v245_v11  ;;  %v249_v13 = vld [vmem:[%s1608_s10 + $0x104] sm:$0xf]  ;;  %v251_v14 = vld [vmem:[%s1608_s10 + $0x118] sm:$0xf] }
  0x21   : > { %248 = vst [vmem:[%s1613_s11 + $0x30] sm:$0xf] %v247_v12  ;;  %250 = vst [vmem:[%s1613_s11 + $0x34] sm:$0xf] %v249_v13  ;;  %v253_v15 = vld [vmem:[%s1608_s10 + $0x12c] sm:$0xf] }
  0x22   : > { %252 = vst [vmem:[%s1613_s11 + $0x38] sm:$0xf] %v251_v14  ;;  %v255_v16 = vld [vmem:[%s1608_s10 + $0x140] sm:$0xf]  ;;  %v257_v17 = vld [vmem:[%s1608_s10 + $0x154] sm:$0xf] }
  0x23   : > { %254 = vst [vmem:[%s1613_s11 + $0x3c] sm:$0xf] %v253_v15  ;;  %256 = vst [vmem:[%s1613_s11 + $0x40] sm:$0xf] %v255_v16  ;;  %v259_v18 = vld [vmem:[%s1608_s10 + $0x168] sm:$0xf] }
  0x24   : > { %258 = vst [vmem:[%s1613_s11 + $0x44] sm:$0xf] %v257_v17  ;;  %v261_v19 = vld [vmem:[%s1608_s10 + $0x17c] sm:$0xf]  ;;  %v263_v20 = vld [vmem:[%s1608_s10 + $0x190] sm:$0xf] }
  0x25   : > { %260 = vst [vmem:[%s1613_s11 + $0x48] sm:$0xf] %v259_v18  ;;  %262 = vst [vmem:[%s1613_s11 + $0x4c] sm:$0xf] %v261_v19  ;;  %v265_v21 = vld [vmem:[%s1608_s10 + $0x1a4] sm:$0xf] }
  0x26   : > { %264 = vst [vmem:[%s1613_s11 + $0x50] sm:$0xf] %v263_v20  ;;  %v267_v22 = vld [vmem:[%s1608_s10 + $0x1b8] sm:$0xf]  ;;  %v269_v23 = vld [vmem:[%s1608_s10 + $0x1cc] sm:$0xf] }
  0x27   : > { %266 = vst [vmem:[%s1613_s11 + $0x54] sm:$0xf] %v265_v21  ;;  %268 = vst [vmem:[%s1613_s11 + $0x58] sm:$0xf] %v267_v22  ;;  %v271_v24 = vld [vmem:[%s1608_s10 + $0x1e0] sm:$0xf] }
  0x28   : > { %270 = vst [vmem:[%s1613_s11 + $0x5c] sm:$0xf] %v269_v23  ;;  %v273_v25 = vld [vmem:[%s1608_s10 + $0x1f4] sm:$0xf]  ;;  %v275_v26 = vld [vmem:[%s1608_s10 + $0x208] sm:$0xf] }
  0x29   : > { %272 = vst [vmem:[%s1613_s11 + $0x60] sm:$0xf] %v271_v24  ;;  %274 = vst [vmem:[%s1613_s11 + $0x64] sm:$0xf] %v273_v25  ;;  %v277_v27 = vld [vmem:[%s1608_s10 + $0x21c] sm:$0xf] }
  0x2a   : > { %276 = vst [vmem:[%s1613_s11 + $0x68] sm:$0xf] %v275_v26  ;;  %v279_v28 = vld [vmem:[%s1608_s10 + $0x230] sm:$0xf]  ;;  %v281_v29 = vld [vmem:[%s1608_s10 + $0x244] sm:$0xf] }
  0x2b   : > { %278 = vst [vmem:[%s1613_s11 + $0x6c] sm:$0xf] %v277_v27  ;;  %280 = vst [vmem:[%s1613_s11 + $0x70] sm:$0xf] %v279_v28  ;;  %v283_v30 = vld [vmem:[%s1608_s10 + $0x258] sm:$0xf] }
  0x2c   : > { %282 = vst [vmem:[%s1613_s11 + $0x74] sm:$0xf] %v281_v29  ;;  %v285_v31 = vld [vmem:[%s1608_s10 + $0x26c] sm:$0xf]  ;;  %284 = vst [vmem:[%s1613_s11 + $0x78] sm:$0xf] %v283_v30 }
  0x2d   : > { %286 = vst [vmem:[%s1613_s11 + $0x7c] sm:$0xf] %v285_v31 }
  0x2e PF: > { %p1260_p7 = scmp.ge.s32.totalorder %s1520_s21, 1  ;;  %p384_p8 = scmp.lt.s32.totalorder %s1520_s21, 11 }
  0x30   : > { %p385_p9 = pnand %p1260_p7, %p384_p8 }
  0x31   : > { %s391_s12 = sand.u32 (!%p385_p9), 1, %s1496_s15   ;;  %s1262_s13 = sshll.u32 (!%p385_p9), %s1504_s17, 4 }
  0x32   : > { %388 = sbr.rel (%p385_p9) target bundleno = 368 (0x170), region = 73  ;;  %s1261_s14 = sshll.u32 (!%p385_p9), %s391_s12, 7 }
  0x33   : > { %p435_p10 = scmp.lt.s32.totalorder (!%p385_p9), %s1262_s13, 79  ;;  %s1264_s24 = sshll.u32 (!%p385_p9), %s1508_s18, 5 }
  0x34   : > { %p450_p11 = scmp.lt.s32.totalorder (!%p385_p9), %s1264_s24, 63  ;;  %s1691_s15 = scalar_lea.vmem (!%p385_p9), [#allocation3], %s1261_s14 }
  0x35   : > { %p1266_p12 = scmp.ne.s32.totalorder (!%p385_p9), %s1504_s17, 0 }
  0x39   : > { %s1864_s13 = smov (!%p435_p10, %s1262_s13), 79  ;;  %s1866_s24 = smov (!%p450_p11, %s1264_s24), 63 }
  0x3a   : > { %s1263_s25 = sshll.u32 %s1864_s13, 2  ;;  %s1265_s30 = sshll.u32 %s1866_s24, 3  ;;  %v1522_v32 = vmov (!%p1266_p12), 0.0  }
  0x3b   : > { %s1684_s29 = scalar_lea.vmem %s1847_s1, %s1263_s25  ;;  %s1689_s7 = scalar_lea.vmem %s1850_s4, %s1265_s30  ;;  %463 = vst [vmem:[#allocation2] sm:$0xff] (!%p1266_p12), %v1522_v32  ;;  %464 = vst [vmem:[#allocation2 + $0x8] sm:$0xff] (!%p1266_p12), %v1522_v32 }
  0x3c   : > { %462 = sbr.rel (%p1266_p12) target bundleno = 75 (0x4b), region = 81  ;;  %465 = vst [vmem:[#allocation2 + $0x10] sm:$0xff] (!%p1266_p12), %v1522_v32  ;;  %466 = vst [vmem:[#allocation2 + $0x18] sm:$0xff] (!%p1266_p12), %v1522_v32 }
  0x3d   : > { %467 = vst [vmem:[#allocation2 + $0x20] sm:$0xff] (!%p1266_p12), %v1522_v32  ;;  %468 = vst [vmem:[#allocation2 + $0x28] sm:$0xff] (!%p1266_p12), %v1522_v32 }
  0x3e   : > { %469 = vst [vmem:[#allocation2 + $0x30] sm:$0xff] (!%p1266_p12), %v1522_v32  ;;  %470 = vst [vmem:[#allocation2 + $0x38] sm:$0xff] (!%p1266_p12), %v1522_v32 }
  0x3f   : > { %471 = vst [vmem:[#allocation2 + $0x40] sm:$0xff] (!%p1266_p12), %v1522_v32  ;;  %472 = vst [vmem:[#allocation2 + $0x48] sm:$0xff] (!%p1266_p12), %v1522_v32 }
  0x40   : > { %473 = vst [vmem:[#allocation2 + $0x50] sm:$0xff] (!%p1266_p12), %v1522_v32  ;;  %474 = vst [vmem:[#allocation2 + $0x58] sm:$0xff] (!%p1266_p12), %v1522_v32 }
  0x41   : > { %475 = vst [vmem:[#allocation2 + $0x60] sm:$0xff] (!%p1266_p12), %v1522_v32  ;;  %476 = vst [vmem:[#allocation2 + $0x68] sm:$0xff] (!%p1266_p12), %v1522_v32 }
  0x42   : > { %477 = vst [vmem:[#allocation2 + $0x70] sm:$0xff] (!%p1266_p12), %v1522_v32  ;;  %478 = vst [vmem:[#allocation2 + $0x78] sm:$0xff] (!%p1266_p12), %v1522_v32 }
  0x43   : > { %479 = vst [vmem:[#allocation2 + $0x80] sm:$0xff] %v1522_v32  ;;  %480 = vst [vmem:[#allocation2 + $0x88] sm:$0xff] %v1522_v32 }
  0x44   : > { %481 = vst [vmem:[#allocation2 + $0x90] sm:$0xff] %v1522_v32  ;;  %482 = vst [vmem:[#allocation2 + $0x98] sm:$0xff] %v1522_v32 }
  0x45   : > { %483 = vst [vmem:[#allocation2 + $0xa0] sm:$0xff] %v1522_v32  ;;  %484 = vst [vmem:[#allocation2 + $0xa8] sm:$0xff] %v1522_v32 }
  0x46   : > { %485 = vst [vmem:[#allocation2 + $0xb0] sm:$0xff] %v1522_v32  ;;  %486 = vst [vmem:[#allocation2 + $0xb8] sm:$0xff] %v1522_v32 }
  0x47   : > { %487 = vst [vmem:[#allocation2 + $0xc0] sm:$0xff] %v1522_v32  ;;  %488 = vst [vmem:[#allocation2 + $0xc8] sm:$0xff] %v1522_v32 }
  0x48   : > { %489 = vst [vmem:[#allocation2 + $0xd0] sm:$0xff] %v1522_v32  ;;  %490 = vst [vmem:[#allocation2 + $0xd8] sm:$0xff] %v1522_v32 }
  0x49   : > { %491 = vst [vmem:[#allocation2 + $0xe0] sm:$0xff] %v1522_v32  ;;  %492 = vst [vmem:[#allocation2 + $0xe8] sm:$0xff] %v1522_v32 }
  0x4a   : > { %493 = vst [vmem:[#allocation2 + $0xf0] sm:$0xff] %v1522_v32  ;;  %494 = vst [vmem:[#allocation2 + $0xf8] sm:$0xff] %v1522_v32 }
  0x4b PF: > { %v1442_v33 = vld [vmem:[%s1684_s29] sm:$0xff]   ;;  %v1443_v34 = vld [vmem:[%s1684_s29 + $0x8] sm:$0xff]   ;;  %v1444_v35 = vld [vmem:[%s1684_s29 + $0x10] sm:$0xff]   ;;  %p1291_p13 = scmp.ne.s32.totalorder %s1504_s17, 4 }
  0x4c   : > { %1320 = vmatprep.subr.bf16.mxu0 %v1442_v33  ;;  %1368 = vmatprep.subr.bf16.mxu1 %v1442_v33  ;;  %v1445_v36 = vld [vmem:[%s1684_s29 + $0x18] sm:$0xff]   ;;  %v1450_v37 = vld [vmem:[%s1691_s15] sm:$0xff]   ;;  %v1447_v40 = vld [vmem:[%s1684_s29 + $0x28] sm:$0xff]  }
  0x4d   : > { %1321 = vmatpush3.bf16.msra.mxu0 %v1442_v33  ;;  %1376 = vmatpush3.bf16.msra.mxu1 %v1442_v33  ;;  %v1451_v38 = vld [vmem:[%s1691_s15 + $0x40] sm:$0xff]   ;;  %v1448_v41 = vld [vmem:[%s1684_s29 + $0x30] sm:$0xff]   ;;  %v1449_v42 = vld [vmem:[%s1684_s29 + $0x38] sm:$0xff]  }
  0x4e   : > { %1322 = vmatprep.subr.bf16.mxu0 %v1443_v34  ;;  %1369 = vmatprep.subr.bf16.mxu1 %v1443_v34  ;;  %v1446_v39 = vld [vmem:[%s1684_s29 + $0x20] sm:$0xff]   ;;  %v1452_v43 = vld [vmem:[%s1691_s15 + $0x8] sm:$0xff]   ;;  %v1454_v45 = vld [vmem:[%s1691_s15 + $0x10] sm:$0xff]  }
  0x4f   : > { %1336 = vmatprep.mubr.bf16.mxu0 %v1450_v37  ;;  %1352 = vmatprep.mubr.bf16.mxu1 %v1451_v38  ;;  %v1453_v44 = vld [vmem:[%s1691_s15 + $0x48] sm:$0xff]   ;;  %v1455_v46 = vld [vmem:[%s1691_s15 + $0x50] sm:$0xff]   ;;  %v1456_v47 = vld [vmem:[%s1691_s15 + $0x18] sm:$0xff]  }
  0x50   : > { %v1457_v48 = vld [vmem:[%s1691_s15 + $0x58] sm:$0xff]   ;;  %v1458_v49 = vld [vmem:[%s1691_s15 + $0x20] sm:$0xff]   ;;  %v1460_v51 = vld [vmem:[%s1691_s15 + $0x28] sm:$0xff]  }
  0x51   : > { %1323 = vmatpush3.bf16.msra.mxu0 %v1443_v34  ;;  %1377 = vmatpush3.bf16.msra.mxu1 %v1443_v34  ;;  %v1459_v50 = vld [vmem:[%s1691_s15 + $0x60] sm:$0xff]   ;;  %v1461_v52 = vld [vmem:[%s1691_s15 + $0x68] sm:$0xff]   ;;  %v1462_v53 = vld [vmem:[%s1691_s15 + $0x30] sm:$0xff]  }
  0x52   : > { %1324 = vmatprep.subr.bf16.mxu0 %v1444_v35  ;;  %1370 = vmatprep.subr.bf16.mxu1 %v1444_v35  ;;  %v1463_v54 = vld [vmem:[%s1691_s15 + $0x70] sm:$0xff]   ;;  %v1464_v55 = vld [vmem:[%s1691_s15 + $0x38] sm:$0xff]   ;;  %v495_v59 = vld [vmem:[#allocation2] sm:$0xff] }
  0x53   : > { %v1465_v56 = vld [vmem:[%s1691_s15 + $0x78] sm:$0xff]   ;;  %v497_v57 = vld [vmem:[#allocation2 + $0x10] sm:$0xff]  ;;  %v511_v60 = vld [vmem:[#allocation2 + $0x80] sm:$0xff] }
  0x54   : > { %v513_v58 = vld [vmem:[#allocation2 + $0x90] sm:$0xff]  ;;  %v498_v63 = vld [vmem:[#allocation2 + $0x18] sm:$0xff]  ;;  %v496_v5 = vld [vmem:[#allocation2 + $0x8] sm:$0xff] }
  0x55   : > { %1325 = vmatpush3.bf16.msra.mxu0 %v1444_v35  ;;  %1378 = vmatpush3.bf16.msra.mxu1 %v1444_v35  ;;  %v514_v0 = vld [vmem:[#allocation2 + $0x98] sm:$0xff]  ;;  %v512_v6 = vld [vmem:[#allocation2 + $0x88] sm:$0xff]  ;;  %v501_v17 = vld [vmem:[#allocation2 + $0x30] sm:$0xff] }
  0x56   : > { %1326 = vmatprep.subr.bf16.mxu0 %v1445_v36  ;;  %1371 = vmatprep.subr.bf16.mxu1 %v1445_v36  ;;  %v517_v18 = vld [vmem:[#allocation2 + $0xb0] sm:$0xff]  ;;  %v499_v19 = vld [vmem:[#allocation2 + $0x20] sm:$0xff]  ;;  %v502_v23 = vld [vmem:[#allocation2 + $0x38] sm:$0xff] }
  0x57   : > { %v515_v20 = vld [vmem:[#allocation2 + $0xa0] sm:$0xff]  ;;  %v518_v24 = vld [vmem:[#allocation2 + $0xb8] sm:$0xff]  ;;  %v500_v29 = vld [vmem:[#allocation2 + $0x28] sm:$0xff] }
  0x58   : > { %v516_v30 = vld [vmem:[#allocation2 + $0xa8] sm:$0xff] }
  0x59   : > { %1327 = vmatpush3.bf16.msra.mxu0 %v1445_v36  ;;  %1379 = vmatpush3.bf16.msra.mxu1 %v1445_v36 }
  0x5a   : > { %1328 = vmatprep.subr.bf16.mxu0 %v1446_v39  ;;  %1372 = vmatprep.subr.bf16.mxu1 %v1446_v39 }
  0x5d   : > { %1329 = vmatpush3.bf16.msra.mxu0 %v1446_v39  ;;  %1380 = vmatpush3.bf16.msra.mxu1 %v1446_v39 }
  0x5e   : > { %1330 = vmatprep.subr.bf16.mxu0 %v1447_v40  ;;  %1373 = vmatprep.subr.bf16.mxu1 %v1447_v40 }
  0x61   : > { %1331 = vmatpush3.bf16.msra.mxu0 %v1447_v40  ;;  %1381 = vmatpush3.bf16.msra.mxu1 %v1447_v40 }
  0x62   : > { %1332 = vmatprep.subr.bf16.mxu0 %v1448_v41  ;;  %1374 = vmatprep.subr.bf16.mxu1 %v1448_v41 }
  0x65   : > { %1333 = vmatpush3.bf16.msra.mxu0 %v1448_v41  ;;  %1382 = vmatpush3.bf16.msra.mxu1 %v1448_v41  ;;  %v505_v41 = vld [vmem:[#allocation2 + $0x50] sm:$0xff] }
  0x66   : > { %1334 = vmatprep.subr.bf16.mxu0 %v1449_v42  ;;  %1375 = vmatprep.subr.bf16.mxu1 %v1449_v42 }
  0x69   : > { %1335 = vmatpush3.bf16.msra.mxu0 %v1449_v42  ;;  %1383 = vmatpush3.bf16.msra.mxu1 %v1449_v42  ;;  %v521_v42 = vld [vmem:[#allocation2 + $0xd0] sm:$0xff] }
  0x6c   : > { %1337 = vmatmul.mubr.bf16.vlgmr.msra.gmra.mrb[0].mxu0 %v1452_v43  ;;  %1353 = vmatmul.mubr.bf16.vlgmr.msra.gmra.mrb[0].mxu1 %v1453_v44  ;;  %v503_v43 = vld [vmem:[#allocation2 + $0x40] sm:$0xff] }
  0x6d   : > { %1340 = vmatprep.mubr.bf16.mxu0 %v1454_v45  ;;  %1356 = vmatprep.mubr.bf16.mxu1 %v1455_v46  ;;  %v519_v44 = vld [vmem:[#allocation2 + $0xc0] sm:$0xff] }
  0x74   : > { %1341 = vmatmul.mubr.bf16.gmra.mrb[4].mxu0 %v1456_v47  ;;  %1357 = vmatmul.mubr.bf16.gmra.mrb[4].mxu1 %v1457_v48  ;;  %v506_v47 = vld [vmem:[#allocation2 + $0x58] sm:$0xff] }
  0x75   : > { %1344 = vmatprep.mubr.bf16.mxu0 %v1458_v49  ;;  %1360 = vmatprep.mubr.bf16.mxu1 %v1459_v50  ;;  %v522_v48 = vld [vmem:[#allocation2 + $0xd8] sm:$0xff] }
  0x7c   : > { %1345 = vmatmul.mubr.bf16.gmra.mrb[8].mxu0 %v1460_v51  ;;  %1361 = vmatmul.mubr.bf16.gmra.mrb[8].mxu1 %v1461_v52 }
  0x7d   : > { %1348 = vmatprep.mubr.bf16.mxu0 %v1462_v53  ;;  %1364 = vmatprep.mubr.bf16.mxu1 %v1463_v54  ;;  %v504_v53 = vld [vmem:[#allocation2 + $0x48] sm:$0xff] }
  0x7e   : > { %v520_v54 = vld [vmem:[#allocation2 + $0xc8] sm:$0xff] }
  0x84   : > { %1349 = vmatmul.mubr.bf16.gmra.mrb[12].mxu0 %v1464_v55  ;;  %1365 = vmatmul.mubr.bf16.gmra.mrb[12].mxu1 %v1465_v56 }
 0x13f   : > { %v1338_v61 = vpop.f32.mrb[0].mxu0  ;;  %v1354_v62 = vpop.f32.mrb[0].mxu1 }
 0x140   : > { %v882_v1 = vadd.f32 %v1338_v61, %v497_v57  ;;  %v898_v2 = vadd.f32 %v1354_v62, %v513_v58  ;;  %v753_v3 = vpop.f32.mrb[1].mxu0  ;;  %v817_v4 = vpop.f32.mrb[1].mxu1 }
 0x141   : > { %v880_v7 = vadd.f32 %v753_v3, %v495_v59  ;;  %v896_v8 = vadd.f32 %v817_v4, %v511_v60  ;;  %v1339_v9 = vpop.f32.mrb[2].mxu0  ;;  %v1355_v10 = vpop.f32.mrb[2].mxu1  ;;  %v507_v3 = vld [vmem:[#allocation2 + $0x60] sm:$0xff] }
 0x142   : > { %914 = vst [vmem:[#allocation2 + $0x10] sm:$0xff] %v882_v1  ;;  %930 = vst [vmem:[#allocation2 + $0x90] sm:$0xff] %v898_v2  ;;  %v883_v11 = vadd.f32 %v1339_v9, %v498_v63  ;;  %v899_v12 = vadd.f32 %v1355_v10, %v514_v0  ;;  %v756_v13 = vpop.f32.mrb[3].mxu0  ;;  %v820_v14 = vpop.f32.mrb[3].mxu1  ;;  %v509_v1 = vld [vmem:[#allocation2 + $0x70] sm:$0xff]  ;;  %v523_v4 = vld [vmem:[#allocation2 + $0xe0] sm:$0xff] }
 0x143   : > { %912 = vst [vmem:[#allocation2] sm:$0xff] %v880_v7  ;;  %928 = vst [vmem:[#allocation2 + $0x80] sm:$0xff] %v896_v8  ;;  %v881_v15 = vadd.f32 %v756_v13, %v496_v5  ;;  %v897_v16 = vadd.f32 %v820_v14, %v512_v6  ;;  %v525_v2 = vld [vmem:[#allocation2 + $0xf0] sm:$0xff]  ;;  %v510_v7 = vld [vmem:[#allocation2 + $0x78] sm:$0xff] }
 0x144   : > { %915 = vst [vmem:[#allocation2 + $0x18] sm:$0xff] %v883_v11  ;;  %931 = vst [vmem:[#allocation2 + $0x98] sm:$0xff] %v899_v12  ;;  %v526_v8 = vld [vmem:[#allocation2 + $0xf8] sm:$0xff]  ;;  %v508_v13 = vld [vmem:[#allocation2 + $0x68] sm:$0xff] }
 0x145   : > { %913 = vst [vmem:[#allocation2 + $0x8] sm:$0xff] %v881_v15  ;;  %929 = vst [vmem:[#allocation2 + $0x88] sm:$0xff] %v897_v16  ;;  %v524_v14 = vld [vmem:[#allocation2 + $0xe8] sm:$0xff] }
 0x147   : > { %v1342_v21 = vpop.f32.mrb[4].mxu0  ;;  %v1358_v22 = vpop.f32.mrb[4].mxu1 }
 0x148   : > { %v886_v25 = vadd.f32 %v1342_v21, %v501_v17  ;;  %v902_v26 = vadd.f32 %v1358_v22, %v517_v18  ;;  %v769_v27 = vpop.f32.mrb[5].mxu0  ;;  %v833_v28 = vpop.f32.mrb[5].mxu1 }
 0x149   : > { %v884_v31 = vadd.f32 %v769_v27, %v499_v19  ;;  %v900_v32 = vadd.f32 %v833_v28, %v515_v20  ;;  %v1343_v33 = vpop.f32.mrb[6].mxu0  ;;  %v1359_v34 = vpop.f32.mrb[6].mxu1  ;;  %v1727_v27 = vld [vmem:[%s1849_s3] ss:$0 sm:$0xff] (!%p1291_p13) }
 0x14a   : > { %918 = vst [vmem:[#allocation2 + $0x30] sm:$0xff] %v886_v25  ;;  %934 = vst [vmem:[#allocation2 + $0xb0] sm:$0xff] %v902_v26  ;;  %v887_v35 = vadd.f32 %v1343_v33, %v502_v23  ;;  %v903_v36 = vadd.f32 %v1359_v34, %v518_v24  ;;  %v772_v37 = vpop.f32.mrb[7].mxu0  ;;  %v836_v38 = vpop.f32.mrb[7].mxu1  ;;  %v948_v25 = vld [vmem:[#allocation2] sm:$0xff] (!%p1291_p13) }
 0x14b   : > { %916 = vst [vmem:[#allocation2 + $0x20] sm:$0xff] %v884_v31  ;;  %932 = vst [vmem:[#allocation2 + $0xa0] sm:$0xff] %v900_v32  ;;  %v885_v39 = vadd.f32 %v772_v37, %v500_v29  ;;  %v901_v40 = vadd.f32 %v836_v38, %v516_v30  ;;  %v1722_v26 = vld [vmem:[%s1848_s2] ss:$0 sm:$0xff] (!%p1291_p13)  ;;  %v950_v30 = vld [vmem:[#allocation2 + $0x10] sm:$0xff] (!%p1291_p13) }
 0x14c   : > { %919 = vst [vmem:[#allocation2 + $0x38] sm:$0xff] %v887_v35  ;;  %935 = vst [vmem:[#allocation2 + $0xb8] sm:$0xff] %v903_v36  ;;  %v987_v28 = vmul.f32 (!%p1291_p13), %v1722_v26, %v948_v25  ;;  %v949_v29 = vld [vmem:[#allocation2 + $0x8] sm:$0xff] (!%p1291_p13)  ;;  %v951_v31 = vld [vmem:[#allocation2 + $0x18] sm:$0xff] (!%p1291_p13)  ;;  %v989_v33 = vmul.f32 (!%p1291_p13), %v1722_v26, %v950_v30 }
 0x14d   : > { %917 = vst [vmem:[#allocation2 + $0x28] sm:$0xff] %v885_v39  ;;  %933 = vst [vmem:[#allocation2 + $0xa8] sm:$0xff] %v901_v40  ;;  %v988_v32 = vmul.f32 (!%p1291_p13), %v1722_v26, %v949_v29  ;;  %v990_v34 = vmul.f32 (!%p1291_p13), %v1722_v26, %v951_v31 }
 0x14e   : > { %v1026_v38 = vadd.f32 (!%p1291_p13), %v1727_v27, %v987_v28 }
 0x14f   : > { %v1346_v45 = vpop.f32.mrb[8].mxu0  ;;  %v1362_v46 = vpop.f32.mrb[8].mxu1 }
 0x150   : > { %v890_v49 = vadd.f32 %v1346_v45, %v505_v41  ;;  %v906_v50 = vadd.f32 %v1362_v46, %v521_v42  ;;  %v785_v51 = vpop.f32.mrb[9].mxu0  ;;  %v849_v52 = vpop.f32.mrb[9].mxu1  ;;  %v1029_v45 = vadd.f32 (!%p1291_p13), %v1727_v27, %v990_v34 }
 0x151   : > { %v888_v55 = vadd.f32 %v785_v51, %v503_v43  ;;  %v904_v56 = vadd.f32 %v849_v52, %v519_v44  ;;  %v1347_v57 = vpop.f32.mrb[10].mxu0  ;;  %v1363_v58 = vpop.f32.mrb[10].mxu1  ;;  %v954_v37 = vld [vmem:[#allocation2 + $0x30] sm:$0xff] (!%p1291_p13)  ;;  %v1027_v43 = vadd.f32 (!%p1291_p13), %v1727_v27, %v988_v32  ;;  %v1028_v44 = vadd.f32 (!%p1291_p13), %v1727_v27, %v989_v33 }
 0x152   : > { %922 = vst [vmem:[#allocation2 + $0x50] sm:$0xff] %v890_v49  ;;  %938 = vst [vmem:[#allocation2 + $0xd0] sm:$0xff] %v906_v50  ;;  %v891_v59 = vadd.f32 %v1347_v57, %v506_v47  ;;  %v907_v60 = vadd.f32 %v1363_v58, %v522_v48  ;;  %v788_v61 = vpop.f32.mrb[11].mxu0  ;;  %v852_v62 = vpop.f32.mrb[11].mxu1  ;;  %v952_v35 = vld [vmem:[#allocation2 + $0x20] sm:$0xff] (!%p1291_p13)  ;;  %v993_v41 = vmul.f32 (!%p1291_p13), %v1722_v26, %v954_v37  ;;  %v1058_v48 = vmax.f32 (!%p1291_p13), %v1026_v38, 0.0 }
 0x153   : > { %920 = vst [vmem:[#allocation2 + $0x40] sm:$0xff] %v888_v55  ;;  %936 = vst [vmem:[#allocation2 + $0xc0] sm:$0xff] %v904_v56  ;;  %v889_v63 = vadd.f32 %v788_v61, %v504_v53  ;;  %v905_v0 = vadd.f32 %v852_v62, %v520_v54  ;;  %v991_v39 = vmul.f32 (!%p1291_p13), %v1722_v26, %v952_v35  ;;  %v955_v42 = vld [vmem:[#allocation2 + $0x38] sm:$0xff] (!%p1291_p13)  ;;  %v1059_v55 = vmax.f32 (!%p1291_p13), %v1027_v43, 0.0  ;;  %v968_v29 = vld [vmem:[#allocation2 + $0xa0] sm:$0xff] (!%p1291_p13) }
 0x154   : > { %923 = vst [vmem:[#allocation2 + $0x58] sm:$0xff] %v891_v59  ;;  %939 = vst [vmem:[#allocation2 + $0xd8] sm:$0xff] %v907_v60  ;;  %v953_v36 = vld [vmem:[#allocation2 + $0x28] sm:$0xff] (!%p1291_p13)  ;;  %v994_v46 = vmul.f32 (!%p1291_p13), %v1722_v26, %v955_v42  ;;  %v1032_v51 = vadd.f32 (!%p1291_p13), %v1727_v27, %v993_v41  ;;  %v1060_v56 = vmax.f32 (!%p1291_p13), %v1028_v44, 0.0  ;;  %v1061_v57 = vmax.f32 (!%p1291_p13), %v1029_v45, 0.0  ;;  %v970_v31 = vld [vmem:[#allocation2 + $0xb0] sm:$0xff] (!%p1291_p13) }
 0x155   : > { %921 = vst [vmem:[#allocation2 + $0x48] sm:$0xff] %v889_v63  ;;  %937 = vst [vmem:[#allocation2 + $0xc8] sm:$0xff] %v905_v0  ;;  %v992_v40 = vmul.f32 (!%p1291_p13), %v1722_v26, %v953_v36  ;;  %v1030_v49 = vadd.f32 (!%p1291_p13), %v1727_v27, %v991_v39  ;;  %v969_v30 = vld [vmem:[#allocation2 + $0xa8] sm:$0xff] (!%p1291_p13)  ;;  %v971_v36 = vld [vmem:[#allocation2 + $0xb8] sm:$0xff] (!%p1291_p13)  ;;  %v1007_v42 = vmul.f32 (!%p1291_p13), %v1722_v26, %v968_v29 }
 0x156   : > { %v1033_v58 = vadd.f32 (!%p1291_p13), %v1727_v27, %v994_v46  ;;  %1090 = vst [vmem:[%s1689_s7] sm:$0xff] (!%p1291_p13), %v1058_v48  ;;  %v1064_v0 = vmax.f32 (!%p1291_p13), %v1032_v51, 0.0  ;;  %1091 = vst [vmem:[%s1689_s7 + $0x8] sm:$0xff] (!%p1291_p13), %v1059_v55  ;;  %v1008_v43 = vmul.f32 (!%p1291_p13), %v1722_v26, %v969_v30  ;;  %v1009_v44 = vmul.f32 (!%p1291_p13), %v1722_v26, %v970_v31 }
 0x157   : > { %v1350_v5 = vpop.f32.mrb[12].mxu0  ;;  %v1366_v6 = vpop.f32.mrb[12].mxu1  ;;  %947 = sbr.rel (%p1291_p13) target bundleno = 368 (0x170), region = 85  ;;  %v1031_v50 = vadd.f32 (!%p1291_p13), %v1727_v27, %v992_v40  ;;  %v1062_v62 = vmax.f32 (!%p1291_p13), %v1030_v49, 0.0  ;;  %1092 = vst [vmem:[%s1689_s7 + $0x10] sm:$0xff] (!%p1291_p13), %v1060_v56  ;;  %1093 = vst [vmem:[%s1689_s7 + $0x18] sm:$0xff] (!%p1291_p13), %v1061_v57  ;;  %v1010_v48 = vmul.f32 (!%p1291_p13), %v1722_v26, %v971_v36  ;;  %v1046_v51 = vadd.f32 (!%p1291_p13), %v1727_v27, %v1007_v42 }
 0x158   : > { %v894_v9 = vadd.f32 %v1350_v5, %v509_v1  ;;  %v910_v10 = vadd.f32 %v1366_v6, %v525_v2  ;;  %v801_v11 = vpop.f32.mrb[13].mxu0  ;;  %v865_v12 = vpop.f32.mrb[13].mxu1  ;;  %1096 = vst [vmem:[%s1689_s7 + $0x30] sm:$0xff] (!%p1291_p13), %v1064_v0 }
 0x159   : > { %v892_v15 = vadd.f32 %v801_v11, %v507_v3  ;;  %v908_v16 = vadd.f32 %v865_v12, %v523_v4  ;;  %v1351_v17 = vpop.f32.mrb[14].mxu0  ;;  %v1367_v18 = vpop.f32.mrb[14].mxu1  ;;  %v958_v53 = vld [vmem:[#allocation2 + $0x50] sm:$0xff] (!%p1291_p13)  ;;  %v1063_v63 = vmax.f32 (!%p1291_p13), %v1031_v50, 0.0  ;;  %v1065_v3 = vmax.f32 (!%p1291_p13), %v1033_v58, 0.0  ;;  %1094 = vst [vmem:[%s1689_s7 + $0x20] sm:$0xff] (!%p1291_p13), %v1062_v62 }
 0x15a   : > { %926 = vst [vmem:[#allocation2 + $0x70] sm:$0xff] %v894_v9  ;;  %942 = vst [vmem:[#allocation2 + $0xf0] sm:$0xff] %v910_v10  ;;  %v895_v19 = vadd.f32 %v1351_v17, %v510_v7  ;;  %v911_v20 = vadd.f32 %v1367_v18, %v526_v8  ;;  %v804_v21 = vpop.f32.mrb[15].mxu0  ;;  %v868_v22 = vpop.f32.mrb[15].mxu1  ;;  %v956_v47 = vld [vmem:[#allocation2 + $0x40] sm:$0xff] (!%p1291_p13)  ;;  %v997_v5 = vmul.f32 (!%p1291_p13), %v1722_v26, %v958_v53  ;;  %v974_v55 = vld [vmem:[#allocation2 + $0xd0] sm:$0xff] (!%p1291_p13) }
 0x15b   : > { %924 = vst [vmem:[#allocation2 + $0x60] sm:$0xff] %v892_v15  ;;  %940 = vst [vmem:[#allocation2 + $0xe0] sm:$0xff] %v908_v16  ;;  %v893_v23 = vadd.f32 %v804_v21, %v508_v13  ;;  %v909_v24 = vadd.f32 %v868_v22, %v524_v14  ;;  %v959_v54 = vld [vmem:[#allocation2 + $0x58] sm:$0xff] (!%p1291_p13)  ;;  %v995_v1 = vmul.f32 (!%p1291_p13), %v1722_v26, %v956_v47  ;;  %v964_v15 = vld [vmem:[#allocation2 + $0x80] sm:$0xff] (!%p1291_p13)  ;;  %v1078_v0 = vmax.f32 (!%p1291_p13), %v1046_v51, 0.0 }
 0x15c   : > { %927 = vst [vmem:[#allocation2 + $0x78] sm:$0xff] %v895_v19  ;;  %943 = vst [vmem:[#allocation2 + $0xf8] sm:$0xff] %v911_v20  ;;  %v957_v52 = vld [vmem:[#allocation2 + $0x48] sm:$0xff] (!%p1291_p13)  ;;  %v998_v6 = vmul.f32 (!%p1291_p13), %v1722_v26, %v959_v54  ;;  %v1036_v12 = vadd.f32 (!%p1291_p13), %v1727_v27, %v997_v5  ;;  %v966_v21 = vld [vmem:[#allocation2 + $0x90] sm:$0xff] (!%p1291_p13)  ;;  %v1003_v35 = vmul.f32 (!%p1291_p13), %v1722_v26, %v964_v15 }
 0x15d   : > { %925 = vst [vmem:[#allocation2 + $0x68] sm:$0xff] %v893_v23  ;;  %941 = vst [vmem:[#allocation2 + $0xe8] sm:$0xff] %v909_v24  ;;  %v996_v4 = vmul.f32 (!%p1291_p13), %v1722_v26, %v957_v52  ;;  %v1034_v7 = vadd.f32 (!%p1291_p13), %v1727_v27, %v995_v1  ;;  %v965_v20 = vld [vmem:[#allocation2 + $0x88] sm:$0xff] (!%p1291_p13)  ;;  %v967_v22 = vld [vmem:[#allocation2 + $0x98] sm:$0xff] (!%p1291_p13)  ;;  %v1005_v39 = vmul.f32 (!%p1291_p13), %v1722_v26, %v966_v21 }
 0x15e   : > { %1095 = vst [vmem:[%s1689_s7 + $0x28] sm:$0xff] %v1063_v63  ;;  %1097 = vst [vmem:[%s1689_s7 + $0x38] sm:$0xff] %v1065_v3  ;;  %v1037_v13 = vadd.f32 %v1727_v27, %v998_v6  ;;  %v1068_v24 = vmax.f32 %v1036_v12, 0.0  ;;  %v1004_v38 = vmul.f32 %v1722_v26, %v965_v20  ;;  %v1006_v40 = vmul.f32 %v1722_v26, %v967_v22  ;;  %v972_v49 = vld [vmem:[#allocation2 + $0xc0] sm:$0xff]  ;;  %v973_v54 = vld [vmem:[#allocation2 + $0xc8] sm:$0xff] }
 0x15f   : > { %v1035_v11 = vadd.f32 %v1727_v27, %v996_v4  ;;  %v1066_v16 = vmax.f32 %v1034_v7, 0.0  ;;  %v1042_v41 = vadd.f32 %v1727_v27, %v1003_v35  ;;  %v1044_v46 = vadd.f32 %v1727_v27, %v1005_v39  ;;  %v975_v56 = vld [vmem:[#allocation2 + $0xd8] sm:$0xff]  ;;  %1110 = vst [vmem:[%s1689_s7 + $0xa0] sm:$0xff] %v1078_v0 }
 0x160   : > { %v1069_v25 = vmax.f32 %v1037_v13, 0.0  ;;  %1100 = vst [vmem:[%s1689_s7 + $0x50] sm:$0xff] %v1068_v24  ;;  %v1043_v45 = vadd.f32 %v1727_v27, %v1004_v38  ;;  %v1045_v47 = vadd.f32 %v1727_v27, %v1006_v40  ;;  %v1047_v52 = vadd.f32 %v1727_v27, %v1008_v43 }
 0x161   : > { %v962_v61 = vld [vmem:[#allocation2 + $0x70] sm:$0xff]  ;;  %v1067_v23 = vmax.f32 %v1035_v11, 0.0  ;;  %1098 = vst [vmem:[%s1689_s7 + $0x40] sm:$0xff] %v1066_v16  ;;  %v1074_v50 = vmax.f32 %v1042_v41, 0.0  ;;  %v1048_v53 = vadd.f32 %v1727_v27, %v1009_v44  ;;  %v1076_v58 = vmax.f32 %v1044_v46, 0.0 }
 0x162   : > { %v960_v59 = vld [vmem:[#allocation2 + $0x60] sm:$0xff]  ;;  %v1001_v10 = vmul.f32 %v1722_v26, %v962_v61  ;;  %1101 = vst [vmem:[%s1689_s7 + $0x58] sm:$0xff] %v1069_v25  ;;  %v1075_v57 = vmax.f32 %v1043_v45, 0.0  ;;  %v978_v63 = vld [vmem:[#allocation2 + $0xf0] sm:$0xff]  ;;  %v1079_v1 = vmax.f32 %v1047_v52, 0.0  ;;  %v1011_v3 = vmul.f32 %v1722_v26, %v972_v49 }
 0x163   : > { %v963_v2 = vld [vmem:[#allocation2 + $0x78] sm:$0xff]  ;;  %v999_v8 = vmul.f32 %v1722_v26, %v960_v59  ;;  %1099 = vst [vmem:[%s1689_s7 + $0x48] sm:$0xff] %v1067_v23  ;;  %v1077_v59 = vmax.f32 %v1045_v47, 0.0  ;;  %v976_v61 = vld [vmem:[#allocation2 + $0xe0] sm:$0xff]  ;;  %1106 = vst [vmem:[%s1689_s7 + $0x80] sm:$0xff] %v1074_v50  ;;  %v1012_v6 = vmul.f32 %v1722_v26, %v973_v54  ;;  %v1013_v7 = vmul.f32 %v1722_v26, %v974_v55 }
 0x164   : > { %v961_v60 = vld [vmem:[#allocation2 + $0x68] sm:$0xff]  ;;  %v1002_v14 = vmul.f32 %v1722_v26, %v963_v2  ;;  %v1040_v19 = vadd.f32 %v1727_v27, %v1001_v10  ;;  %v1080_v2 = vmax.f32 %v1048_v53, 0.0  ;;  %v979_v4 = vld [vmem:[#allocation2 + $0xf8] sm:$0xff]  ;;  %1107 = vst [vmem:[%s1689_s7 + $0x88] sm:$0xff] %v1075_v57  ;;  %1108 = vst [vmem:[%s1689_s7 + $0x90] sm:$0xff] %v1076_v58  ;;  %v1015_v10 = vmul.f32 %v1722_v26, %v976_v61 }
 0x165   : > { %v1000_v9 = vmul.f32 %v1722_v26, %v961_v60  ;;  %v1038_v17 = vadd.f32 %v1727_v27, %v999_v8  ;;  %v1049_v60 = vadd.f32 %v1727_v27, %v1010_v48  ;;  %v977_v62 = vld [vmem:[#allocation2 + $0xe8] sm:$0xff]  ;;  %1109 = vst [vmem:[%s1689_s7 + $0x98] sm:$0xff] %v1077_v59  ;;  %v1014_v8 = vmul.f32 %v1722_v26, %v975_v56 }
 0x166   : > { %v1041_v28 = vadd.f32 %v1727_v27, %v1002_v14  ;;  %v1072_v34 = vmax.f32 %v1040_v19, 0.0  ;;  %1111 = vst [vmem:[%s1689_s7 + $0xa8] sm:$0xff] %v1079_v1  ;;  %1112 = vst [vmem:[%s1689_s7 + $0xb0] sm:$0xff] %v1080_v2  ;;  %v1016_v11 = vmul.f32 %v1722_v26, %v977_v62  ;;  %v1017_v12 = vmul.f32 %v1722_v26, %v978_v63 }
 0x167   : > { %v1039_v18 = vadd.f32 %v1727_v27, %v1000_v9  ;;  %v1070_v32 = vmax.f32 %v1038_v17, 0.0  ;;  %v1081_v5 = vmax.f32 %v1049_v60, 0.0  ;;  %v1050_v9 = vadd.f32 %v1727_v27, %v1011_v3 }
 0x168   : > { %v1073_v37 = vmax.f32 %v1041_v28, 0.0  ;;  %1104 = vst [vmem:[%s1689_s7 + $0x70] sm:$0xff] %v1072_v34  ;;  %v1051_v13 = vadd.f32 %v1727_v27, %v1012_v6  ;;  %v1052_v14 = vadd.f32 %v1727_v27, %v1013_v7  ;;  %v1053_v15 = vadd.f32 %v1727_v27, %v1014_v8 }
 0x169   : > { %v1071_v33 = vmax.f32 %v1039_v18, 0.0  ;;  %1102 = vst [vmem:[%s1689_s7 + $0x60] sm:$0xff] %v1070_v32  ;;  %1113 = vst [vmem:[%s1689_s7 + $0xb8] sm:$0xff] %v1081_v5  ;;  %v1018_v16 = vmul.f32 %v1722_v26, %v979_v4  ;;  %v1082_v17 = vmax.f32 %v1050_v9, 0.0  ;;  %v1054_v18 = vadd.f32 %v1727_v27, %v1015_v10 }
 0x16a   : > { %1105 = vst [vmem:[%s1689_s7 + $0x78] sm:$0xff] %v1073_v37  ;;  %v1055_v19 = vadd.f32 %v1727_v27, %v1016_v11  ;;  %v1056_v20 = vadd.f32 %v1727_v27, %v1017_v12  ;;  %v1083_v21 = vmax.f32 %v1051_v13, 0.0  ;;  %v1084_v22 = vmax.f32 %v1052_v14, 0.0 }
 0x16b   : > { %1103 = vst [vmem:[%s1689_s7 + $0x68] sm:$0xff] %v1071_v33  ;;  %v1085_v23 = vmax.f32 %v1053_v15, 0.0  ;;  %v1057_v24 = vadd.f32 %v1727_v27, %v1018_v16  ;;  %1114 = vst [vmem:[%s1689_s7 + $0xc0] sm:$0xff] %v1082_v17  ;;  %v1086_v25 = vmax.f32 %v1054_v18, 0.0 }
 0x16c   : > { %v1087_v28 = vmax.f32 %v1055_v19, 0.0  ;;  %v1088_v26 = vmax.f32 %v1056_v20, 0.0  ;;  %1115 = vst [vmem:[%s1689_s7 + $0xc8] sm:$0xff] %v1083_v21  ;;  %1116 = vst [vmem:[%s1689_s7 + $0xd0] sm:$0xff] %v1084_v22 }
 0x16d   : > { %1117 = vst [vmem:[%s1689_s7 + $0xd8] sm:$0xff] %v1085_v23  ;;  %v1089_v29 = vmax.f32 %v1057_v24, 0.0  ;;  %1118 = vst [vmem:[%s1689_s7 + $0xe0] sm:$0xff] %v1086_v25 }
 0x16e   : > { %1119 = vst [vmem:[%s1689_s7 + $0xe8] sm:$0xff] %v1087_v28  ;;  %1120 = vst [vmem:[%s1689_s7 + $0xf0] sm:$0xff] %v1088_v26 }
 0x16f   : > { %1121 = vst [vmem:[%s1689_s7 + $0xf8] sm:$0xff] %v1089_v29 }
 0x170 PF: > { %s14_s21 = sadd.s32 1, %s1520_s21   ;;  %s1851_s15 = smov %s1500_s16 }
 0x171   : > { %p11_p0 = scmp.ge.s32.totalorder %s14_s21, 12   ;;  %s1852_s16 = smov %s1599_s28 }
 0x172   : > { %s1853_s17 = smov %s1512_s19  ;;  %s1854_s18 = smov %s1516_s20 }
 0x173   : > { %s1855_s19 = smov %s1858_s22  ;;  %s1856_s20 = smov %s1862_s23 }
 0x174   :  { %13 = sbr.rel (!%p11_p0) target bundleno = 4 (0x4), region = 129 }

// kernel: bottleneck_forward.6
= control target key start
LH: loop header
LB: loop body
LE: loop exit
PB: predicated region body
PF: predicated region fallthrough
CT: control target
= control target key end

     0   :  { %s1598_s15 = smov 0   ;;  %s1600_s16 = smov 0   ;;  %s1925_s0 = inlined_call_operand.vmem [shape: bf16[512,128], index: 0, kind: input, shape index: {}]   ;;  %s1926_s1 = inlined_call_operand.vmem [shape: bf16[128,256], index: 1, kind: input, shape index: {}]   ;;  %s1927_s2 = inlined_call_operand.vmem [shape: f32[1,256], index: 2, kind: input, shape index: {}]   ;;  %s1928_s3 = inlined_call_operand.vmem [shape: f32[1,256], index: 3, kind: input, shape index: {}]   ;;  %s1929_s4 = inlined_call_operand.vmem [shape: f32[512,256], index: 4, kind: output, shape index: {}]  }
   0x1   :  { %s1602_s17 = smov 0  }
   0x2 LB: > { %s33_s18 = sadd.s32 1, %s1566_s16  ;;  %p1426_p0 = scmp.ge.s32.totalorder %s1570_s17, 1  ;;  %s1570_s17 = sphi %s1602_s17, %s14_s17   ;;  %s1566_s16 = sphi %s1600_s16, %s1931_s16   ;;  %s1562_s15 = sphi %s1598_s15, %s1930_s15  }
   0x3   : > { %p35_p1 = scmp.ge.s32.totalorder %s33_s18, 2  ;;  %p228_p2 = scmp.lt.s32.totalorder %s1570_s17, 3 }
   0x5   : > { %s1933_s18 = smov (%p35_p1, %s33_s18), 0  ;;  %p229_p3 = pnand %p1426_p0, %p228_p2 }
   0x6   : > { %v1508_v0 = vld [vmem:[%s1926_s1 + $0x4] ss:$8 sps:$4 sm:$0xff] (!%p229_p3)   ;;  %s1427_s21 = sshll.u32 (!%p229_p3), %s1562_s15, 5  ;;  %v1510_v1 = vld [vmem:[%s1926_s1] ss:$8 sps:$4 sm:$0xff] (!%p229_p3)   ;;  %v1572_v2 = vmov (!%p229_p3), 0   ;;  %v1070_v33 = vlaneseq (!%p229_p3) }
   0x7   : > { %232 = sbr.rel (%p229_p3) target bundleno = 316 (0x13c), region = 36  ;;  %712 = vmatprep.mubr.bf16.mxu0 (!%p229_p3), %v1572_v2  ;;  %792 = vmatprep.mubr.bf16.mxu1 (!%p229_p3), %v1572_v2  ;;  %p281_p4 = scmp.lt.s32.totalorder (!%p229_p3), %s1427_s21, 63  ;;  %v1511_v3 = vld [vmem:[%s1926_s1 + $0x14] ss:$8 sps:$4 sm:$0xff] (!%p229_p3)   ;;  %v1513_v4 = vld [vmem:[%s1926_s1 + $0x10] ss:$8 sps:$4 sm:$0xff] (!%p229_p3)  }
   0x8   : > { %680 = vmatprep.subr.bf16.mxu0 (!%p229_p3), %v1508_v0  ;;  %1467 = vmatprep.subr.bf16.mxu1 (!%p229_p3), %v1508_v0  ;;  %v1514_v5 = vld [vmem:[%s1926_s1 + $0x24] ss:$8 sps:$4 sm:$0xff] (!%p229_p3)   ;;  %v1516_v6 = vld [vmem:[%s1926_s1 + $0x20] ss:$8 sps:$4 sm:$0xff] (!%p229_p3)   ;;  %v1517_v7 = vld [vmem:[%s1926_s1 + $0x34] ss:$8 sps:$4 sm:$0xff] (!%p229_p3)  }
   0x9   : > { %681 = vmatpush1.bf16.msra.mxu0 (!%p229_p3), %v1510_v1  ;;  %1475 = vmatpush1.bf16.msra.mxu1 (!%p229_p3), %v1510_v1  ;;  %v1519_v8 = vld [vmem:[%s1926_s1 + $0x30] ss:$8 sps:$4 sm:$0xff] (!%p229_p3)   ;;  %v1520_v9 = vld [vmem:[%s1926_s1 + $0x44] ss:$8 sps:$4 sm:$0xff] (!%p229_p3)   ;;  %v1522_v10 = vld [vmem:[%s1926_s1 + $0x40] ss:$8 sps:$4 sm:$0xff] (!%p229_p3)  }
   0xa   : > { %682 = vmatprep.subr.bf16.mxu0 (!%p229_p3), %v1511_v3  ;;  %1468 = vmatprep.subr.bf16.mxu1 (!%p229_p3), %v1511_v3  ;;  %v1523_v11 = vld [vmem:[%s1926_s1 + $0x54] ss:$8 sps:$4 sm:$0xff] (!%p229_p3)   ;;  %v1525_v12 = vld [vmem:[%s1926_s1 + $0x50] ss:$8 sps:$4 sm:$0xff] (!%p229_p3)   ;;  %v1526_v13 = vld [vmem:[%s1926_s1 + $0x64] ss:$8 sps:$4 sm:$0xff] (!%p229_p3)  }
   0xb   : > { %v1528_v14 = vld [vmem:[%s1926_s1 + $0x60] ss:$8 sps:$4 sm:$0xff] (!%p229_p3)   ;;  %v1529_v15 = vld [vmem:[%s1926_s1 + $0x74] ss:$8 sps:$4 sm:$0xff] (!%p229_p3)   ;;  %v1531_v16 = vld [vmem:[%s1926_s1 + $0x70] ss:$8 sps:$4 sm:$0xff] (!%p229_p3)  }
   0xc   : > { %v1071_v34 = vshrl.u32 (!%p229_p3), %v1070_v33, 7  ;;  %v1068_v36 = vld [vmem:[%s1927_s2] sm:$0x3] (!%p229_p3) }
   0xd   : > { %683 = vmatpush1.bf16.msra.mxu0 (!%p229_p3), %v1513_v4  ;;  %1476 = vmatpush1.bf16.msra.mxu1 (!%p229_p3), %v1513_v4  ;;  %v1144_v38 = vld [vmem:[%s1928_s3] sm:$0x3] (!%p229_p3) }
   0xe   : > { %s1935_s21 = smov (!%p281_p4, %s1427_s21), 63  ;;  %684 = vmatprep.subr.bf16.mxu0 %v1514_v5  ;;  %1469 = vmatprep.subr.bf16.mxu1 %v1514_v5  ;;  %v1072_v35 = vsub.s32 0, %v1071_v34  ;;  %v1076_v37 = vsub.s32 1, %v1071_v34 }
   0xf   : > { %s1428_s30 = sshll.u32 %s1935_s21, 2  ;;  %s1466_s13 = sshll.u32 %s1935_s21, 4 }
  0x10   : > { %s1645_s11 = scalar_lea.vmem %s1925_s0, %s1428_s30  ;;  %v1710_v39 = vrot.slane %v1068_v36, %v1072_v35  ;;  %v1712_v40 = vrot.slane %v1068_v36, %v1076_v37  ;;  %v1715_v41 = vrot.slane %v1144_v38, %v1072_v35  ;;  %v1717_v44 = vrot.slane %v1144_v38, %v1076_v37  ;;  %s1724_s15 = scalar_lea.vmem %s1929_s4, %s1466_s13 }
  0x11   : > { %685 = vmatpush1.bf16.msra.mxu0 %v1516_v6  ;;  %1477 = vmatpush1.bf16.msra.mxu1 %v1516_v6  ;;  %v1532_v17 = vld [vmem:[%s1645_s11] sm:$0xff]   ;;  %v1534_v19 = vld [vmem:[%s1645_s11 + $0x8] sm:$0xff]   ;;  %v1536_v21 = vld [vmem:[%s1645_s11 + $0x10] sm:$0xff]  }
  0x12   : > { %686 = vmatprep.subr.bf16.mxu0 %v1517_v7  ;;  %1470 = vmatprep.subr.bf16.mxu1 %v1517_v7  ;;  %v1533_v18 = vld [vmem:[%s1645_s11 + $0x40] sm:$0xff]   ;;  %v1535_v20 = vld [vmem:[%s1645_s11 + $0x48] sm:$0xff]   ;;  %v1537_v22 = vld [vmem:[%s1645_s11 + $0x50] sm:$0xff]  }
  0x13   : > { %v1538_v23 = vld [vmem:[%s1645_s11 + $0x18] sm:$0xff]   ;;  %v1540_v25 = vld [vmem:[%s1645_s11 + $0x20] sm:$0xff]   ;;  %v1542_v27 = vld [vmem:[%s1645_s11 + $0x28] sm:$0xff]  }
  0x14   : > { %v1539_v24 = vld [vmem:[%s1645_s11 + $0x58] sm:$0xff]   ;;  %v1541_v26 = vld [vmem:[%s1645_s11 + $0x60] sm:$0xff]   ;;  %v1543_v28 = vld [vmem:[%s1645_s11 + $0x68] sm:$0xff]  }
  0x15   : > { %687 = vmatpush1.bf16.msra.mxu0 %v1519_v8  ;;  %1478 = vmatpush1.bf16.msra.mxu1 %v1519_v8  ;;  %v1544_v29 = vld [vmem:[%s1645_s11 + $0x30] sm:$0xff]   ;;  %v1546_v31 = vld [vmem:[%s1645_s11 + $0x38] sm:$0xff]  }
  0x16   : > { %688 = vmatprep.subr.bf16.mxu0 %v1520_v9  ;;  %1471 = vmatprep.subr.bf16.mxu1 %v1520_v9  ;;  %v1545_v30 = vld [vmem:[%s1645_s11 + $0x70] sm:$0xff]   ;;  %v1547_v32 = vld [vmem:[%s1645_s11 + $0x78] sm:$0xff]  }
  0x19   : > { %689 = vmatpush1.bf16.msra.mxu0 %v1522_v10  ;;  %1479 = vmatpush1.bf16.msra.mxu1 %v1522_v10 }
  0x1a   : > { %690 = vmatprep.subr.bf16.mxu0 %v1523_v11  ;;  %1472 = vmatprep.subr.bf16.mxu1 %v1523_v11 }
  0x1d   : > { %691 = vmatpush1.bf16.msra.mxu0 %v1525_v12  ;;  %1480 = vmatpush1.bf16.msra.mxu1 %v1525_v12 }
  0x1e   : > { %692 = vmatprep.subr.bf16.mxu0 %v1526_v13  ;;  %1473 = vmatprep.subr.bf16.mxu1 %v1526_v13 }
  0x21   : > { %693 = vmatpush1.bf16.msra.mxu0 %v1528_v14  ;;  %1481 = vmatpush1.bf16.msra.mxu1 %v1528_v14 }
  0x22   : > { %694 = vmatprep.subr.bf16.mxu0 %v1529_v15  ;;  %1474 = vmatprep.subr.bf16.mxu1 %v1529_v15 }
  0x25   : > { %695 = vmatpush1.bf16.msra.mxu0 %v1531_v16  ;;  %1482 = vmatpush1.bf16.msra.mxu1 %v1531_v16 }
  0x28   : > { %713 = vmatmul.mubr.bf16.vlgmr.msra.gmra.mrb[0].mxu0 %v1532_v17  ;;  %793 = vmatmul.mubr.bf16.vlgmr.msra.gmra.mrb[0].mxu1 %v1533_v18 }
  0x29   : > { %722 = vmatprep.mubr.bf16.mxu0 %v1572_v2  ;;  %802 = vmatprep.mubr.bf16.mxu1 %v1572_v2 }
  0x30   : > { %723 = vmatmul.mubr.bf16.gmra.mrb[4].mxu0 %v1534_v19  ;;  %803 = vmatmul.mubr.bf16.gmra.mrb[4].mxu1 %v1535_v20 }
  0x31   : > { %732 = vmatprep.mubr.bf16.mxu0 %v1572_v2  ;;  %812 = vmatprep.mubr.bf16.mxu1 %v1572_v2 }
  0x38   : > { %733 = vmatmul.mubr.bf16.gmra.mrb[8].mxu0 %v1536_v21  ;;  %813 = vmatmul.mubr.bf16.gmra.mrb[8].mxu1 %v1537_v22 }
  0x39   : > { %742 = vmatprep.mubr.bf16.mxu0 %v1572_v2  ;;  %822 = vmatprep.mubr.bf16.mxu1 %v1572_v2 }
  0x40   : > { %743 = vmatmul.mubr.bf16.gmra.mrb[12].mxu0 %v1538_v23  ;;  %823 = vmatmul.mubr.bf16.gmra.mrb[12].mxu1 %v1539_v24 }
  0x41   : > { %752 = vmatprep.mubr.bf16.mxu0 %v1572_v2  ;;  %832 = vmatprep.mubr.bf16.mxu1 %v1572_v2 }
  0x48   : > { %753 = vmatmul.mubr.bf16.gmra.mrb[16].mxu0 %v1540_v25  ;;  %833 = vmatmul.mubr.bf16.gmra.mrb[16].mxu1 %v1541_v26 }
  0x49   : > { %762 = vmatprep.mubr.bf16.mxu0 %v1572_v2  ;;  %842 = vmatprep.mubr.bf16.mxu1 %v1572_v2 }
  0x50   : > { %763 = vmatmul.mubr.bf16.gmra.mrb[20].mxu0 %v1542_v27  ;;  %843 = vmatmul.mubr.bf16.gmra.mrb[20].mxu1 %v1543_v28 }
  0x51   : > { %772 = vmatprep.mubr.bf16.mxu0 %v1572_v2  ;;  %852 = vmatprep.mubr.bf16.mxu1 %v1572_v2 }
  0x58   : > { %773 = vmatmul.mubr.bf16.gmra.mrb[24].mxu0 %v1544_v29  ;;  %853 = vmatmul.mubr.bf16.gmra.mrb[24].mxu1 %v1545_v30 }
  0x59   : > { %782 = vmatprep.mubr.bf16.mxu0 %v1572_v2  ;;  %862 = vmatprep.mubr.bf16.mxu1 %v1572_v2 }
  0x60   : > { %783 = vmatmul.mubr.bf16.gmra.mrb[28].mxu0 %v1546_v31  ;;  %863 = vmatmul.mubr.bf16.gmra.mrb[28].mxu1 %v1547_v32 }
  0xfb   : > { %v714_v42 = vpop.f32.mrb[0].mxu0  ;;  %v794_v43 = vpop.f32.mrb[0].mxu1 }
  0xfc   : > { %v1080_v45 = vmul.f32 %v1710_v39, %v714_v42  ;;  %v1112_v46 = vmul.f32 %v1710_v39, %v794_v43  ;;  %v716_v47 = vpop.f32.mrb[1].mxu0  ;;  %v796_v48 = vpop.f32.mrb[1].mxu1 }
  0xfd   : > { %v1081_v49 = vmul.f32 %v1712_v40, %v716_v47  ;;  %v1113_v50 = vmul.f32 %v1712_v40, %v796_v48  ;;  %v718_v51 = vpop.f32.mrb[2].mxu0  ;;  %v798_v52 = vpop.f32.mrb[2].mxu1 }
  0xfe   : > { %v1156_v53 = vadd.f32 %v1715_v41, %v1080_v45  ;;  %v1188_v54 = vadd.f32 %v1715_v41, %v1112_v46  ;;  %v1082_v55 = vmul.f32 %v1710_v39, %v718_v51  ;;  %v1114_v56 = vmul.f32 %v1710_v39, %v798_v52  ;;  %v720_v57 = vpop.f32.mrb[3].mxu0  ;;  %v800_v58 = vpop.f32.mrb[3].mxu1 }
  0xff   : > { %v1157_v59 = vadd.f32 %v1717_v44, %v1081_v49  ;;  %v1189_v60 = vadd.f32 %v1717_v44, %v1113_v50  ;;  %v1083_v61 = vmul.f32 %v1712_v40, %v720_v57  ;;  %v1115_v62 = vmul.f32 %v1712_v40, %v800_v58 }
 0x100   : > { %1220 = vst [vmem:[%s1724_s15] sm:$0xff] %v1156_v53  ;;  %1252 = vst [vmem:[%s1724_s15 + $0x100] sm:$0xff] %v1188_v54  ;;  %v1158_v63 = vadd.f32 %v1715_v41, %v1082_v55  ;;  %v1190_v0 = vadd.f32 %v1715_v41, %v1114_v56 }
 0x101   : > { %1221 = vst [vmem:[%s1724_s15 + $0x8] sm:$0xff] %v1157_v59  ;;  %1253 = vst [vmem:[%s1724_s15 + $0x108] sm:$0xff] %v1189_v60  ;;  %v1159_v1 = vadd.f32 %v1717_v44, %v1083_v61  ;;  %v1191_v2 = vadd.f32 %v1717_v44, %v1115_v62 }
 0x102   : > { %1222 = vst [vmem:[%s1724_s15 + $0x10] sm:$0xff] %v1158_v63  ;;  %1254 = vst [vmem:[%s1724_s15 + $0x110] sm:$0xff] %v1190_v0 }
 0x103   : > { %1223 = vst [vmem:[%s1724_s15 + $0x18] sm:$0xff] %v1159_v1  ;;  %1255 = vst [vmem:[%s1724_s15 + $0x118] sm:$0xff] %v1191_v2  ;;  %v724_v3 = vpop.f32.mrb[4].mxu0  ;;  %v804_v4 = vpop.f32.mrb[4].mxu1 }
 0x104   : > { %v1084_v5 = vmul.f32 %v1710_v39, %v724_v3  ;;  %v1116_v6 = vmul.f32 %v1710_v39, %v804_v4  ;;  %v726_v7 = vpop.f32.mrb[5].mxu0  ;;  %v806_v8 = vpop.f32.mrb[5].mxu1 }
 0x105   : > { %v1085_v9 = vmul.f32 %v1712_v40, %v726_v7  ;;  %v1117_v10 = vmul.f32 %v1712_v40, %v806_v8  ;;  %v728_v11 = vpop.f32.mrb[6].mxu0  ;;  %v808_v12 = vpop.f32.mrb[6].mxu1 }
 0x106   : > { %v1160_v13 = vadd.f32 %v1715_v41, %v1084_v5  ;;  %v1192_v14 = vadd.f32 %v1715_v41, %v1116_v6  ;;  %v1086_v15 = vmul.f32 %v1710_v39, %v728_v11  ;;  %v1118_v16 = vmul.f32 %v1710_v39, %v808_v12  ;;  %v730_v17 = vpop.f32.mrb[7].mxu0  ;;  %v810_v18 = vpop.f32.mrb[7].mxu1 }
 0x107   : > { %v1161_v19 = vadd.f32 %v1717_v44, %v1085_v9  ;;  %v1193_v20 = vadd.f32 %v1717_v44, %v1117_v10  ;;  %v1087_v21 = vmul.f32 %v1712_v40, %v730_v17  ;;  %v1119_v22 = vmul.f32 %v1712_v40, %v810_v18 }
 0x108   : > { %1224 = vst [vmem:[%s1724_s15 + $0x20] sm:$0xff] %v1160_v13  ;;  %1256 = vst [vmem:[%s1724_s15 + $0x120] sm:$0xff] %v1192_v14  ;;  %v1162_v23 = vadd.f32 %v1715_v41, %v1086_v15  ;;  %v1194_v24 = vadd.f32 %v1715_v41, %v1118_v16 }
 0x109   : > { %1225 = vst [vmem:[%s1724_s15 + $0x28] sm:$0xff] %v1161_v19  ;;  %1257 = vst [vmem:[%s1724_s15 + $0x128] sm:$0xff] %v1193_v20  ;;  %v1163_v25 = vadd.f32 %v1717_v44, %v1087_v21  ;;  %v1195_v26 = vadd.f32 %v1717_v44, %v1119_v22 }
 0x10a   : > { %1226 = vst [vmem:[%s1724_s15 + $0x30] sm:$0xff] %v1162_v23  ;;  %1258 = vst [vmem:[%s1724_s15 + $0x130] sm:$0xff] %v1194_v24 }
 0x10b   : > { %1227 = vst [vmem:[%s1724_s15 + $0x38] sm:$0xff] %v1163_v25  ;;  %1259 = vst [vmem:[%s1724_s15 + $0x138] sm:$0xff] %v1195_v26  ;;  %v734_v27 = vpop.f32.mrb[8].mxu0  ;;  %v814_v28 = vpop.f32.mrb[8].mxu1 }
 0x10c   : > { %v1088_v29 = vmul.f32 %v1710_v39, %v734_v27  ;;  %v1120_v30 = vmul.f32 %v1710_v39, %v814_v28  ;;  %v736_v31 = vpop.f32.mrb[9].mxu0  ;;  %v816_v32 = vpop.f32.mrb[9].mxu1 }
 0x10d   : > { %v1089_v33 = vmul.f32 %v1712_v40, %v736_v31  ;;  %v1121_v34 = vmul.f32 %v1712_v40, %v816_v32  ;;  %v738_v35 = vpop.f32.mrb[10].mxu0  ;;  %v818_v36 = vpop.f32.mrb[10].mxu1 }
 0x10e   : > { %v1164_v37 = vadd.f32 %v1715_v41, %v1088_v29  ;;  %v1196_v38 = vadd.f32 %v1715_v41, %v1120_v30  ;;  %v1090_v42 = vmul.f32 %v1710_v39, %v738_v35  ;;  %v1122_v43 = vmul.f32 %v1710_v39, %v818_v36  ;;  %v740_v45 = vpop.f32.mrb[11].mxu0  ;;  %v820_v46 = vpop.f32.mrb[11].mxu1 }
 0x10f   : > { %v1165_v47 = vadd.f32 %v1717_v44, %v1089_v33  ;;  %v1197_v48 = vadd.f32 %v1717_v44, %v1121_v34  ;;  %v1091_v49 = vmul.f32 %v1712_v40, %v740_v45  ;;  %v1123_v50 = vmul.f32 %v1712_v40, %v820_v46 }
 0x110   : > { %1228 = vst [vmem:[%s1724_s15 + $0x40] sm:$0xff] %v1164_v37  ;;  %1260 = vst [vmem:[%s1724_s15 + $0x140] sm:$0xff] %v1196_v38  ;;  %v1166_v51 = vadd.f32 %v1715_v41, %v1090_v42  ;;  %v1198_v52 = vadd.f32 %v1715_v41, %v1122_v43 }
 0x111   : > { %1229 = vst [vmem:[%s1724_s15 + $0x48] sm:$0xff] %v1165_v47  ;;  %1261 = vst [vmem:[%s1724_s15 + $0x148] sm:$0xff] %v1197_v48  ;;  %v1167_v53 = vadd.f32 %v1717_v44, %v1091_v49  ;;  %v1199_v54 = vadd.f32 %v1717_v44, %v1123_v50 }
 0x112   : > { %1230 = vst [vmem:[%s1724_s15 + $0x50] sm:$0xff] %v1166_v51  ;;  %1262 = vst [vmem:[%s1724_s15 + $0x150] sm:$0xff] %v1198_v52 }
 0x113   : > { %1231 = vst [vmem:[%s1724_s15 + $0x58] sm:$0xff] %v1167_v53  ;;  %1263 = vst [vmem:[%s1724_s15 + $0x158] sm:$0xff] %v1199_v54  ;;  %v744_v55 = vpop.f32.mrb[12].mxu0  ;;  %v824_v56 = vpop.f32.mrb[12].mxu1 }
 0x114   : > { %v1092_v57 = vmul.f32 %v1710_v39, %v744_v55  ;;  %v1124_v58 = vmul.f32 %v1710_v39, %v824_v56  ;;  %v746_v59 = vpop.f32.mrb[13].mxu0  ;;  %v826_v60 = vpop.f32.mrb[13].mxu1 }
 0x115   : > { %v1093_v61 = vmul.f32 %v1712_v40, %v746_v59  ;;  %v1125_v62 = vmul.f32 %v1712_v40, %v826_v60  ;;  %v748_v63 = vpop.f32.mrb[14].mxu0  ;;  %v828_v0 = vpop.f32.mrb[14].mxu1 }
 0x116   : > { %v1168_v1 = vadd.f32 %v1715_v41, %v1092_v57  ;;  %v1200_v2 = vadd.f32 %v1715_v41, %v1124_v58  ;;  %v1094_v3 = vmul.f32 %v1710_v39, %v748_v63  ;;  %v1126_v4 = vmul.f32 %v1710_v39, %v828_v0  ;;  %v750_v5 = vpop.f32.mrb[15].mxu0  ;;  %v830_v6 = vpop.f32.mrb[15].mxu1 }
 0x117   : > { %v1169_v7 = vadd.f32 %v1717_v44, %v1093_v61  ;;  %v1201_v8 = vadd.f32 %v1717_v44, %v1125_v62  ;;  %v1095_v9 = vmul.f32 %v1712_v40, %v750_v5  ;;  %v1127_v10 = vmul.f32 %v1712_v40, %v830_v6 }
 0x118   : > { %1232 = vst [vmem:[%s1724_s15 + $0x60] sm:$0xff] %v1168_v1  ;;  %1264 = vst [vmem:[%s1724_s15 + $0x160] sm:$0xff] %v1200_v2  ;;  %v1170_v11 = vadd.f32 %v1715_v41, %v1094_v3  ;;  %v1202_v12 = vadd.f32 %v1715_v41, %v1126_v4 }
 0x119   : > { %1233 = vst [vmem:[%s1724_s15 + $0x68] sm:$0xff] %v1169_v7  ;;  %1265 = vst [vmem:[%s1724_s15 + $0x168] sm:$0xff] %v1201_v8  ;;  %v1171_v13 = vadd.f32 %v1717_v44, %v1095_v9  ;;  %v1203_v14 = vadd.f32 %v1717_v44, %v1127_v10 }
 0x11a   : > { %1234 = vst [vmem:[%s1724_s15 + $0x70] sm:$0xff] %v1170_v11  ;;  %1266 = vst [vmem:[%s1724_s15 + $0x170] sm:$0xff] %v1202_v12 }
 0x11b   : > { %1235 = vst [vmem:[%s1724_s15 + $0x78] sm:$0xff] %v1171_v13  ;;  %1267 = vst [vmem:[%s1724_s15 + $0x178] sm:$0xff] %v1203_v14  ;;  %v754_v15 = vpop.f32.mrb[16].mxu0  ;;  %v834_v16 = vpop.f32.mrb[16].mxu1 }
 0x11c   : > { %v1096_v17 = vmul.f32 %v1710_v39, %v754_v15  ;;  %v1128_v18 = vmul.f32 %v1710_v39, %v834_v16  ;;  %v756_v19 = vpop.f32.mrb[17].mxu0  ;;  %v836_v20 = vpop.f32.mrb[17].mxu1 }
 0x11d   : > { %v1097_v21 = vmul.f32 %v1712_v40, %v756_v19  ;;  %v1129_v22 = vmul.f32 %v1712_v40, %v836_v20  ;;  %v758_v23 = vpop.f32.mrb[18].mxu0  ;;  %v838_v24 = vpop.f32.mrb[18].mxu1 }
 0x11e   : > { %v1172_v25 = vadd.f32 %v1715_v41, %v1096_v17  ;;  %v1204_v26 = vadd.f32 %v1715_v41, %v1128_v18  ;;  %v1098_v27 = vmul.f32 %v1710_v39, %v758_v23  ;;  %v1130_v28 = vmul.f32 %v1710_v39, %v838_v24  ;;  %v760_v29 = vpop.f32.mrb[19].mxu0  ;;  %v840_v30 = vpop.f32.mrb[19].mxu1 }
 0x11f   : > { %v1173_v31 = vadd.f32 %v1717_v44, %v1097_v21  ;;  %v1205_v32 = vadd.f32 %v1717_v44, %v1129_v22  ;;  %v1099_v33 = vmul.f32 %v1712_v40, %v760_v29  ;;  %v1131_v34 = vmul.f32 %v1712_v40, %v840_v30 }
 0x120   : > { %1236 = vst [vmem:[%s1724_s15 + $0x80] sm:$0xff] %v1172_v25  ;;  %1268 = vst [vmem:[%s1724_s15 + $0x180] sm:$0xff] %v1204_v26  ;;  %v1174_v35 = vadd.f32 %v1715_v41, %v1098_v27  ;;  %v1206_v36 = vadd.f32 %v1715_v41, %v1130_v28 }
 0x121   : > { %1237 = vst [vmem:[%s1724_s15 + $0x88] sm:$0xff] %v1173_v31  ;;  %1269 = vst [vmem:[%s1724_s15 + $0x188] sm:$0xff] %v1205_v32  ;;  %v1175_v37 = vadd.f32 %v1717_v44, %v1099_v33  ;;  %v1207_v38 = vadd.f32 %v1717_v44, %v1131_v34 }
 0x122   : > { %1238 = vst [vmem:[%s1724_s15 + $0x90] sm:$0xff] %v1174_v35  ;;  %1270 = vst [vmem:[%s1724_s15 + $0x190] sm:$0xff] %v1206_v36 }
 0x123   : > { %1239 = vst [vmem:[%s1724_s15 + $0x98] sm:$0xff] %v1175_v37  ;;  %1271 = vst [vmem:[%s1724_s15 + $0x198] sm:$0xff] %v1207_v38  ;;  %v764_v42 = vpop.f32.mrb[20].mxu0  ;;  %v844_v43 = vpop.f32.mrb[20].mxu1 }
 0x124   : > { %v1100_v45 = vmul.f32 %v1710_v39, %v764_v42  ;;  %v1132_v46 = vmul.f32 %v1710_v39, %v844_v43  ;;  %v766_v47 = vpop.f32.mrb[21].mxu0  ;;  %v846_v48 = vpop.f32.mrb[21].mxu1 }
 0x125   : > { %v1101_v49 = vmul.f32 %v1712_v40, %v766_v47  ;;  %v1133_v50 = vmul.f32 %v1712_v40, %v846_v48  ;;  %v768_v51 = vpop.f32.mrb[22].mxu0  ;;  %v848_v52 = vpop.f32.mrb[22].mxu1 }
 0x126   : > { %v1176_v53 = vadd.f32 %v1715_v41, %v1100_v45  ;;  %v1208_v54 = vadd.f32 %v1715_v41, %v1132_v46  ;;  %v1102_v55 = vmul.f32 %v1710_v39, %v768_v51  ;;  %v1134_v56 = vmul.f32 %v1710_v39, %v848_v52  ;;  %v770_v57 = vpop.f32.mrb[23].mxu0  ;;  %v850_v58 = vpop.f32.mrb[23].mxu1 }
 0x127   : > { %v1177_v59 = vadd.f32 %v1717_v44, %v1101_v49  ;;  %v1209_v60 = vadd.f32 %v1717_v44, %v1133_v50  ;;  %v1103_v61 = vmul.f32 %v1712_v40, %v770_v57  ;;  %v1135_v62 = vmul.f32 %v1712_v40, %v850_v58 }
 0x128   : > { %1240 = vst [vmem:[%s1724_s15 + $0xa0] sm:$0xff] %v1176_v53  ;;  %1272 = vst [vmem:[%s1724_s15 + $0x1a0] sm:$0xff] %v1208_v54  ;;  %v1178_v63 = vadd.f32 %v1715_v41, %v1102_v55  ;;  %v1210_v0 = vadd.f32 %v1715_v41, %v1134_v56 }
 0x129   : > { %1241 = vst [vmem:[%s1724_s15 + $0xa8] sm:$0xff] %v1177_v59  ;;  %1273 = vst [vmem:[%s1724_s15 + $0x1a8] sm:$0xff] %v1209_v60  ;;  %v1179_v1 = vadd.f32 %v1717_v44, %v1103_v61  ;;  %v1211_v2 = vadd.f32 %v1717_v44, %v1135_v62 }
 0x12a   : > { %1242 = vst [vmem:[%s1724_s15 + $0xb0] sm:$0xff] %v1178_v63  ;;  %1274 = vst [vmem:[%s1724_s15 + $0x1b0] sm:$0xff] %v1210_v0 }
 0x12b   : > { %1243 = vst [vmem:[%s1724_s15 + $0xb8] sm:$0xff] %v1179_v1  ;;  %1275 = vst [vmem:[%s1724_s15 + $0x1b8] sm:$0xff] %v1211_v2  ;;  %v774_v3 = vpop.f32.mrb[24].mxu0  ;;  %v854_v4 = vpop.f32.mrb[24].mxu1 }
 0x12c   : > { %v1104_v5 = vmul.f32 %v1710_v39, %v774_v3  ;;  %v1136_v6 = vmul.f32 %v1710_v39, %v854_v4  ;;  %v776_v7 = vpop.f32.mrb[25].mxu0  ;;  %v856_v8 = vpop.f32.mrb[25].mxu1 }
 0x12d   : > { %v1105_v9 = vmul.f32 %v1712_v40, %v776_v7  ;;  %v1137_v10 = vmul.f32 %v1712_v40, %v856_v8  ;;  %v778_v11 = vpop.f32.mrb[26].mxu0  ;;  %v858_v12 = vpop.f32.mrb[26].mxu1 }
 0x12e   : > { %v1180_v13 = vadd.f32 %v1715_v41, %v1104_v5  ;;  %v1212_v14 = vadd.f32 %v1715_v41, %v1136_v6  ;;  %v1106_v15 = vmul.f32 %v1710_v39, %v778_v11  ;;  %v1138_v16 = vmul.f32 %v1710_v39, %v858_v12  ;;  %v780_v17 = vpop.f32.mrb[27].mxu0  ;;  %v860_v18 = vpop.f32.mrb[27].mxu1 }
 0x12f   : > { %v1181_v19 = vadd.f32 %v1717_v44, %v1105_v9  ;;  %v1213_v20 = vadd.f32 %v1717_v44, %v1137_v10  ;;  %v1107_v21 = vmul.f32 %v1712_v40, %v780_v17  ;;  %v1139_v22 = vmul.f32 %v1712_v40, %v860_v18 }
 0x130   : > { %1244 = vst [vmem:[%s1724_s15 + $0xc0] sm:$0xff] %v1180_v13  ;;  %1276 = vst [vmem:[%s1724_s15 + $0x1c0] sm:$0xff] %v1212_v14  ;;  %v1182_v23 = vadd.f32 %v1715_v41, %v1106_v15  ;;  %v1214_v24 = vadd.f32 %v1715_v41, %v1138_v16 }
 0x131   : > { %1245 = vst [vmem:[%s1724_s15 + $0xc8] sm:$0xff] %v1181_v19  ;;  %1277 = vst [vmem:[%s1724_s15 + $0x1c8] sm:$0xff] %v1213_v20  ;;  %v1183_v25 = vadd.f32 %v1717_v44, %v1107_v21  ;;  %v1215_v26 = vadd.f32 %v1717_v44, %v1139_v22 }
 0x132   : > { %1246 = vst [vmem:[%s1724_s15 + $0xd0] sm:$0xff] %v1182_v23  ;;  %1278 = vst [vmem:[%s1724_s15 + $0x1d0] sm:$0xff] %v1214_v24 }
 0x133   : > { %1247 = vst [vmem:[%s1724_s15 + $0xd8] sm:$0xff] %v1183_v25  ;;  %1279 = vst [vmem:[%s1724_s15 + $0x1d8] sm:$0xff] %v1215_v26  ;;  %v784_v27 = vpop.f32.mrb[28].mxu0  ;;  %v864_v28 = vpop.f32.mrb[28].mxu1 }
 0x134   : > { %v1108_v29 = vmul.f32 %v1710_v39, %v784_v27  ;;  %v1140_v30 = vmul.f32 %v1710_v39, %v864_v28  ;;  %v786_v31 = vpop.f32.mrb[29].mxu0  ;;  %v866_v32 = vpop.f32.mrb[29].mxu1 }
 0x135   : > { %v1109_v33 = vmul.f32 %v1712_v40, %v786_v31  ;;  %v1141_v34 = vmul.f32 %v1712_v40, %v866_v32  ;;  %v788_v35 = vpop.f32.mrb[30].mxu0  ;;  %v868_v36 = vpop.f32.mrb[30].mxu1 }
 0x136   : > { %v1184_v37 = vadd.f32 %v1715_v41, %v1108_v29  ;;  %v1216_v38 = vadd.f32 %v1715_v41, %v1140_v30  ;;  %v1110_v42 = vmul.f32 %v1710_v39, %v788_v35  ;;  %v1142_v43 = vmul.f32 %v1710_v39, %v868_v36  ;;  %v790_v45 = vpop.f32.mrb[31].mxu0  ;;  %v870_v46 = vpop.f32.mrb[31].mxu1 }
 0x137   : > { %v1185_v47 = vadd.f32 %v1717_v44, %v1109_v33  ;;  %v1217_v48 = vadd.f32 %v1717_v44, %v1141_v34  ;;  %v1111_v49 = vmul.f32 %v1712_v40, %v790_v45  ;;  %v1143_v50 = vmul.f32 %v1712_v40, %v870_v46 }
 0x138   : > { %1248 = vst [vmem:[%s1724_s15 + $0xe0] sm:$0xff] %v1184_v37  ;;  %1280 = vst [vmem:[%s1724_s15 + $0x1e0] sm:$0xff] %v1216_v38  ;;  %v1186_v51 = vadd.f32 %v1715_v41, %v1110_v42  ;;  %v1218_v52 = vadd.f32 %v1715_v41, %v1142_v43 }
 0x139   : > { %1249 = vst [vmem:[%s1724_s15 + $0xe8] sm:$0xff] %v1185_v47  ;;  %1281 = vst [vmem:[%s1724_s15 + $0x1e8] sm:$0xff] %v1217_v48  ;;  %v1187_v39 = vadd.f32 %v1717_v44, %v1111_v49  ;;  %v1219_v53 = vadd.f32 %v1717_v44, %v1143_v50 }
 0x13a   : > { %1250 = vst [vmem:[%s1724_s15 + $0xf0] sm:$0xff] %v1186_v51  ;;  %1282 = vst [vmem:[%s1724_s15 + $0x1f0] sm:$0xff] %v1218_v52 }
 0x13b   : > { %1251 = vst [vmem:[%s1724_s15 + $0xf8] sm:$0xff] %v1187_v39  ;;  %1283 = vst [vmem:[%s1724_s15 + $0x1f8] sm:$0xff] %v1219_v53 }
 0x13c PF: > { %s14_s17 = sadd.s32 1, %s1570_s17   ;;  %s1930_s15 = smov %s1566_s16 }
 0x13d   : > { %p11_p5 = scmp.ge.s32.totalorder %s14_s17, 4   ;;  %s1931_s16 = smov %s1933_s18 }
 0x13f   :  { %13 = sbr.rel (!%p11_p5) target bundleno = 2 (0x2), region = 83 }

// kernel: bottleneck_forward.7
= control target key start
LH: loop header
LB: loop body
LE: loop exit
PB: predicated region body
PF: predicated region fallthrough
CT: control target
= control target key end

     0   :  { %10 = vsyncpa [#allocation4], 0  ;;  %s2712_s0 = inlined_call_operand.vmem [shape: bf16[512,128], index: 0, kind: input, shape index: {}]   ;;  %s2713_s1 = inlined_call_operand.vmem [shape: bf16[128,256], index: 1, kind: input, shape index: {}]   ;;  %s2714_s2 = inlined_call_operand.vmem [shape: f32[1,256], index: 2, kind: input, shape index: {}]   ;;  %s2715_s3 = inlined_call_operand.vmem [shape: f32[1,256], index: 3, kind: input, shape index: {}]   ;;  %s2716_s4 = inlined_call_operand.vmem [shape: bf16[512,256], index: 4, kind: input, shape index: {}]   ;;  %s2717_s5 = inlined_call_operand.hbm [shape: f32[512,256], index: 5, kind: output, shape index: {}]  }
   0x1   :  { %12 = vsyncpa [#allocation4 + $0x1], 0  ;;  %s2006_s18 = smov 0   ;;  %s2008_s19 = smov 0  }
   0x2   :  { %s2010_s20 = smov 0   ;;  %s2012_s21 = smov 0  }
   0x3   :  { %s2014_s22 = smov 0   ;;  %s2016_s23 = smov 0  }
   0x4 LB: > { %s1723_s24 = sadd.s32 4294967295, %s1970_s23   ;;  %s1724_s25 = sadd.s32 4294967294, %s1970_s23   ;;  %s1970_s23 = sphi %s2016_s23, %s18_s23   ;;  %s1966_s22 = sphi %s2014_s22, %s2778_s22   ;;  %s1962_s21 = sphi %s2012_s21, %s2777_s21   ;;  %s1958_s20 = sphi %s2010_s20, %s2776_s20   ;;  %s1954_s19 = sphi %s2008_s19, %s2775_s19   ;;  %s1950_s18 = sphi %s2006_s18, %s2774_s18  }
   0x5   : > { %s37_s26 = sadd.s32 1, %s1966_s22  ;;  %s182_s27 = sadd.s32 1, %s1958_s20 }
   0x6   : > { %p39_p0 = scmp.ge.s32.totalorder %s37_s26, 2  ;;  %p192_p1 = scmp.ne.s32.totalorder %s1958_s20, %s1954_s19 }
   0x7   : > { %p193_p2 = scmp.eq.s32.totalorder %s1723_s24, 1  ;;  %p198_p3 = scmp.ne.s32.totalorder %s1954_s19, %s1950_s18 }
   0x8   : > { %s2780_s26 = smov (%p39_p0, %s37_s26), 0  ;;  %p199_p5 = scmp.eq.s32.totalorder %s1724_s25, 1 }
   0x9   : > { %p2046_p4 = por %p193_p2, %p192_p1  ;;  %s177_s29 = ssub.s32 %s1966_s22, %s2780_s26 }
   0xa   : > { %p1730_p6 = scmp.ge.s32.totalorder %s1970_s23, 1  ;;  %p180_p7 = scmp.eq.s32.totalorder %s177_s29, 0 }
   0xb   : > { %p2053_p8 = por %p199_p5, %p198_p3  ;;  %p275_p9 = scmp.lt.s32.totalorder %s1970_s23, 3 }
   0xc   : > { %s2059_s6 = scalar_select %p180_p7, %s1958_s20, %s182_s27  }
   0xd   : > { %p276_p10 = pnand %p1730_p6, %p275_p9 }
   0xe   : > { %v1852_v0 = vld [vmem:[%s2713_s1 + $0x4] ss:$8 sps:$4 sm:$0xff] (!%p276_p10)   ;;  %s1732_s9 = sshll.u32 (!%p276_p10), %s1962_s21, 5  ;;  %v1854_v1 = vld [vmem:[%s2713_s1] ss:$8 sps:$4 sm:$0xff] (!%p276_p10)   ;;  %v1972_v2 = vmov (!%p276_p10), 0   ;;  %v1126_v33 = vlaneseq (!%p276_p10) }
   0xf   : > { %279 = sbr.rel (%p276_p10) target bundleno = 356 (0x164), region = 40  ;;  %768 = vmatprep.mubr.bf16.mxu0 (!%p276_p10), %v1972_v2  ;;  %848 = vmatprep.mubr.bf16.mxu1 (!%p276_p10), %v1972_v2  ;;  %p335_p11 = scmp.lt.s32.totalorder (!%p276_p10), %s1732_s9, 63  ;;  %v1855_v3 = vld [vmem:[%s2713_s1 + $0x14] ss:$8 sps:$4 sm:$0xff] (!%p276_p10)   ;;  %v1857_v4 = vld [vmem:[%s2713_s1 + $0x10] ss:$8 sps:$4 sm:$0xff] (!%p276_p10)  }
  0x10   : > { %736 = vmatprep.subr.bf16.mxu0 (!%p276_p10), %v1852_v0  ;;  %1778 = vmatprep.subr.bf16.mxu1 (!%p276_p10), %v1852_v0  ;;  %v1858_v5 = vld [vmem:[%s2713_s1 + $0x24] ss:$8 sps:$4 sm:$0xff] (!%p276_p10)   ;;  %v1860_v6 = vld [vmem:[%s2713_s1 + $0x20] ss:$8 sps:$4 sm:$0xff] (!%p276_p10)   ;;  %v1861_v7 = vld [vmem:[%s2713_s1 + $0x34] ss:$8 sps:$4 sm:$0xff] (!%p276_p10)  }
  0x11   : > { %737 = vmatpush1.bf16.msra.mxu0 (!%p276_p10), %v1854_v1  ;;  %1786 = vmatpush1.bf16.msra.mxu1 (!%p276_p10), %v1854_v1  ;;  %v1863_v8 = vld [vmem:[%s2713_s1 + $0x30] ss:$8 sps:$4 sm:$0xff] (!%p276_p10)   ;;  %v1864_v9 = vld [vmem:[%s2713_s1 + $0x44] ss:$8 sps:$4 sm:$0xff] (!%p276_p10)   ;;  %v1866_v10 = vld [vmem:[%s2713_s1 + $0x40] ss:$8 sps:$4 sm:$0xff] (!%p276_p10)  }
  0x12   : > { %738 = vmatprep.subr.bf16.mxu0 (!%p276_p10), %v1855_v3  ;;  %1779 = vmatprep.subr.bf16.mxu1 (!%p276_p10), %v1855_v3  ;;  %v1867_v11 = vld [vmem:[%s2713_s1 + $0x54] ss:$8 sps:$4 sm:$0xff] (!%p276_p10)   ;;  %v1869_v12 = vld [vmem:[%s2713_s1 + $0x50] ss:$8 sps:$4 sm:$0xff] (!%p276_p10)   ;;  %v1870_v13 = vld [vmem:[%s2713_s1 + $0x64] ss:$8 sps:$4 sm:$0xff] (!%p276_p10)  }
  0x13   : > { %v1872_v14 = vld [vmem:[%s2713_s1 + $0x60] ss:$8 sps:$4 sm:$0xff] (!%p276_p10)   ;;  %v1873_v15 = vld [vmem:[%s2713_s1 + $0x74] ss:$8 sps:$4 sm:$0xff] (!%p276_p10)   ;;  %v1875_v16 = vld [vmem:[%s2713_s1 + $0x70] ss:$8 sps:$4 sm:$0xff] (!%p276_p10)  }
  0x14   : > { %v1127_v34 = vshrl.u32 (!%p276_p10), %v1126_v33, 7  ;;  %v1124_v37 = vld [vmem:[%s2714_s2] sm:$0x3] (!%p276_p10)  ;;  %s331_s8 = sand.u32 (!%p276_p10), 1, %s1954_s19   ;;  %s1777_s13 = sshll.u32 (!%p276_p10), %s1962_s21, 13 }
  0x15   : > { %739 = vmatpush1.bf16.msra.mxu0 (!%p276_p10), %v1857_v4  ;;  %1787 = vmatpush1.bf16.msra.mxu1 (!%p276_p10), %v1857_v4  ;;  %v1200_v38 = vld [vmem:[%s2715_s3] sm:$0x3] (!%p276_p10)  ;;  %s1731_s10 = sshll.u32 (!%p276_p10), %s331_s8, 9  ;;  %s2654_s16 = scalar_lea.hbm (!%p276_p10), %s2717_s5, %s1777_s13 }
  0x16   : > { %s2782_s9 = smov (!%p335_p11, %s1732_s9), 63  ;;  %740 = vmatprep.subr.bf16.mxu0 %v1858_v5  ;;  %1780 = vmatprep.subr.bf16.mxu1 %v1858_v5  ;;  %v1128_v35 = vsub.s32 0, %v1127_v34  ;;  %v1132_v36 = vsub.s32 1, %v1127_v34  ;;  %s2365_s12 = scalar_lea.vmem [#allocation3], %s1731_s10 }
  0x17   : > { %s1733_s24 = sshll.u32 %s2782_s9, 2  ;;  %s1775_s17 = sshll.u32 %s2782_s9, 3 }
  0x18   : > { %s2091_s11 = scalar_lea.vmem %s2712_s0, %s1733_s24  ;;  %s2154_s27 = scalar_lea.vmem %s2716_s4, %s1775_s17  ;;  %v2174_v43 = vrot.slane %v1124_v37, %v1128_v35  ;;  %v2176_v44 = vrot.slane %v1200_v38, %v1128_v35  ;;  %v2178_v45 = vrot.slane %v1124_v37, %v1132_v36  ;;  %v2180_v46 = vrot.slane %v1200_v38, %v1132_v36 }
  0x19   : > { %741 = vmatpush1.bf16.msra.mxu0 %v1860_v6  ;;  %1788 = vmatpush1.bf16.msra.mxu1 %v1860_v6  ;;  %v1876_v17 = vld [vmem:[%s2091_s11] sm:$0xff]   ;;  %v1878_v19 = vld [vmem:[%s2091_s11 + $0x8] sm:$0xff]   ;;  %v1880_v21 = vld [vmem:[%s2091_s11 + $0x10] sm:$0xff]   ;;  %s1581_s14 = sshll.u32 %s2365_s12, 4  ;;  %s2666_s17 = scalar_lea.sflag [#allocation4], %s331_s8  ;;  %s2656_s14 = int_to_ptr.vmem [resolvable:$true] %s1581_s14 }
  0x1a   : > { %742 = vmatprep.subr.bf16.mxu0 %v1861_v7  ;;  %1781 = vmatprep.subr.bf16.mxu1 %v1861_v7  ;;  %v1877_v18 = vld [vmem:[%s2091_s11 + $0x40] sm:$0xff]   ;;  %v1879_v20 = vld [vmem:[%s2091_s11 + $0x48] sm:$0xff]   ;;  %v1881_v22 = vld [vmem:[%s2091_s11 + $0x50] sm:$0xff]   ;;  %s1892_s24 = scalar_lea.vmem %s2656_s14, 8192  ;;  %s1973_s25 = smov [#allocation3]  }
  0x1b   : > { %v1882_v23 = vld [vmem:[%s2091_s11 + $0x18] sm:$0xff]   ;;  %v1884_v25 = vld [vmem:[%s2091_s11 + $0x20] sm:$0xff]   ;;  %v1886_v27 = vld [vmem:[%s2091_s11 + $0x28] sm:$0xff]   ;;  %p1893_p12 = scmp.ne.s32.totalorder %s2656_s14, %s1892_s24 }
  0x1c   : > { %v1883_v24 = vld [vmem:[%s2091_s11 + $0x58] sm:$0xff]   ;;  %v1885_v26 = vld [vmem:[%s2091_s11 + $0x60] sm:$0xff]   ;;  %v1887_v28 = vld [vmem:[%s2091_s11 + $0x68] sm:$0xff]  }
  0x1d   : > { %743 = vmatpush1.bf16.msra.mxu0 %v1863_v8  ;;  %1789 = vmatpush1.bf16.msra.mxu1 %v1863_v8  ;;  %v1888_v29 = vld [vmem:[%s2091_s11 + $0x30] sm:$0xff]   ;;  %v1890_v31 = vld [vmem:[%s2091_s11 + $0x38] sm:$0xff]   ;;  %v2163_v39 = vld [vmem:[%s2154_s27] sm:$0xff]  ;;  %p1894_p13 = pnand %p1893_p12, %p2046_p4 }
  0x1e   : > { %744 = vmatprep.subr.bf16.mxu0 %v1864_v9  ;;  %1782 = vmatprep.subr.bf16.mxu1 %v1864_v9  ;;  %v1889_v30 = vld [vmem:[%s2091_s11 + $0x70] sm:$0xff]   ;;  %v1891_v32 = vld [vmem:[%s2091_s11 + $0x78] sm:$0xff]   ;;  %v2166_v40 = vld [vmem:[%s2154_s27 + $0x80] sm:$0xff]  ;;  %v1308_v49 = vunpack.c.l.bf16 %v2163_v39  ;;  %v1309_v51 = vunpack.c.h.bf16 %v2163_v39 }
  0x1f   : > { %v2169_v41 = vld [vmem:[%s2154_s27 + $0x8] sm:$0xff]  ;;  %v2183_v47 = vld [vmem:[%s2154_s27 + $0x10] sm:$0xff]  ;;  %v1340_v50 = vunpack.c.l.bf16 %v2166_v40  ;;  %v1341_v52 = vunpack.c.h.bf16 %v2166_v40  ;;  %v2193_v53 = vld [vmem:[%s2154_s27 + $0x18] sm:$0xff]  ;;  %p1895_p0 = pneg %p1894_p13 }
  0x20   : > { %v2172_v42 = vld [vmem:[%s2154_s27 + $0x88] sm:$0xff]  ;;  %v2186_v48 = vld [vmem:[%s2154_s27 + $0x90] sm:$0xff]  ;;  %v2196_v54 = vld [vmem:[%s2154_s27 + $0x98] sm:$0xff]  ;;  %v1310_v55 = vunpack.c.l.bf16 %v2169_v41  ;;  %v1311_v57 = vunpack.c.h.bf16 %v2169_v41  ;;  %v1312_v61 = vunpack.c.l.bf16 %v2183_v47 }
  0x21   : > { %745 = vmatpush1.bf16.msra.mxu0 %v1866_v10  ;;  %1790 = vmatpush1.bf16.msra.mxu1 %v1866_v10  ;;  %v1342_v56 = vunpack.c.l.bf16 %v2172_v42  ;;  %v1343_v58 = vunpack.c.h.bf16 %v2172_v42  ;;  %v2203_v59 = vld [vmem:[%s2154_s27 + $0x20] sm:$0xff]  ;;  %v1344_v62 = vunpack.c.l.bf16 %v2186_v48  ;;  %v2213_v1 = vld [vmem:[%s2154_s27 + $0x28] sm:$0xff]  ;;  %v2223_v7 = vld [vmem:[%s2154_s27 + $0x30] sm:$0xff] }
  0x22   : > { %746 = vmatprep.subr.bf16.mxu0 %v1867_v11  ;;  %1783 = vmatprep.subr.bf16.mxu1 %v1867_v11  ;;  %v2206_v60 = vld [vmem:[%s2154_s27 + $0xa0] sm:$0xff]  ;;  %v2226_v8 = vld [vmem:[%s2154_s27 + $0xb0] sm:$0xff]  ;;  %v2273_v37 = vld [vmem:[%s2154_s27 + $0x58] sm:$0xff] }
  0x23   : > { %v2276_v38 = vld [vmem:[%s2154_s27 + $0xd8] sm:$0xff]  ;;  %v2283_v34 = vld [vmem:[%s2154_s27 + $0x60] sm:$0xff]  ;;  %v2306_v35 = vld [vmem:[%s2154_s27 + $0xf0] sm:$0xff] }
  0x25   : > { %747 = vmatpush1.bf16.msra.mxu0 %v1869_v12  ;;  %1791 = vmatpush1.bf16.msra.mxu1 %v1869_v12 }
  0x26   : > { %748 = vmatprep.subr.bf16.mxu0 %v1870_v13  ;;  %1784 = vmatprep.subr.bf16.mxu1 %v1870_v13  ;;  %v2233_v13 = vld [vmem:[%s2154_s27 + $0x38] sm:$0xff] }
  0x29   : > { %749 = vmatpush1.bf16.msra.mxu0 %v1872_v14  ;;  %1792 = vmatpush1.bf16.msra.mxu1 %v1872_v14  ;;  %v2236_v14 = vld [vmem:[%s2154_s27 + $0xb8] sm:$0xff] }
  0x2a   : > { %750 = vmatprep.subr.bf16.mxu0 %v1873_v15  ;;  %1785 = vmatprep.subr.bf16.mxu1 %v1873_v15 }
  0x2d   : > { %751 = vmatpush1.bf16.msra.mxu0 %v1875_v16  ;;  %1793 = vmatpush1.bf16.msra.mxu1 %v1875_v16  ;;  %v2316_v16 = vld [vmem:[%s2154_s27 + $0xf8] sm:$0xff] }
  0x30   : > { %769 = vmatmul.mubr.bf16.vlgmr.msra.gmra.mrb[0].mxu0 %v1876_v17  ;;  %849 = vmatmul.mubr.bf16.vlgmr.msra.gmra.mrb[0].mxu1 %v1877_v18 }
  0x31   : > { %778 = vmatprep.mubr.bf16.mxu0 %v1972_v2  ;;  %858 = vmatprep.mubr.bf16.mxu1 %v1972_v2 }
  0x38   : > { %779 = vmatmul.mubr.bf16.gmra.mrb[4].mxu0 %v1878_v19  ;;  %859 = vmatmul.mubr.bf16.gmra.mrb[4].mxu1 %v1879_v20  ;;  %v2243_v19 = vld [vmem:[%s2154_s27 + $0x40] sm:$0xff] }
  0x39   : > { %788 = vmatprep.mubr.bf16.mxu0 %v1972_v2  ;;  %868 = vmatprep.mubr.bf16.mxu1 %v1972_v2  ;;  %v2246_v20 = vld [vmem:[%s2154_s27 + $0xc0] sm:$0xff] }
  0x40   : > { %789 = vmatmul.mubr.bf16.gmra.mrb[8].mxu0 %v1880_v21  ;;  %869 = vmatmul.mubr.bf16.gmra.mrb[8].mxu1 %v1881_v22  ;;  %v2303_v21 = vld [vmem:[%s2154_s27 + $0x70] sm:$0xff] }
  0x41   : > { %798 = vmatprep.mubr.bf16.mxu0 %v1972_v2  ;;  %878 = vmatprep.mubr.bf16.mxu1 %v1972_v2 }
  0x48   : > { %799 = vmatmul.mubr.bf16.gmra.mrb[12].mxu0 %v1882_v23  ;;  %879 = vmatmul.mubr.bf16.gmra.mrb[12].mxu1 %v1883_v24  ;;  %v2296_v23 = vld [vmem:[%s2154_s27 + $0xe8] sm:$0xff] }
  0x49   : > { %808 = vmatprep.mubr.bf16.mxu0 %v1972_v2  ;;  %888 = vmatprep.mubr.bf16.mxu1 %v1972_v2 }
  0x50   : > { %809 = vmatmul.mubr.bf16.gmra.mrb[16].mxu0 %v1884_v25  ;;  %889 = vmatmul.mubr.bf16.gmra.mrb[16].mxu1 %v1885_v26  ;;  %v2253_v25 = vld [vmem:[%s2154_s27 + $0x48] sm:$0xff] }
  0x51   : > { %818 = vmatprep.mubr.bf16.mxu0 %v1972_v2  ;;  %898 = vmatprep.mubr.bf16.mxu1 %v1972_v2  ;;  %v2256_v26 = vld [vmem:[%s2154_s27 + $0xc8] sm:$0xff] }
  0x58   : > { %819 = vmatmul.mubr.bf16.gmra.mrb[20].mxu0 %v1886_v27  ;;  %899 = vmatmul.mubr.bf16.gmra.mrb[20].mxu1 %v1887_v28  ;;  %v2286_v27 = vld [vmem:[%s2154_s27 + $0xe0] sm:$0xff]  ;;  %v2313_v28 = vld [vmem:[%s2154_s27 + $0x78] sm:$0xff] }
  0x59   : > { %828 = vmatprep.mubr.bf16.mxu0 %v1972_v2  ;;  %908 = vmatprep.mubr.bf16.mxu1 %v1972_v2 }
  0x60   : > { %829 = vmatmul.mubr.bf16.gmra.mrb[24].mxu0 %v1888_v29  ;;  %909 = vmatmul.mubr.bf16.gmra.mrb[24].mxu1 %v1889_v30  ;;  %v2293_v29 = vld [vmem:[%s2154_s27 + $0x68] sm:$0xff] }
  0x61   : > { %838 = vmatprep.mubr.bf16.mxu0 %v1972_v2  ;;  %918 = vmatprep.mubr.bf16.mxu1 %v1972_v2  ;;  %v2216_v2 = vld [vmem:[%s2154_s27 + $0xa8] sm:$0xff] }
  0x68   : > { %839 = vmatmul.mubr.bf16.gmra.mrb[28].mxu0 %v1890_v31  ;;  %919 = vmatmul.mubr.bf16.gmra.mrb[28].mxu1 %v1891_v32  ;;  %v2263_v31 = vld [vmem:[%s2154_s27 + $0x50] sm:$0xff] }
  0x69   : > { %v2266_v32 = vld [vmem:[%s2154_s27 + $0xd0] sm:$0xff]  ;;  %s1896_s27 = sshll.u32 %s1973_s25, 4  ;;  %s1897_s27 = int_to_ptr.vmem [resolvable:$false] %s1896_s27 }
  0x6a   : > { %s1898_s29 = scalar_lea.vmem %s1897_s27, 16384  ;;  %p1899_p1 = scmp.lt.s32.totalorder %s2656_s14, %s1897_s27 }
  0x6b   : > { %p1900_p2 = scmp.lt.s32.totalorder %s1898_s29, %s1892_s24 }
  0x6d   : > { %p1901_p3 = por %p1900_p2, %p1899_p1 }
  0x6f   : > { %p1902_p5 = pnand %p1901_p3, %p1895_p0 }
 0x103   : > { %v770_v30 = vpop.f32.mrb[0].mxu0  ;;  %v850_v12 = vpop.f32.mrb[0].mxu1 }
 0x104   : > { %v1136_v22 = vmul.f32 %v2174_v43, %v770_v30  ;;  %v1168_v36 = vmul.f32 %v2174_v43, %v850_v12  ;;  %v772_v10 = vpop.f32.mrb[1].mxu0  ;;  %v852_v33 = vpop.f32.mrb[1].mxu1 }
 0x105   : > { %v1137_v6 = vmul.f32 %v2178_v45, %v772_v10  ;;  %v1169_v24 = vmul.f32 %v2178_v45, %v852_v33  ;;  %v774_v5 = vpop.f32.mrb[2].mxu0  ;;  %v854_v17 = vpop.f32.mrb[2].mxu1 }
 0x106   : > { %v1212_v12 = vadd.f32 %v2176_v44, %v1136_v22  ;;  %v1244_v30 = vadd.f32 %v2176_v44, %v1168_v36  ;;  %v1138_v15 = vmul.f32 %v2174_v43, %v774_v5  ;;  %v1170_v9 = vmul.f32 %v2174_v43, %v854_v17  ;;  %v776_v4 = vpop.f32.mrb[3].mxu0  ;;  %v856_v10 = vpop.f32.mrb[3].mxu1 }
 0x107   : > { %v1213_v33 = vadd.f32 %v2180_v46, %v1137_v6  ;;  %v1245_v3 = vadd.f32 %v2180_v46, %v1169_v24  ;;  %v1139_v18 = vmul.f32 %v2178_v45, %v776_v4  ;;  %v1171_v11 = vmul.f32 %v2178_v45, %v856_v10 }
 0x108   : > { %v1372_v0 = vadd.f32 %v1308_v49, %v1212_v12  ;;  %v1404_v22 = vadd.f32 %v1340_v50, %v1244_v30  ;;  %v1214_v5 = vadd.f32 %v2176_v44, %v1138_v15  ;;  %v1246_v17 = vadd.f32 %v2176_v44, %v1170_v9 }
 0x109   : > { %v1373_v36 = vadd.f32 %v1309_v51, %v1213_v33  ;;  %v1405_v6 = vadd.f32 %v1341_v52, %v1245_v3  ;;  %v1215_v4 = vadd.f32 %v2180_v46, %v1139_v18  ;;  %v1247_v24 = vadd.f32 %v2180_v46, %v1171_v11 }
 0x10a   : > { %v1436_v10 = vmax.f32 %v1372_v0, 0.0  ;;  %v1468_v63 = vmax.f32 %v1404_v22, 0.0  ;;  %v1374_v49 = vadd.f32 %v1310_v55, %v1214_v5  ;;  %v1406_v50 = vadd.f32 %v1342_v56, %v1246_v17 }
 0x10b   : > { %v1437_v15 = vmax.f32 %v1373_v36, 0.0  ;;  %v1469_v9 = vmax.f32 %v1405_v6, 0.0  ;;  %v1375_v39 = vadd.f32 %v1311_v57, %v1215_v4  ;;  %v1407_v40 = vadd.f32 %v1343_v58, %v1247_v24  ;;  %v780_v51 = vpop.f32.mrb[4].mxu0  ;;  %v860_v52 = vpop.f32.mrb[4].mxu1 }
 0x10c   : > { %1500 = vst [vmem:[%s2365_s12] sm:$0xff] %v1436_v10  ;;  %1532 = vst [vmem:[%s2365_s12 + $0x100] sm:$0xff] %v1468_v63  ;;  %v1438_v55 = vmax.f32 %v1374_v49, 0.0  ;;  %v1470_v56 = vmax.f32 %v1406_v50, 0.0  ;;  %v1140_v41 = vmul.f32 %v2174_v43, %v780_v51  ;;  %v1172_v57 = vmul.f32 %v2174_v43, %v860_v52  ;;  %v782_v42 = vpop.f32.mrb[5].mxu0  ;;  %v862_v58 = vpop.f32.mrb[5].mxu1 }
 0x10d   : > { %1501 = vst [vmem:[%s2365_s12 + $0x8] sm:$0xff] %v1437_v15  ;;  %1533 = vst [vmem:[%s2365_s12 + $0x108] sm:$0xff] %v1469_v9  ;;  %v1439_v0 = vmax.f32 %v1375_v39, 0.0  ;;  %v1471_v3 = vmax.f32 %v1407_v40, 0.0  ;;  %v1141_v11 = vmul.f32 %v2178_v45, %v782_v42  ;;  %v1173_v18 = vmul.f32 %v2178_v45, %v862_v58  ;;  %v784_v63 = vpop.f32.mrb[6].mxu0  ;;  %v864_v12 = vpop.f32.mrb[6].mxu1 }
 0x10e   : > { %1502 = vst [vmem:[%s2365_s12 + $0x10] sm:$0xff] %v1438_v55  ;;  %1534 = vst [vmem:[%s2365_s12 + $0x110] sm:$0xff] %v1470_v56  ;;  %v1216_v30 = vadd.f32 %v2176_v44, %v1140_v41  ;;  %v1248_v33 = vadd.f32 %v2176_v44, %v1172_v57  ;;  %v1142_v22 = vmul.f32 %v2174_v43, %v784_v63  ;;  %v786_v17 = vpop.f32.mrb[7].mxu0  ;;  %v866_v36 = vpop.f32.mrb[7].mxu1  ;;  %v2720_v39 = vunpack.c.h.bf16 %v2183_v47 }
 0x10f   : > { %v1174_v5 = vmul.f32 %v2174_v43, %v864_v12  ;;  %1503 = vst [vmem:[%s2365_s12 + $0x18] sm:$0xff] %v1439_v0  ;;  %1535 = vst [vmem:[%s2365_s12 + $0x118] sm:$0xff] %v1471_v3  ;;  %v1217_v6 = vadd.f32 %v2180_v46, %v1141_v11  ;;  %v1249_v4 = vadd.f32 %v2180_v46, %v1173_v18  ;;  %v2721_v51 = vunpack.c.h.bf16 %v2186_v48 }
 0x110   : > { %v1143_v24 = vmul.f32 %v2178_v45, %v786_v17  ;;  %v1175_v10 = vmul.f32 %v2178_v45, %v866_v36  ;;  %v1376_v49 = vadd.f32 %v1312_v61, %v1216_v30  ;;  %v1408_v50 = vadd.f32 %v1344_v62, %v1248_v33 }
 0x111   : > { %v1218_v15 = vadd.f32 %v2176_v44, %v1142_v22  ;;  %v1250_v9 = vadd.f32 %v2176_v44, %v1174_v5  ;;  %v1377_v40 = vadd.f32 %v2720_v39, %v1217_v6  ;;  %v1409_v52 = vadd.f32 %v2721_v51, %v1249_v4 }
 0x112   : > { %v1219_v55 = vadd.f32 %v2180_v46, %v1143_v24  ;;  %v1251_v56 = vadd.f32 %v2180_v46, %v1175_v10  ;;  %v1440_v61 = vmax.f32 %v1376_v49, 0.0  ;;  %v1472_v41 = vmax.f32 %v1408_v50, 0.0 }
 0x113   : > { %v2722_v62 = vunpack.c.l.bf16 %v2193_v53  ;;  %v2723_v42 = vunpack.c.l.bf16 %v2196_v54  ;;  %v1441_v47 = vmax.f32 %v1377_v40, 0.0  ;;  %v1473_v0 = vmax.f32 %v1409_v52, 0.0  ;;  %v790_v63 = vpop.f32.mrb[8].mxu0  ;;  %v870_v12 = vpop.f32.mrb[8].mxu1 }
 0x114   : > { %v2724_v3 = vunpack.c.h.bf16 %v2193_v53  ;;  %v2725_v11 = vunpack.c.h.bf16 %v2196_v54  ;;  %1504 = vst [vmem:[%s2365_s12 + $0x20] sm:$0xff] %v1440_v61  ;;  %1536 = vst [vmem:[%s2365_s12 + $0x120] sm:$0xff] %v1472_v41  ;;  %v1144_v22 = vmul.f32 %v2174_v43, %v790_v63  ;;  %v1176_v5 = vmul.f32 %v2174_v43, %v870_v12  ;;  %v792_v17 = vpop.f32.mrb[9].mxu0  ;;  %v872_v36 = vpop.f32.mrb[9].mxu1 }
 0x115   : > { %v1378_v57 = vadd.f32 %v2722_v62, %v1218_v15  ;;  %v1410_v58 = vadd.f32 %v2723_v42, %v1250_v9  ;;  %1505 = vst [vmem:[%s2365_s12 + $0x28] sm:$0xff] %v1441_v47  ;;  %1537 = vst [vmem:[%s2365_s12 + $0x128] sm:$0xff] %v1473_v0  ;;  %v1145_v6 = vmul.f32 %v2178_v45, %v792_v17  ;;  %v794_v24 = vpop.f32.mrb[10].mxu0  ;;  %v874_v10 = vpop.f32.mrb[10].mxu1  ;;  %v2726_v61 = vunpack.c.l.bf16 %v2203_v59 }
 0x116   : > { %v1379_v48 = vadd.f32 %v2724_v3, %v1219_v55  ;;  %v1411_v18 = vadd.f32 %v2725_v11, %v1251_v56  ;;  %v1177_v4 = vmul.f32 %v2178_v45, %v872_v36  ;;  %v1220_v49 = vadd.f32 %v2176_v44, %v1144_v22  ;;  %v796_v39 = vpop.f32.mrb[11].mxu0  ;;  %v876_v40 = vpop.f32.mrb[11].mxu1 }
 0x117   : > { %v1442_v30 = vmax.f32 %v1378_v57, 0.0  ;;  %v1474_v33 = vmax.f32 %v1410_v58, 0.0  ;;  %v1252_v50 = vadd.f32 %v2176_v44, %v1176_v5  ;;  %v1146_v15 = vmul.f32 %v2174_v43, %v794_v24 }
 0x118   : > { %v1443_v53 = vmax.f32 %v1379_v48, 0.0  ;;  %v1475_v54 = vmax.f32 %v1411_v18, 0.0  ;;  %v1178_v9 = vmul.f32 %v2174_v43, %v874_v10  ;;  %v1221_v51 = vadd.f32 %v2180_v46, %v1145_v6 }
 0x119   : > { %1506 = vst [vmem:[%s2365_s12 + $0x30] sm:$0xff] %v1442_v30  ;;  %1538 = vst [vmem:[%s2365_s12 + $0x130] sm:$0xff] %v1474_v33  ;;  %v1253_v52 = vadd.f32 %v2180_v46, %v1177_v4  ;;  %v1147_v55 = vmul.f32 %v2178_v45, %v796_v39  ;;  %v1179_v56 = vmul.f32 %v2178_v45, %v876_v40  ;;  %v2727_v62 = vunpack.c.l.bf16 %v2206_v60 }
 0x11a   : > { %1507 = vst [vmem:[%s2365_s12 + $0x38] sm:$0xff] %v1443_v53  ;;  %1539 = vst [vmem:[%s2365_s12 + $0x138] sm:$0xff] %v1475_v54  ;;  %v1380_v41 = vadd.f32 %v2726_v61, %v1220_v49  ;;  %v1222_v42 = vadd.f32 %v2176_v44, %v1146_v15  ;;  %v1254_v58 = vadd.f32 %v2176_v44, %v1178_v9  ;;  %v2728_v47 = vunpack.c.h.bf16 %v2203_v59 }
 0x11b   : > { %v1412_v57 = vadd.f32 %v2727_v62, %v1252_v50  ;;  %v2729_v3 = vunpack.c.h.bf16 %v2206_v60  ;;  %v1223_v11 = vadd.f32 %v2180_v46, %v1147_v55  ;;  %v1255_v18 = vadd.f32 %v2180_v46, %v1179_v56  ;;  %v800_v6 = vpop.f32.mrb[12].mxu0  ;;  %v880_v4 = vpop.f32.mrb[12].mxu1 }
 0x11c   : > { %v1381_v0 = vadd.f32 %v2728_v47, %v1221_v51  ;;  %v1444_v63 = vmax.f32 %v1380_v41, 0.0  ;;  %v2730_v30 = vunpack.c.l.bf16 %v2213_v1  ;;  %v2731_v22 = vunpack.c.l.bf16 %v2216_v2  ;;  %v802_v15 = vpop.f32.mrb[13].mxu0  ;;  %v882_v9 = vpop.f32.mrb[13].mxu1 }
 0x11d   : > { %v1413_v48 = vadd.f32 %v2729_v3, %v1253_v52  ;;  %v1476_v12 = vmax.f32 %v1412_v57, 0.0  ;;  %v2732_v36 = vunpack.c.h.bf16 %v2213_v1  ;;  %v2733_v53 = vunpack.c.h.bf16 %v2216_v2  ;;  %v804_v51 = vpop.f32.mrb[14].mxu0  ;;  %v884_v52 = vpop.f32.mrb[14].mxu1 }
 0x11e   : > { %v1382_v33 = vadd.f32 %v2730_v30, %v1222_v42  ;;  %v1414_v5 = vadd.f32 %v2731_v22, %v1254_v58  ;;  %v1445_v59 = vmax.f32 %v1381_v0, 0.0  ;;  %1508 = vst [vmem:[%s2365_s12 + $0x40] sm:$0xff] %v1444_v63  ;;  %v1148_v49 = vmul.f32 %v2174_v43, %v800_v6  ;;  %v806_v62 = vpop.f32.mrb[15].mxu0  ;;  %v886_v57 = vpop.f32.mrb[15].mxu1 }
 0x11f   : > { %v1477_v17 = vmax.f32 %v1413_v48, 0.0  ;;  %v1383_v60 = vadd.f32 %v2732_v36, %v1223_v11  ;;  %v1415_v54 = vadd.f32 %v2733_v53, %v1255_v18  ;;  %1540 = vst [vmem:[%s2365_s12 + $0x140] sm:$0xff] %v1476_v12  ;;  %v1180_v50 = vmul.f32 %v2174_v43, %v880_v4 }
 0x120   : > { %v1446_v24 = vmax.f32 %v1382_v33, 0.0  ;;  %v1478_v10 = vmax.f32 %v1414_v5, 0.0  ;;  %1509 = vst [vmem:[%s2365_s12 + $0x48] sm:$0xff] %v1445_v59  ;;  %v1149_v39 = vmul.f32 %v2178_v45, %v802_v15  ;;  %v1181_v40 = vmul.f32 %v2178_v45, %v882_v9 }
 0x121   : > { %1541 = vst [vmem:[%s2365_s12 + $0x148] sm:$0xff] %v1477_v17  ;;  %v1447_v1 = vmax.f32 %v1383_v60, 0.0  ;;  %v1479_v2 = vmax.f32 %v1415_v54, 0.0  ;;  %v1224_v55 = vadd.f32 %v2176_v44, %v1148_v49  ;;  %v1256_v56 = vadd.f32 %v2176_v44, %v1180_v50 }
 0x122   : > { %1510 = vst [vmem:[%s2365_s12 + $0x50] sm:$0xff] %v1446_v24  ;;  %1542 = vst [vmem:[%s2365_s12 + $0x150] sm:$0xff] %v1478_v10  ;;  %v1150_v61 = vmul.f32 %v2174_v43, %v804_v51  ;;  %v1182_v41 = vmul.f32 %v2174_v43, %v884_v52  ;;  %v1225_v42 = vadd.f32 %v2180_v46, %v1149_v39  ;;  %v2734_v3 = vunpack.c.l.bf16 %v2223_v7 }
 0x123   : > { %1511 = vst [vmem:[%s2365_s12 + $0x58] sm:$0xff] %v1447_v1  ;;  %1543 = vst [vmem:[%s2365_s12 + $0x158] sm:$0xff] %v1479_v2  ;;  %v1257_v58 = vadd.f32 %v2180_v46, %v1181_v40  ;;  %v1151_v47 = vmul.f32 %v2178_v45, %v806_v62  ;;  %v1183_v0 = vmul.f32 %v2178_v45, %v886_v57  ;;  %v2735_v11 = vunpack.c.l.bf16 %v2226_v8  ;;  %v810_v15 = vpop.f32.mrb[16].mxu0  ;;  %v890_v9 = vpop.f32.mrb[16].mxu1 }
 0x124   : > { %v1384_v48 = vadd.f32 %v2734_v3, %v1224_v55  ;;  %v1226_v63 = vadd.f32 %v2176_v44, %v1150_v61  ;;  %v1258_v12 = vadd.f32 %v2176_v44, %v1182_v41  ;;  %v2736_v30 = vunpack.c.h.bf16 %v2223_v7  ;;  %v812_v51 = vpop.f32.mrb[17].mxu0  ;;  %v892_v52 = vpop.f32.mrb[17].mxu1 }
 0x125   : > { %v1416_v18 = vadd.f32 %v2735_v11, %v1256_v56  ;;  %v2737_v22 = vunpack.c.h.bf16 %v2226_v8  ;;  %v1227_v59 = vadd.f32 %v2180_v46, %v1151_v47  ;;  %v1259_v17 = vadd.f32 %v2180_v46, %v1183_v0  ;;  %v814_v61 = vpop.f32.mrb[18].mxu0  ;;  %v894_v41 = vpop.f32.mrb[18].mxu1 }
 0x126   : > { %v1385_v33 = vadd.f32 %v2736_v30, %v1225_v42  ;;  %v1448_v36 = vmax.f32 %v1384_v48, 0.0  ;;  %v2738_v53 = vunpack.c.l.bf16 %v2233_v13  ;;  %v2739_v6 = vunpack.c.l.bf16 %v2236_v14  ;;  %v816_v47 = vpop.f32.mrb[19].mxu0  ;;  %v896_v0 = vpop.f32.mrb[19].mxu1 }
 0x127   : > { %v1417_v5 = vadd.f32 %v2737_v22, %v1257_v58  ;;  %v1480_v60 = vmax.f32 %v1416_v18, 0.0  ;;  %v2740_v10 = vunpack.c.h.bf16 %v2233_v13  ;;  %v2741_v49 = vunpack.c.h.bf16 %v2236_v14 }
 0x128   : > { %v1386_v54 = vadd.f32 %v2738_v53, %v1226_v63  ;;  %v1418_v4 = vadd.f32 %v2739_v6, %v1258_v12  ;;  %v1449_v7 = vmax.f32 %v1385_v33, 0.0  ;;  %1512 = vst [vmem:[%s2365_s12 + $0x60] sm:$0xff] %v1448_v36  ;;  %v1152_v39 = vmul.f32 %v2174_v43, %v810_v15 }
 0x129   : > { %v1481_v24 = vmax.f32 %v1417_v5, 0.0  ;;  %v1387_v8 = vadd.f32 %v2740_v10, %v1227_v59  ;;  %v1419_v50 = vadd.f32 %v2741_v49, %v1259_v17  ;;  %1544 = vst [vmem:[%s2365_s12 + $0x160] sm:$0xff] %v1480_v60  ;;  %v1184_v40 = vmul.f32 %v2174_v43, %v890_v9 }
 0x12a   : > { %v1450_v1 = vmax.f32 %v1386_v54, 0.0  ;;  %v1482_v2 = vmax.f32 %v1418_v4, 0.0  ;;  %1513 = vst [vmem:[%s2365_s12 + $0x68] sm:$0xff] %v1449_v7  ;;  %v1153_v55 = vmul.f32 %v2178_v45, %v812_v51  ;;  %v1185_v56 = vmul.f32 %v2178_v45, %v892_v52 }
 0x12b   : > { %1545 = vst [vmem:[%s2365_s12 + $0x168] sm:$0xff] %v1481_v24  ;;  %v1451_v13 = vmax.f32 %v1387_v8, 0.0  ;;  %v1483_v14 = vmax.f32 %v1419_v50, 0.0  ;;  %v1228_v62 = vadd.f32 %v2176_v44, %v1152_v39  ;;  %v1260_v57 = vadd.f32 %v2176_v44, %v1184_v40 }
 0x12c   : > { %1514 = vst [vmem:[%s2365_s12 + $0x70] sm:$0xff] %v1450_v1  ;;  %1546 = vst [vmem:[%s2365_s12 + $0x170] sm:$0xff] %v1482_v2  ;;  %v1154_v42 = vmul.f32 %v2174_v43, %v814_v61  ;;  %v1186_v58 = vmul.f32 %v2174_v43, %v894_v41  ;;  %v1229_v3 = vadd.f32 %v2180_v46, %v1153_v55  ;;  %v2742_v63 = vunpack.c.l.bf16 %v2243_v19  ;;  %v820_v1 = vpop.f32.mrb[20].mxu0  ;;  %v900_v2 = vpop.f32.mrb[20].mxu1 }
 0x12d   : > { %1515 = vst [vmem:[%s2365_s12 + $0x78] sm:$0xff] %v1451_v13  ;;  %1547 = vst [vmem:[%s2365_s12 + $0x178] sm:$0xff] %v1483_v14  ;;  %v1261_v48 = vadd.f32 %v2180_v46, %v1185_v56  ;;  %v1155_v11 = vmul.f32 %v2178_v45, %v816_v47  ;;  %v1187_v18 = vmul.f32 %v2178_v45, %v896_v0  ;;  %v2743_v30 = vunpack.c.l.bf16 %v2246_v20  ;;  %v822_v13 = vpop.f32.mrb[21].mxu0  ;;  %v902_v14 = vpop.f32.mrb[21].mxu1 }
 0x12e   : > { %v1388_v12 = vadd.f32 %v2742_v63, %v1228_v62  ;;  %v1230_v22 = vadd.f32 %v2176_v44, %v1154_v42  ;;  %v1262_v5 = vadd.f32 %v2176_v44, %v1186_v58  ;;  %v2744_v59 = vunpack.c.h.bf16 %v2243_v19  ;;  %v824_v61 = vpop.f32.mrb[22].mxu0  ;;  %v904_v41 = vpop.f32.mrb[22].mxu1 }
 0x12f   : > { %v1420_v33 = vadd.f32 %v2743_v30, %v1260_v57  ;;  %v2745_v36 = vunpack.c.h.bf16 %v2246_v20  ;;  %v1231_v53 = vadd.f32 %v2180_v46, %v1155_v11  ;;  %v1263_v54 = vadd.f32 %v2180_v46, %v1187_v18  ;;  %v826_v47 = vpop.f32.mrb[23].mxu0  ;;  %v906_v0 = vpop.f32.mrb[23].mxu1 }
 0x130   : > { %v1389_v17 = vadd.f32 %v2744_v59, %v1229_v3  ;;  %v1452_v6 = vmax.f32 %v1388_v12, 0.0  ;;  %v2746_v7 = vunpack.c.l.bf16 %v2253_v25  ;;  %v2747_v10 = vunpack.c.l.bf16 %v2256_v26 }
 0x131   : > { %v1421_v60 = vadd.f32 %v2745_v36, %v1261_v48  ;;  %v1484_v4 = vmax.f32 %v1420_v33, 0.0  ;;  %v2748_v50 = vunpack.c.h.bf16 %v2253_v25  ;;  %v2749_v15 = vunpack.c.h.bf16 %v2256_v26 }
 0x132   : > { %v1390_v24 = vadd.f32 %v2746_v7, %v1230_v22  ;;  %v1422_v8 = vadd.f32 %v2747_v10, %v1262_v5  ;;  %v1453_v19 = vmax.f32 %v1389_v17, 0.0  ;;  %1516 = vst [vmem:[%s2365_s12 + $0x80] sm:$0xff] %v1452_v6  ;;  %v1156_v51 = vmul.f32 %v2174_v43, %v820_v1 }
 0x133   : > { %v1485_v49 = vmax.f32 %v1421_v60, 0.0  ;;  %v1391_v20 = vadd.f32 %v2748_v50, %v1231_v53  ;;  %v1423_v9 = vadd.f32 %v2749_v15, %v1263_v54  ;;  %1548 = vst [vmem:[%s2365_s12 + $0x180] sm:$0xff] %v1484_v4  ;;  %v1188_v52 = vmul.f32 %v2174_v43, %v900_v2  ;;  %v830_v15 = vpop.f32.mrb[24].mxu0 }
 0x134   : > { %v1454_v39 = vmax.f32 %v1390_v24, 0.0  ;;  %v1486_v40 = vmax.f32 %v1422_v8, 0.0  ;;  %1517 = vst [vmem:[%s2365_s12 + $0x88] sm:$0xff] %v1453_v19  ;;  %v1157_v55 = vmul.f32 %v2178_v45, %v822_v13  ;;  %v1189_v56 = vmul.f32 %v2178_v45, %v902_v14 }
 0x135   : > { %1549 = vst [vmem:[%s2365_s12 + $0x188] sm:$0xff] %v1485_v49  ;;  %v1455_v25 = vmax.f32 %v1391_v20, 0.0  ;;  %v1487_v26 = vmax.f32 %v1423_v9, 0.0  ;;  %v1232_v62 = vadd.f32 %v2176_v44, %v1156_v51  ;;  %v1264_v57 = vadd.f32 %v2176_v44, %v1188_v52  ;;  %v910_v9 = vpop.f32.mrb[24].mxu1  ;;  %v832_v51 = vpop.f32.mrb[25].mxu0 }
 0x136   : > { %1518 = vst [vmem:[%s2365_s12 + $0x90] sm:$0xff] %v1454_v39  ;;  %1550 = vst [vmem:[%s2365_s12 + $0x190] sm:$0xff] %v1486_v40  ;;  %v1158_v42 = vmul.f32 %v2174_v43, %v824_v61  ;;  %v1190_v58 = vmul.f32 %v2174_v43, %v904_v41  ;;  %v1233_v3 = vadd.f32 %v2180_v46, %v1157_v55  ;;  %v2750_v63 = vunpack.c.l.bf16 %v2263_v31  ;;  %v912_v52 = vpop.f32.mrb[25].mxu1 }
 0x137   : > { %1519 = vst [vmem:[%s2365_s12 + $0x98] sm:$0xff] %v1455_v25  ;;  %1551 = vst [vmem:[%s2365_s12 + $0x198] sm:$0xff] %v1487_v26  ;;  %v1265_v48 = vadd.f32 %v2180_v46, %v1189_v56  ;;  %v1159_v11 = vmul.f32 %v2178_v45, %v826_v47  ;;  %v1191_v18 = vmul.f32 %v2178_v45, %v906_v0  ;;  %v2751_v30 = vunpack.c.l.bf16 %v2266_v32  ;;  %v834_v25 = vpop.f32.mrb[26].mxu0  ;;  %v914_v26 = vpop.f32.mrb[26].mxu1 }
 0x138   : > { %v1392_v12 = vadd.f32 %v2750_v63, %v1232_v62  ;;  %v1234_v22 = vadd.f32 %v2176_v44, %v1158_v42  ;;  %v1266_v5 = vadd.f32 %v2176_v44, %v1190_v58  ;;  %v2752_v59 = vunpack.c.h.bf16 %v2263_v31  ;;  %v836_v62 = vpop.f32.mrb[27].mxu0 }
 0x139   : > { %v1424_v33 = vadd.f32 %v2751_v30, %v1264_v57  ;;  %v2753_v36 = vunpack.c.h.bf16 %v2266_v32  ;;  %v1235_v53 = vadd.f32 %v2180_v46, %v1159_v11  ;;  %v1267_v54 = vadd.f32 %v2180_v46, %v1191_v18  ;;  %v916_v57 = vpop.f32.mrb[27].mxu1 }
 0x13a   : > { %v1393_v17 = vadd.f32 %v2752_v59, %v1233_v3  ;;  %v1456_v6 = vmax.f32 %v1392_v12, 0.0  ;;  %v2754_v7 = vunpack.c.l.bf16 %v2273_v37  ;;  %v2755_v10 = vunpack.c.l.bf16 %v2276_v38 }
 0x13b   : > { %v1425_v60 = vadd.f32 %v2753_v36, %v1265_v48  ;;  %v1488_v4 = vmax.f32 %v1424_v33, 0.0  ;;  %v2756_v49 = vunpack.c.h.bf16 %v2273_v37  ;;  %v2757_v50 = vunpack.c.h.bf16 %v2276_v38 }
 0x13c   : > { %v1394_v24 = vadd.f32 %v2754_v7, %v1234_v22  ;;  %v1426_v8 = vadd.f32 %v2755_v10, %v1266_v5  ;;  %v1457_v31 = vmax.f32 %v1393_v17, 0.0  ;;  %1520 = vst [vmem:[%s2365_s12 + $0xa0] sm:$0xff] %v1456_v6  ;;  %v1160_v39 = vmul.f32 %v2174_v43, %v830_v15 }
 0x13d   : > { %v1489_v19 = vmax.f32 %v1425_v60, 0.0  ;;  %v1395_v32 = vadd.f32 %v2756_v49, %v1235_v53  ;;  %v1427_v20 = vadd.f32 %v2757_v50, %v1267_v54  ;;  %1552 = vst [vmem:[%s2365_s12 + $0x1a0] sm:$0xff] %v1488_v4  ;;  %v1192_v40 = vmul.f32 %v2174_v43, %v910_v9 }
 0x13e   : > { %v1458_v1 = vmax.f32 %v1394_v24, 0.0  ;;  %v1490_v2 = vmax.f32 %v1426_v8, 0.0  ;;  %1521 = vst [vmem:[%s2365_s12 + $0xa8] sm:$0xff] %v1457_v31  ;;  %v1161_v13 = vmul.f32 %v2178_v45, %v832_v51  ;;  %v1193_v14 = vmul.f32 %v2178_v45, %v912_v52  ;;  %v840_v31 = vpop.f32.mrb[28].mxu0 }
 0x13f   : > { %1553 = vst [vmem:[%s2365_s12 + $0x1a8] sm:$0xff] %v1489_v19  ;;  %v1459_v37 = vmax.f32 %v1395_v32, 0.0  ;;  %v1491_v38 = vmax.f32 %v1427_v20, 0.0  ;;  %v1236_v55 = vadd.f32 %v2176_v44, %v1160_v39  ;;  %v1268_v56 = vadd.f32 %v2176_v44, %v1192_v40  ;;  %v920_v19 = vpop.f32.mrb[28].mxu1  ;;  %v842_v15 = vpop.f32.mrb[29].mxu0 }
 0x140   : > { %1522 = vst [vmem:[%s2365_s12 + $0xb0] sm:$0xff] %v1458_v1  ;;  %1554 = vst [vmem:[%s2365_s12 + $0x1b0] sm:$0xff] %v1490_v2  ;;  %v1162_v61 = vmul.f32 %v2174_v43, %v834_v25  ;;  %v1194_v41 = vmul.f32 %v2174_v43, %v914_v26  ;;  %v1237_v42 = vadd.f32 %v2180_v46, %v1161_v13  ;;  %v2758_v3 = vunpack.c.l.bf16 %v2283_v34  ;;  %v922_v9 = vpop.f32.mrb[29].mxu1  ;;  %v844_v39 = vpop.f32.mrb[30].mxu0 }
 0x141   : > { %1523 = vst [vmem:[%s2365_s12 + $0xb8] sm:$0xff] %v1459_v37  ;;  %1555 = vst [vmem:[%s2365_s12 + $0x1b8] sm:$0xff] %v1491_v38  ;;  %v1269_v58 = vadd.f32 %v2180_v46, %v1193_v14  ;;  %v1163_v47 = vmul.f32 %v2178_v45, %v836_v62  ;;  %v1195_v0 = vmul.f32 %v2178_v45, %v916_v57  ;;  %v2759_v11 = vunpack.c.l.bf16 %v2286_v27  ;;  %v924_v40 = vpop.f32.mrb[30].mxu1  ;;  %v846_v13 = vpop.f32.mrb[31].mxu0 }
 0x142   : > { %v1396_v48 = vadd.f32 %v2758_v3, %v1236_v55  ;;  %v1238_v63 = vadd.f32 %v2176_v44, %v1162_v61  ;;  %v1270_v12 = vadd.f32 %v2176_v44, %v1194_v41  ;;  %v2760_v30 = vunpack.c.h.bf16 %v2283_v34  ;;  %v926_v14 = vpop.f32.mrb[31].mxu1 }
 0x143   : > { %v1428_v18 = vadd.f32 %v2759_v11, %v1268_v56  ;;  %v2761_v22 = vunpack.c.h.bf16 %v2286_v27  ;;  %v1239_v59 = vadd.f32 %v2180_v46, %v1163_v47  ;;  %v1271_v17 = vadd.f32 %v2180_v46, %v1195_v0 }
 0x144   : > { %v1397_v33 = vadd.f32 %v2760_v30, %v1237_v42  ;;  %v1460_v36 = vmax.f32 %v1396_v48, 0.0  ;;  %v2762_v53 = vunpack.c.l.bf16 %v2293_v29  ;;  %v2763_v6 = vunpack.c.l.bf16 %v2296_v23 }
 0x145   : > { %v1429_v5 = vadd.f32 %v2761_v22, %v1269_v58  ;;  %v1492_v60 = vmax.f32 %v1428_v18, 0.0  ;;  %v2764_v24 = vunpack.c.h.bf16 %v2293_v29  ;;  %v2765_v10 = vunpack.c.h.bf16 %v2296_v23 }
 0x146   : > { %v1398_v54 = vadd.f32 %v2762_v53, %v1238_v63  ;;  %v1430_v4 = vadd.f32 %v2763_v6, %v1270_v12  ;;  %v1461_v34 = vmax.f32 %v1397_v33, 0.0  ;;  %1524 = vst [vmem:[%s2365_s12 + $0xc0] sm:$0xff] %v1460_v36  ;;  %v1164_v50 = vmul.f32 %v2174_v43, %v840_v31 }
 0x147   : > { %v1493_v7 = vmax.f32 %v1429_v5, 0.0  ;;  %v1399_v27 = vadd.f32 %v2764_v24, %v1239_v59  ;;  %v1431_v8 = vadd.f32 %v2765_v10, %v1271_v17  ;;  %1556 = vst [vmem:[%s2365_s12 + $0x1c0] sm:$0xff] %v1492_v60  ;;  %v1196_v20 = vmul.f32 %v2174_v43, %v920_v19 }
 0x148   : > { %v1462_v49 = vmax.f32 %v1398_v54, 0.0  ;;  %v1494_v32 = vmax.f32 %v1430_v4, 0.0  ;;  %1525 = vst [vmem:[%s2365_s12 + $0xc8] sm:$0xff] %v1461_v34  ;;  %v1165_v1 = vmul.f32 %v2178_v45, %v842_v15  ;;  %v1197_v2 = vmul.f32 %v2178_v45, %v922_v9 }
 0x149   : > { %1557 = vst [vmem:[%s2365_s12 + $0x1c8] sm:$0xff] %v1493_v7  ;;  %v1463_v23 = vmax.f32 %v1399_v27, 0.0  ;;  %v1495_v29 = vmax.f32 %v1431_v8, 0.0  ;;  %v1240_v51 = vadd.f32 %v2176_v44, %v1164_v50  ;;  %v1272_v52 = vadd.f32 %v2176_v44, %v1196_v20 }
 0x14a   : > { %1526 = vst [vmem:[%s2365_s12 + $0xd0] sm:$0xff] %v1462_v49  ;;  %1558 = vst [vmem:[%s2365_s12 + $0x1d0] sm:$0xff] %v1494_v32  ;;  %v1166_v37 = vmul.f32 %v2174_v43, %v844_v39  ;;  %v1198_v38 = vmul.f32 %v2174_v43, %v924_v40  ;;  %v1241_v25 = vadd.f32 %v2180_v46, %v1165_v1  ;;  %v2766_v61 = vunpack.c.l.bf16 %v2303_v21 }
 0x14b   : > { %1527 = vst [vmem:[%s2365_s12 + $0xd8] sm:$0xff] %v1463_v23  ;;  %1559 = vst [vmem:[%s2365_s12 + $0x1d8] sm:$0xff] %v1495_v29  ;;  %v1273_v26 = vadd.f32 %v2180_v46, %v1197_v2  ;;  %v1167_v55 = vmul.f32 %v2178_v45, %v846_v13  ;;  %v1199_v56 = vmul.f32 %v2178_v45, %v926_v14  ;;  %v2767_v62 = vunpack.c.l.bf16 %v2306_v35 }
 0x14c   : > { %v1400_v41 = vadd.f32 %v2766_v61, %v1240_v51  ;;  %v1242_v57 = vadd.f32 %v2176_v44, %v1166_v37  ;;  %v1274_v42 = vadd.f32 %v2176_v44, %v1198_v38  ;;  %v2768_v58 = vunpack.c.h.bf16 %v2303_v21 }
 0x14d   : > { %v1432_v43 = vadd.f32 %v2767_v62, %v1272_v52  ;;  %v2769_v0 = vunpack.c.h.bf16 %v2306_v35  ;;  %v1243_v45 = vadd.f32 %v2180_v46, %v1167_v55  ;;  %v1275_v48 = vadd.f32 %v2180_v46, %v1199_v56 }
 0x14e   : > { %v1401_v47 = vadd.f32 %v2768_v58, %v1241_v25  ;;  %v1464_v11 = vmax.f32 %v1400_v41, 0.0  ;;  %v2770_v63 = vunpack.c.l.bf16 %v2313_v28  ;;  %v2771_v21 = vunpack.c.l.bf16 %v2316_v16 }
 0x14f   : > { %v1433_v3 = vadd.f32 %v2769_v0, %v1273_v26  ;;  %v1496_v18 = vmax.f32 %v1432_v43, 0.0  ;;  %v2772_v33 = vunpack.c.h.bf16 %v2313_v28  ;;  %v2773_v22 = vunpack.c.h.bf16 %v2316_v16 }
 0x150   : > { %v1402_v44 = vadd.f32 %v2770_v63, %v1242_v57  ;;  %v1434_v12 = vadd.f32 %v2771_v21, %v1274_v42  ;;  %v1465_v35 = vmax.f32 %v1401_v47, 0.0  ;;  %1528 = vst [vmem:[%s2365_s12 + $0xe0] sm:$0xff] %v1464_v11 }
 0x151   : > { %v1497_v30 = vmax.f32 %v1433_v3, 0.0  ;;  %v1403_v46 = vadd.f32 %v2772_v33, %v1243_v45  ;;  %v1435_v5 = vadd.f32 %v2773_v22, %v1275_v48  ;;  %1560 = vst [vmem:[%s2365_s12 + $0x1e0] sm:$0xff] %v1496_v18 }
 0x152   : > { %v1466_v59 = vmax.f32 %v1402_v44, 0.0  ;;  %v1498_v17 = vmax.f32 %v1434_v12, 0.0  ;;  %1529 = vst [vmem:[%s2365_s12 + $0xe8] sm:$0xff] %v1465_v35 }
 0x153   : > { %1561 = vst [vmem:[%s2365_s12 + $0x1e8] sm:$0xff] %v1497_v30  ;;  %v1467_v16 = vmax.f32 %v1403_v46, 0.0  ;;  %v1499_v28 = vmax.f32 %v1435_v5, 0.0 }
 0x154   : > { %1530 = vst [vmem:[%s2365_s12 + $0xf0] sm:$0xff] %v1466_v59  ;;  %1562 = vst [vmem:[%s2365_s12 + $0x1f0] sm:$0xff] %v1498_v17 }
 0x155   : > { %1531 = vst [vmem:[%s2365_s12 + $0xf8] sm:$0xff] %v1467_v16  ;;  %1563 = vst [vmem:[%s2365_s12 + $0x1f8] sm:$0xff] %v1499_v28 }
 0x156   : > { %1905 = shalt.err (!%p1902_p5)
}
 0x157   : > { %s1906_s11 = scalar_lea.hbm %s2654_s16, 8192  ;;  %s1910_s8 = scalar_lea.hbm %s2717_s5, 16384 }
 0x158   : > { %p1907_p6 = scmp.ne.s32.totalorder %s2654_s16, %s1906_s11  ;;  %p1911_p10 = scmp.lt.u32.totalorder %s2654_s16, %s2717_s5 }
 0x159   : > { %p1912_p11 = scmp.lt.u32.totalorder %s1910_s8, %s1906_s11  ;;  %p1914_p13 = scmp.lt.u32.totalorder %s1906_s11, %s2654_s16 }
 0x15a   : > { %p1908_p7 = pnand %p1907_p6, %p2046_p4 }
 0x15b   : > { %p1913_p12 = por %p1912_p11, %p1911_p10 }
 0x15c   : > { %p1909_p9 = pneg %p1908_p7 }
 0x15d   : > { %p1915_p0 = por %p1914_p13, %p1913_p12 }
 0x15f   : > { %p1916_p1 = pnand %p1915_p0, %p1909_p9 }
 0x161   : > { %1919 = shalt.err (!%p1916_p1)
}
 0x162   : > { %s1974_s13 = smov 256   ;;  %s1975_s21 = smov 16  }
 0x163   : > { %1794 = dma.vmem_to_hbm [thread:$0]  (%p2046_p4), %s2656_s14, 8192, %s2654_s16, %s2666_s17, %s1974_s13, %s1974_s13, %s1975_s21  }
 0x164 PF: > { %p1800_p2 = scmp.ge.s32.totalorder %s1970_s23, 2  ;;  %s1596_s15 = sand.u32 1, %s1950_s18  }
 0x165   : > { %s1597_s24 = scalar_lea.sflag [#allocation4], %s1596_s15 }
 0x166   : > { %p1797_p3 = pnand %p1800_p2, %p2053_p8 }
 0x168   : > { %1945 = dma.done.wait (!%p1797_p3), %s1597_s24, 8192  }
 0x169   : > { %1947 = vsyncadd (!%p1797_p3), %s1597_s24, 4294959104  ;;  %s18_s23 = sadd.s32 1, %s1970_s23   ;;  %s2774_s18 = smov %s1954_s19 }
 0x16a   : > { %p15_p5 = scmp.ge.s32.totalorder %s18_s23, 4   ;;  %s2775_s19 = smov %s1958_s20 }
 0x16b   : > { %s2776_s20 = smov %s2059_s6  ;;  %s2777_s21 = smov %s1966_s22 }
 0x16c   : > { %s2778_s22 = smov %s2780_s26  ;;  %17 = sbr.rel (!%p15_p5) target bundleno = 4 (0x4), region = 95 }
 0x173   :  { %1602 = vsyncpa [#allocation4], 1 }
 0x174   :  { %1604 = vsyncpa [#allocation4 + $0x1], 1 }

</bundles_post_ra>
